<compile_context>
chip_gen: v6e
topology: v6e:2x2x1
jax: 0.10.0
libtpu: 0.0.40
codegen_flags: <defaults>
</compile_context>

<pallas_src>
import jax
import jax.numpy as jnp
from jax.experimental import pallas as pl
from jax.experimental.pallas import tpu as pltpu  # noqa: F401  (kept for optional CompilerParams)

# ---- small, DistilBERT-shaped config (scaled down, classifier D -> 9) -------
B = 2            # batch
S = 8            # sequence length
D = 128          # hidden size (768 in the original)
H = 4            # attention heads
DH = D // H      # per-head dim
FFN = 256        # FFN hidden dim
L = 2            # number of transformer layers
VOCAB = 64
MAX_POS = 16
N_CLASSES = 9
N_PAD = 128      # lane-dense padded classifier width
LN_EPS = 1e-12   # DistilBERT LayerNorm eps
BS = B * S


def _layer_norm(x, gamma, beta):
    mu = jnp.mean(x, axis=-1, keepdims=True)
    var = jnp.mean((x - mu) ** 2, axis=-1, keepdims=True)
    return (x - mu) * jax.lax.rsqrt(var + LN_EPS) * gamma + beta


def _gelu(x):
    # tanh-approximate GELU (EUP tanh), computed in f32.
    # TODO(synk): HF DistilBERT uses the exact erf-based GELU; tanh approx used here.
    c = jnp.float32(0.7978845608028654)  # sqrt(2/pi)
    return 0.5 * x * (1.0 + jnp.tanh(c * (x + 0.044715 * x * x * x)))


def _doccls_kernel(
    x_ref,              # (B, S, D)  word+pos embedding sum (pre-LayerNorm), f32
    eg_ref, eb_ref,     # (1, D) embedding LayerNorm gamma / beta, f32
    wqkv_ref,           # (L, D, 3*D)  fused QKV weights (Q|K|V lane blocks), bf16
    bqkv_ref,           # (L, 1, 3*D)  fused QKV biases, f32
    wo_ref, bo_ref,     # (L, D, D) bf16, (L, D) f32
    g1_ref, be1_ref,    # (L, D) post-attention LayerNorm, f32
    w1_ref, b1_ref,     # (L, D, FFN) bf16, (L, FFN) f32
    w2_ref, b2_ref,     # (L, FFN, D) bf16, (L, D) f32
    g2_ref, be2_ref,    # (L, D) post-FFN LayerNorm, f32
    wc_ref, bc_ref,     # (D, N_PAD) bf16 (zero-padded), (1, N_PAD) f32
    out_ref,            # (B, N_PAD)  padded [CLS] logits
):
    bf16 = jnp.bfloat16
    f32 = jnp.float32

    # All docs processed together as one (B*S, D) = (16, 128) slab.
    x = x_ref[...].reshape(BS, D)                               # f32

    # DistilBERT embedding LayerNorm (dropout is identity in eval mode).
    x = _layer_norm(x, eg_ref[...], eb_ref[...])
    # TODO(synk): no attention/padding mask applied (toy inputs have no padding).

    def to_heads(m):    # (BS, H*DH) -> (H*B, S, DH), single leading batch dim
        return jnp.stack([m[:, h * DH:(h + 1) * DH] for h in range(H)],
                         axis=0).reshape(H * B, S, DH)

    def from_heads(c):  # (H*B, S, DH) -> (BS, H*DH) lane-dense slab
        return jnp.concatenate(
            [c[h * B:(h + 1) * B].reshape(BS, DH) for h in range(H)], axis=-1)

    for l in range(L):  # static unroll over layers
        # Hoist per-layer parameter loads once.
        wqkv_l = wqkv_ref[l]                                    # (D, 3D) bf16
        bqkv_l = bqkv_ref[l]                                    # (1, 3D) f32
        wo_l = wo_ref[l]                                        # (D, D)  bf16
        bo_l = bo_ref[l]                                        # (D,)    f32
        g1_l, be1_l = g1_ref[l], be1_ref[l]
        w1_l, b1_l = w1_ref[l], b1_ref[l]
        w2_l, b2_l = w2_ref[l], b2_ref[l]
        g2_l, be2_l = g2_ref[l], be2_ref[l]

        # ---- fused QKV projection: one (16,128)@(128,384) matmul ------------
        qkv = (jnp.dot(x.astype(bf16), wqkv_l,
                       preferred_element_type=f32) + bqkv_l).astype(bf16)
        # 1/sqrt(DH) query scale is already folded into the Q block in the wrapper.
        q = to_heads(qkv[:, 0:D])                               # (B*H, S, DH)
        k = to_heads(qkv[:, D:2 * D])
        v = to_heads(qkv[:, 2 * D:3 * D])

        # ---- attention batched over n = B*H ----------------------------------
        scores = jnp.einsum('nqd,nkd->nqk', q, k,
                            preferred_element_type=f32)         # (B*H, S, S)
        scores = scores - jnp.max(scores, axis=-1, keepdims=True)
        p = jnp.exp(scores)
        p = p * pl.reciprocal(jnp.sum(p, axis=-1, keepdims=True), approx=True)

        ctx = jnp.einsum('nqk,nkd->nqd', p.astype(bf16), v,
                         preferred_element_type=f32)            # (B*H, S, DH)

        # ---- output projection: single full-contraction (16,128)@(128,128) ---
        ctx2d = from_heads(ctx)                                 # (BS, 128) f32
        attn = jnp.dot(ctx2d.astype(bf16), wo_l,
                       preferred_element_type=f32) + bo_l       # (BS, D)

        x = _layer_norm(attn + x, g1_l, be1_l)

        # ---- feed-forward -----------------------------------------------------
        h1 = jnp.dot(x.astype(bf16), w1_l,
                     preferred_element_type=f32) + b1_l         # (BS, FFN)
        h1 = _gelu(h1)
        h2 = jnp.dot(h1.astype(bf16), w2_l,
                     preferred_element_type=f32) + b2_l         # (BS, D)
        x = _layer_norm(h2 + x, g2_l, be2_l)

    # ---- classifier on [CLS] rows only (rows b*S), lane-dense (B, 128) slab --
    cls = jnp.concatenate([x[b * S:b * S + 1, :] for b in range(B)], axis=0)
    logits = jnp.dot(cls.astype(bf16), wc_ref[...],
                     preferred_element_type=f32) + bc_ref[...]  # (B, N_PAD)
    out_ref[...] = logits


def init_params(key):
    std = 0.02
    ks = jax.random.split(key, 16)
    return {
        'word_emb': jax.random.normal(ks[0], (VOCAB, D), jnp.float32) * std,
        'pos_emb':  jax.random.normal(ks[1], (MAX_POS, D), jnp.float32) * std,
        'emb_g':    jnp.ones((1, D), jnp.float32),
        'emb_b':    jnp.zeros((1, D), jnp.float32),
        'wq': jax.random.normal(ks[2], (L, D, D), jnp.float32) * std,
        'bq': jnp.zeros((L, D), jnp.float32),
        'wk': jax.random.normal(ks[3], (L, D, D), jnp.float32) * std,
        'bk': jnp.zeros((L, D), jnp.float32),
        'wv': jax.random.normal(ks[4], (L, D, D), jnp.float32) * std,
        'bv': jnp.zeros((L, D), jnp.float32),
        'wo': jax.random.normal(ks[5], (L, D, D), jnp.float32) * std,
        'bo': jnp.zeros((L, D), jnp.float32),
        'g1': jnp.ones((L, D), jnp.float32),
        'be1': jnp.zeros((L, D), jnp.float32),
        'w1': jax.random.normal(ks[6], (L, D, FFN), jnp.float32) * std,
        'b1': jnp.zeros((L, FFN), jnp.float32),
        'w2': jax.random.normal(ks[7], (L, FFN, D), jnp.float32) * std,
        'b2': jnp.zeros((L, D), jnp.float32),
        'g2': jnp.ones((L, D), jnp.float32),
        'be2': jnp.zeros((L, D), jnp.float32),
        'wc': jax.random.normal(ks[8], (D, N_CLASSES), jnp.float32) * std,
        'bc': jnp.zeros((1, N_CLASSES), jnp.float32),
    }


def prepare_params(p):
    """Repack params into the kernel layout (done once, plain JAX)."""
    scale = jnp.float32(1.0 / (DH ** 0.5))

    # Q|K|V as contiguous 128-lane blocks; query scale folded into Q weights/bias.
    wqkv = jnp.concatenate([p['wq'] * scale, p['wk'], p['wv']], axis=-1)  # (L, D, 3D)
    bqkv = jnp.concatenate([p['bq'] * scale, p['bk'], p['bv']],
                           axis=-1)[:, None, :]                            # (L, 1, 3D)

    wc_pad = jnp.zeros((D, N_PAD), jnp.float32).at[:, :N_CLASSES].set(p['wc'])
    bc_pad = jnp.zeros((1, N_PAD), jnp.float32).at[:, :N_CLASSES].set(p['bc'])

    bf16 = jnp.bfloat16
    return {
        'word_emb': p['word_emb'], 'pos_emb': p['pos_emb'],
        'emb_g': p['emb_g'], 'emb_b': p['emb_b'],
        'wqkv': wqkv.astype(bf16), 'bqkv': bqkv,
        'wo': p['wo'].astype(bf16), 'bo': p['bo'],
        'g1': p['g1'], 'be1': p['be1'],
        'w1': p['w1'].astype(bf16), 'b1': p['b1'],
        'w2': p['w2'].astype(bf16), 'b2': p['b2'],
        'g2': p['g2'], 'be2': p['be2'],
        'wc': wc_pad.astype(bf16), 'bc': bc_pad,
    }


@jax.jit
def doccls_forward(token_ids, kp):
    # Embedding gather (glue, plain JAX): word + learned positional embeddings.
    pos = jnp.arange(S, dtype=jnp.int32)
    x_emb = (jnp.take(kp['word_emb'], token_ids, axis=0)
             + jnp.take(kp['pos_emb'], pos, axis=0)[None, :, :])  # (B, S, D) f32

    # Single invocation (no grid): all B documents processed together; every
    # operand lands fully in VMEM (total footprint < 1 MiB on all generations).
    logits_pad = pl.pallas_call(
        _doccls_kernel,
        out_shape=jax.ShapeDtypeStruct((B, N_PAD), jnp.float32),
    )(x_emb, kp['emb_g'], kp['emb_b'], kp['wqkv'], kp['bqkv'],
      kp['wo'], kp['bo'], kp['g1'], kp['be1'], kp['w1'], kp['b1'],
      kp['w2'], kp['b2'], kp['g2'], kp['be2'], kp['wc'], kp['bc'])

    # First N_CLASSES columns of the padded [CLS] logits slab.
    return logits_pad[:, :N_CLASSES]


if __name__ == "__main__":
    key = jax.random.PRNGKey(0)
    k_tok, k_par = jax.random.split(key)
    token_ids = jax.random.randint(k_tok, (B, S), 0, VOCAB, dtype=jnp.int32)
    params = init_params(k_par)
    kparams = prepare_params(params)

    logits = doccls_forward(token_ids, kparams)
    jax.block_until_ready(logits)
    assert logits.shape == (B, N_CLASSES) and logits.dtype == jnp.float32
    print("KERNEL_OK")
</pallas_src>

<mosaic_0001>
module attributes {stable_mosaic.version = 11 : i64} {
  func.func @_doccls_kernel(%arg0: memref<2x8x128xf32, #tpu.memory_space<vmem>>, %arg1: memref<1x128xf32, #tpu.memory_space<vmem>>, %arg2: memref<1x128xf32, #tpu.memory_space<vmem>>, %arg3: memref<2x128x384xbf16, #tpu.memory_space<vmem>>, %arg4: memref<2x1x384xf32, #tpu.memory_space<vmem>>, %arg5: memref<2x128x128xbf16, #tpu.memory_space<vmem>>, %arg6: memref<2x128xf32, #tpu.memory_space<vmem>>, %arg7: memref<2x128xf32, #tpu.memory_space<vmem>>, %arg8: memref<2x128xf32, #tpu.memory_space<vmem>>, %arg9: memref<2x128x256xbf16, #tpu.memory_space<vmem>>, %arg10: memref<2x256xf32, #tpu.memory_space<vmem>>, %arg11: memref<2x256x128xbf16, #tpu.memory_space<vmem>>, %arg12: memref<2x128xf32, #tpu.memory_space<vmem>>, %arg13: memref<2x128xf32, #tpu.memory_space<vmem>>, %arg14: memref<2x128xf32, #tpu.memory_space<vmem>>, %arg15: memref<128x128xbf16, #tpu.memory_space<vmem>>, %arg16: memref<1x128xf32, #tpu.memory_space<vmem>>, %arg17: memref<2x128xf32, #tpu.memory_space<vmem>>) attributes {dimension_semantics = [], scalar_prefetch = 0 : i64, scratch_operands = 0 : i64, tpu.core_type = #tpu.core_type<tc>} {
    %c0 = arith.constant 0 : index
    %c0_0 = arith.constant 0 : index
    %c0_1 = arith.constant 0 : index
    %0 = vector.load %arg0[%c0, %c0_0, %c0_1] : memref<2x8x128xf32, #tpu.memory_space<vmem>>, vector<2x8x128xf32>
    %1 = vector.shape_cast %0 : vector<2x8x128xf32> to vector<16x128xf32>
    %c0_2 = arith.constant 0 : index
    %c0_3 = arith.constant 0 : index
    %2 = vector.load %arg1[%c0_2, %c0_3] : memref<1x128xf32, #tpu.memory_space<vmem>>, vector<1x128xf32>
    %c0_4 = arith.constant 0 : index
    %c0_5 = arith.constant 0 : index
    %3 = vector.load %arg2[%c0_4, %c0_5] : memref<1x128xf32, #tpu.memory_space<vmem>>, vector<1x128xf32>
    %cst = arith.constant dense<0.000000e+00> : vector<16xf32>
    %4 = vector.multi_reduction <add>, %1, %cst [1] : vector<16x128xf32> to vector<16xf32>
    %5 = vector.shape_cast %4 : vector<16xf32> to vector<16x1xf32>
    %cst_6 = arith.constant 1.280000e+02 : f32
    %6 = vector.broadcast %cst_6 : f32 to vector<16x1xf32>
    %7 = arith.divf %5, %6 : vector<16x1xf32>
    %8 = vector.broadcast %7 : vector<16x1xf32> to vector<16x128xf32>
    %9 = arith.subf %1, %8 : vector<16x128xf32>
    %10 = arith.mulf %9, %9 : vector<16x128xf32>
    %cst_7 = arith.constant dense<0.000000e+00> : vector<16xf32>
    %11 = vector.multi_reduction <add>, %10, %cst_7 [1] : vector<16x128xf32> to vector<16xf32>
    %12 = vector.shape_cast %11 : vector<16xf32> to vector<16x1xf32>
    %cst_8 = arith.constant 1.280000e+02 : f32
    %13 = vector.broadcast %cst_8 : f32 to vector<16x1xf32>
    %14 = arith.divf %12, %13 : vector<16x1xf32>
    %15 = vector.broadcast %7 : vector<16x1xf32> to vector<16x128xf32>
    %16 = arith.subf %1, %15 : vector<16x128xf32>
    %cst_9 = arith.constant 9.99999996E-13 : f32
    %17 = vector.broadcast %cst_9 : f32 to vector<16x1xf32>
    %18 = arith.addf %14, %17 : vector<16x1xf32>
    %19 = math.rsqrt %18 : vector<16x1xf32>
    %20 = vector.broadcast %19 : vector<16x1xf32> to vector<16x128xf32>
    %21 = arith.mulf %16, %20 : vector<16x128xf32>
    %22 = vector.broadcast %2 : vector<1x128xf32> to vector<16x128xf32>
    %23 = arith.mulf %21, %22 : vector<16x128xf32>
    %24 = vector.broadcast %3 : vector<1x128xf32> to vector<16x128xf32>
    %25 = arith.addf %23, %24 : vector<16x128xf32>
    %c0_10 = arith.constant 0 : index
    %c0_11 = arith.constant 0 : index
    %c0_12 = arith.constant 0 : index
    %26 = vector.load %arg3[%c0_10, %c0_11, %c0_12] : memref<2x128x384xbf16, #tpu.memory_space<vmem>>, vector<1x128x384xbf16>
    %27 = vector.shape_cast %26 : vector<1x128x384xbf16> to vector<128x384xbf16>
    %c0_13 = arith.constant 0 : index
    %c0_14 = arith.constant 0 : index
    %c0_15 = arith.constant 0 : index
    %28 = vector.load %arg4[%c0_13, %c0_14, %c0_15] : memref<2x1x384xf32, #tpu.memory_space<vmem>>, vector<1x1x384xf32>
    %29 = vector.shape_cast %28 : vector<1x1x384xf32> to vector<1x384xf32>
    %c0_16 = arith.constant 0 : index
    %c0_17 = arith.constant 0 : index
    %c0_18 = arith.constant 0 : index
    %30 = vector.load %arg5[%c0_16, %c0_17, %c0_18] : memref<2x128x128xbf16, #tpu.memory_space<vmem>>, vector<1x128x128xbf16>
    %31 = vector.shape_cast %30 : vector<1x128x128xbf16> to vector<128x128xbf16>
    %c0_19 = arith.constant 0 : index
    %c0_20 = arith.constant 0 : index
    %32 = vector.load %arg6[%c0_19, %c0_20] : memref<2x128xf32, #tpu.memory_space<vmem>>, vector<1x128xf32>
    %33 = vector.shape_cast %32 : vector<1x128xf32> to vector<128xf32>
    %c0_21 = arith.constant 0 : index
    %c0_22 = arith.constant 0 : index
    %34 = vector.load %arg7[%c0_21, %c0_22] : memref<2x128xf32, #tpu.memory_space<vmem>>, vector<1x128xf32>
    %35 = vector.shape_cast %34 : vector<1x128xf32> to vector<128xf32>
    %c0_23 = arith.constant 0 : index
    %c0_24 = arith.constant 0 : index
    %36 = vector.load %arg8[%c0_23, %c0_24] : memref<2x128xf32, #tpu.memory_space<vmem>>, vector<1x128xf32>
    %37 = vector.shape_cast %36 : vector<1x128xf32> to vector<128xf32>
    %c0_25 = arith.constant 0 : index
    %c0_26 = arith.constant 0 : index
    %c0_27 = arith.constant 0 : index
    %38 = vector.load %arg9[%c0_25, %c0_26, %c0_27] : memref<2x128x256xbf16, #tpu.memory_space<vmem>>, vector<1x128x256xbf16>
    %39 = vector.shape_cast %38 : vector<1x128x256xbf16> to vector<128x256xbf16>
    %c0_28 = arith.constant 0 : index
    %c0_29 = arith.constant 0 : index
    %40 = vector.load %arg10[%c0_28, %c0_29] : memref<2x256xf32, #tpu.memory_space<vmem>>, vector<1x256xf32>
    %41 = vector.shape_cast %40 : vector<1x256xf32> to vector<256xf32>
    %c0_30 = arith.constant 0 : index
    %c0_31 = arith.constant 0 : index
    %c0_32 = arith.constant 0 : index
    %42 = vector.load %arg11[%c0_30, %c0_31, %c0_32] : memref<2x256x128xbf16, #tpu.memory_space<vmem>>, vector<1x256x128xbf16>
    %43 = vector.shape_cast %42 : vector<1x256x128xbf16> to vector<256x128xbf16>
    %c0_33 = arith.constant 0 : index
    %c0_34 = arith.constant 0 : index
    %44 = vector.load %arg12[%c0_33, %c0_34] : memref<2x128xf32, #tpu.memory_space<vmem>>, vector<1x128xf32>
    %45 = vector.shape_cast %44 : vector<1x128xf32> to vector<128xf32>
    %c0_35 = arith.constant 0 : index
    %c0_36 = arith.constant 0 : index
    %46 = vector.load %arg13[%c0_35, %c0_36] : memref<2x128xf32, #tpu.memory_space<vmem>>, vector<1x128xf32>
    %47 = vector.shape_cast %46 : vector<1x128xf32> to vector<128xf32>
    %c0_37 = arith.constant 0 : index
    %c0_38 = arith.constant 0 : index
    %48 = vector.load %arg14[%c0_37, %c0_38] : memref<2x128xf32, #tpu.memory_space<vmem>>, vector<1x128xf32>
    %49 = vector.shape_cast %48 : vector<1x128xf32> to vector<128xf32>
    %50 = arith.truncf %25 : vector<16x128xf32> to vector<16x128xbf16>
    %cst_39 = arith.constant dense<0.000000e+00> : vector<16x384xf32>
    %51 = tpu.matmul %50, %27, %cst_39 {dimension_numbers = #tpu.dot_dimension_numbers<[1], [0], [0], [1], [0, 0, 1, 1], [], []>} : vector<16x128xbf16>, vector<128x384xbf16>, vector<16x384xf32> -> vector<16x384xf32>
    %52 = vector.broadcast %29 : vector<1x384xf32> to vector<16x384xf32>
    %53 = arith.addf %51, %52 : vector<16x384xf32>
    %54 = arith.truncf %53 : vector<16x384xf32> to vector<16x384xbf16>
    %55 = vector.extract_strided_slice %54 {offsets = [0, 0], sizes = [16, 128], strides = [1, 1]} : vector<16x384xbf16> to vector<16x128xbf16>
    %56 = vector.extract_strided_slice %55 {offsets = [0, 0], sizes = [16, 32], strides = [1, 1]} : vector<16x128xbf16> to vector<16x32xbf16>
    %57 = vector.extract_strided_slice %55 {offsets = [0, 32], sizes = [16, 32], strides = [1, 1]} : vector<16x128xbf16> to vector<16x32xbf16>
    %58 = vector.extract_strided_slice %55 {offsets = [0, 64], sizes = [16, 32], strides = [1, 1]} : vector<16x128xbf16> to vector<16x32xbf16>
    %59 = vector.extract_strided_slice %55 {offsets = [0, 96], sizes = [16, 32], strides = [1, 1]} : vector<16x128xbf16> to vector<16x32xbf16>
    %60 = vector.shape_cast %56 : vector<16x32xbf16> to vector<1x16x32xbf16>
    %61 = vector.shape_cast %57 : vector<16x32xbf16> to vector<1x16x32xbf16>
    %62 = vector.shape_cast %58 : vector<16x32xbf16> to vector<1x16x32xbf16>
    %63 = vector.shape_cast %59 : vector<16x32xbf16> to vector<1x16x32xbf16>
    %64 = tpu.concatenate %60, %61, %62, %63 in 0 : vector<1x16x32xbf16>, vector<1x16x32xbf16>, vector<1x16x32xbf16>, vector<1x16x32xbf16> -> vector<4x16x32xbf16>
    %65 = vector.shape_cast %64 : vector<4x16x32xbf16> to vector<8x8x32xbf16>
    %66 = vector.extract_strided_slice %54 {offsets = [0, 128], sizes = [16, 128], strides = [1, 1]} : vector<16x384xbf16> to vector<16x128xbf16>
    %67 = vector.extract_strided_slice %66 {offsets = [0, 0], sizes = [16, 32], strides = [1, 1]} : vector<16x128xbf16> to vector<16x32xbf16>
    %68 = vector.extract_strided_slice %66 {offsets = [0, 32], sizes = [16, 32], strides = [1, 1]} : vector<16x128xbf16> to vector<16x32xbf16>
    %69 = vector.extract_strided_slice %66 {offsets = [0, 64], sizes = [16, 32], strides = [1, 1]} : vector<16x128xbf16> to vector<16x32xbf16>
    %70 = vector.extract_strided_slice %66 {offsets = [0, 96], sizes = [16, 32], strides = [1, 1]} : vector<16x128xbf16> to vector<16x32xbf16>
    %71 = vector.shape_cast %67 : vector<16x32xbf16> to vector<1x16x32xbf16>
    %72 = vector.shape_cast %68 : vector<16x32xbf16> to vector<1x16x32xbf16>
    %73 = vector.shape_cast %69 : vector<16x32xbf16> to vector<1x16x32xbf16>
    %74 = vector.shape_cast %70 : vector<16x32xbf16> to vector<1x16x32xbf16>
    %75 = tpu.concatenate %71, %72, %73, %74 in 0 : vector<1x16x32xbf16>, vector<1x16x32xbf16>, vector<1x16x32xbf16>, vector<1x16x32xbf16> -> vector<4x16x32xbf16>
    %76 = vector.shape_cast %75 : vector<4x16x32xbf16> to vector<8x8x32xbf16>
    %77 = vector.extract_strided_slice %54 {offsets = [0, 256], sizes = [16, 128], strides = [1, 1]} : vector<16x384xbf16> to vector<16x128xbf16>
    %78 = vector.extract_strided_slice %77 {offsets = [0, 0], sizes = [16, 32], strides = [1, 1]} : vector<16x128xbf16> to vector<16x32xbf16>
    %79 = vector.extract_strided_slice %77 {offsets = [0, 32], sizes = [16, 32], strides = [1, 1]} : vector<16x128xbf16> to vector<16x32xbf16>
    %80 = vector.extract_strided_slice %77 {offsets = [0, 64], sizes = [16, 32], strides = [1, 1]} : vector<16x128xbf16> to vector<16x32xbf16>
    %81 = vector.extract_strided_slice %77 {offsets = [0, 96], sizes = [16, 32], strides = [1, 1]} : vector<16x128xbf16> to vector<16x32xbf16>
    %82 = vector.shape_cast %78 : vector<16x32xbf16> to vector<1x16x32xbf16>
    %83 = vector.shape_cast %79 : vector<16x32xbf16> to vector<1x16x32xbf16>
    %84 = vector.shape_cast %80 : vector<16x32xbf16> to vector<1x16x32xbf16>
    %85 = vector.shape_cast %81 : vector<16x32xbf16> to vector<1x16x32xbf16>
    %86 = tpu.concatenate %82, %83, %84, %85 in 0 : vector<1x16x32xbf16>, vector<1x16x32xbf16>, vector<1x16x32xbf16>, vector<1x16x32xbf16> -> vector<4x16x32xbf16>
    %87 = vector.shape_cast %86 : vector<4x16x32xbf16> to vector<8x8x32xbf16>
    "tpu.trace_start"() <{level = 10 : i32, message = "nqd,nkd->nqk"}> : () -> ()
    %cst_40 = arith.constant dense<0.000000e+00> : vector<8x8x8xf32>
    %88 = tpu.matmul %65, %76, %cst_40 {dimension_numbers = #tpu.dot_dimension_numbers<[2], [2], [1], [1], [0, 0, 0, 1, 1, 1], [0], [0]>} : vector<8x8x32xbf16>, vector<8x8x32xbf16>, vector<8x8x8xf32> -> vector<8x8x8xf32>
    "tpu.trace_stop"() : () -> ()
    %cst_41 = arith.constant dense<0xFF800000> : vector<8x8xf32>
    %89 = vector.multi_reduction <maximumf>, %88, %cst_41 [2] : vector<8x8x8xf32> to vector<8x8xf32>
    %90 = vector.shape_cast %89 : vector<8x8xf32> to vector<8x8x1xf32>
    %91 = vector.broadcast %90 : vector<8x8x1xf32> to vector<8x8x8xf32>
    %92 = arith.subf %88, %91 : vector<8x8x8xf32>
    %93 = math.exp %92 : vector<8x8x8xf32>
    %cst_42 = arith.constant dense<0.000000e+00> : vector<8x8xf32>
    %94 = vector.multi_reduction <add>, %93, %cst_42 [2] : vector<8x8x8xf32> to vector<8x8xf32>
    %95 = vector.shape_cast %94 : vector<8x8xf32> to vector<8x8x1xf32>
    %96 = tpu.reciprocal %95 {approx = true} : vector<8x8x1xf32> -> vector<8x8x1xf32>
    %97 = vector.broadcast %96 : vector<8x8x1xf32> to vector<8x8x8xf32>
    %98 = arith.mulf %93, %97 : vector<8x8x8xf32>
    %99 = arith.truncf %98 : vector<8x8x8xf32> to vector<8x8x8xbf16>
    "tpu.trace_start"() <{level = 10 : i32, message = "nqk,nkd->nqd"}> : () -> ()
    %cst_43 = arith.constant dense<0.000000e+00> : vector<8x8x32xf32>
    %100 = tpu.matmul %99, %87, %cst_43 {dimension_numbers = #tpu.dot_dimension_numbers<[2], [1], [1], [2], [0, 0, 0, 1, 1, 2], [0], [0]>} : vector<8x8x8xbf16>, vector<8x8x32xbf16>, vector<8x8x32xf32> -> vector<8x8x32xf32>
    "tpu.trace_stop"() : () -> ()
    %101 = vector.extract_strided_slice %100 {offsets = [0, 0, 0], sizes = [2, 8, 32], strides = [1, 1, 1]} : vector<8x8x32xf32> to vector<2x8x32xf32>
    %102 = vector.shape_cast %101 : vector<2x8x32xf32> to vector<16x32xf32>
    %103 = vector.extract_strided_slice %100 {offsets = [2, 0, 0], sizes = [2, 8, 32], strides = [1, 1, 1]} : vector<8x8x32xf32> to vector<2x8x32xf32>
    %104 = vector.shape_cast %103 : vector<2x8x32xf32> to vector<16x32xf32>
    %105 = vector.extract_strided_slice %100 {offsets = [4, 0, 0], sizes = [2, 8, 32], strides = [1, 1, 1]} : vector<8x8x32xf32> to vector<2x8x32xf32>
    %106 = vector.shape_cast %105 : vector<2x8x32xf32> to vector<16x32xf32>
    %107 = vector.extract_strided_slice %100 {offsets = [6, 0, 0], sizes = [2, 8, 32], strides = [1, 1, 1]} : vector<8x8x32xf32> to vector<2x8x32xf32>
    %108 = vector.shape_cast %107 : vector<2x8x32xf32> to vector<16x32xf32>
    %109 = tpu.concatenate %102, %104, %106, %108 in 1 : vector<16x32xf32>, vector<16x32xf32>, vector<16x32xf32>, vector<16x32xf32> -> vector<16x128xf32>
    %110 = arith.truncf %109 : vector<16x128xf32> to vector<16x128xbf16>
    %cst_44 = arith.constant dense<0.000000e+00> : vector<16x128xf32>
    %111 = tpu.matmul %110, %31, %cst_44 {dimension_numbers = #tpu.dot_dimension_numbers<[1], [0], [0], [1], [0, 0, 1, 1], [], []>} : vector<16x128xbf16>, vector<128x128xbf16>, vector<16x128xf32> -> vector<16x128xf32>
    %112 = vector.shape_cast %33 : vector<128xf32> to vector<1x128xf32>
    %113 = vector.broadcast %112 : vector<1x128xf32> to vector<16x128xf32>
    %114 = arith.addf %111, %113 : vector<16x128xf32>
    %115 = arith.addf %114, %25 : vector<16x128xf32>
    %cst_45 = arith.constant dense<0.000000e+00> : vector<16xf32>
    %116 = vector.multi_reduction <add>, %115, %cst_45 [1] : vector<16x128xf32> to vector<16xf32>
    %117 = vector.shape_cast %116 : vector<16xf32> to vector<16x1xf32>
    %cst_46 = arith.constant 1.280000e+02 : f32
    %118 = vector.broadcast %cst_46 : f32 to vector<16x1xf32>
    %119 = arith.divf %117, %118 : vector<16x1xf32>
    %120 = vector.broadcast %119 : vector<16x1xf32> to vector<16x128xf32>
    %121 = arith.subf %115, %120 : vector<16x128xf32>
    %122 = arith.mulf %121, %121 : vector<16x128xf32>
    %cst_47 = arith.constant dense<0.000000e+00> : vector<16xf32>
    %123 = vector.multi_reduction <add>, %122, %cst_47 [1] : vector<16x128xf32> to vector<16xf32>
    %124 = vector.shape_cast %123 : vector<16xf32> to vector<16x1xf32>
    %cst_48 = arith.constant 1.280000e+02 : f32
    %125 = vector.broadcast %cst_48 : f32 to vector<16x1xf32>
    %126 = arith.divf %124, %125 : vector<16x1xf32>
    %127 = vector.broadcast %119 : vector<16x1xf32> to vector<16x128xf32>
    %128 = arith.subf %115, %127 : vector<16x128xf32>
    %cst_49 = arith.constant 9.99999996E-13 : f32
    %129 = vector.broadcast %cst_49 : f32 to vector<16x1xf32>
    %130 = arith.addf %126, %129 : vector<16x1xf32>
    %131 = math.rsqrt %130 : vector<16x1xf32>
    %132 = vector.broadcast %131 : vector<16x1xf32> to vector<16x128xf32>
    %133 = arith.mulf %128, %132 : vector<16x128xf32>
    %134 = vector.shape_cast %35 : vector<128xf32> to vector<1x128xf32>
    %135 = vector.broadcast %134 : vector<1x128xf32> to vector<16x128xf32>
    %136 = arith.mulf %133, %135 : vector<16x128xf32>
    %137 = vector.shape_cast %37 : vector<128xf32> to vector<1x128xf32>
    %138 = vector.broadcast %137 : vector<1x128xf32> to vector<16x128xf32>
    %139 = arith.addf %136, %138 : vector<16x128xf32>
    %140 = arith.truncf %139 : vector<16x128xf32> to vector<16x128xbf16>
    %cst_50 = arith.constant dense<0.000000e+00> : vector<16x256xf32>
    %141 = tpu.matmul %140, %39, %cst_50 {dimension_numbers = #tpu.dot_dimension_numbers<[1], [0], [0], [1], [0, 0, 1, 1], [], []>} : vector<16x128xbf16>, vector<128x256xbf16>, vector<16x256xf32> -> vector<16x256xf32>
    %142 = vector.shape_cast %41 : vector<256xf32> to vector<1x256xf32>
    %143 = vector.broadcast %142 : vector<1x256xf32> to vector<16x256xf32>
    %144 = arith.addf %141, %143 : vector<16x256xf32>
    %cst_51 = arith.constant 5.000000e-01 : f32
    %145 = vector.broadcast %cst_51 : f32 to vector<16x256xf32>
    %146 = arith.mulf %145, %144 : vector<16x256xf32>
    %cst_52 = arith.constant 4.471500e-02 : f32
    %147 = vector.broadcast %cst_52 : f32 to vector<16x256xf32>
    %148 = arith.mulf %147, %144 : vector<16x256xf32>
    %149 = arith.mulf %148, %144 : vector<16x256xf32>
    %150 = arith.mulf %149, %144 : vector<16x256xf32>
    %151 = arith.addf %144, %150 : vector<16x256xf32>
    %cst_53 = arith.constant 0.797884583 : f32
    %152 = vector.broadcast %cst_53 : f32 to vector<16x256xf32>
    %153 = arith.mulf %152, %151 : vector<16x256xf32>
    %154 = math.tanh %153 : vector<16x256xf32>
    %cst_54 = arith.constant 1.000000e+00 : f32
    %155 = vector.broadcast %cst_54 : f32 to vector<16x256xf32>
    %156 = arith.addf %155, %154 : vector<16x256xf32>
    %157 = arith.mulf %146, %156 : vector<16x256xf32>
    %158 = arith.truncf %157 : vector<16x256xf32> to vector<16x256xbf16>
    %cst_55 = arith.constant dense<0.000000e+00> : vector<16x128xf32>
    %159 = tpu.matmul %158, %43, %cst_55 {dimension_numbers = #tpu.dot_dimension_numbers<[1], [0], [0], [1], [0, 0, 1, 1], [], []>} : vector<16x256xbf16>, vector<256x128xbf16>, vector<16x128xf32> -> vector<16x128xf32>
    %160 = vector.shape_cast %45 : vector<128xf32> to vector<1x128xf32>
    %161 = vector.broadcast %160 : vector<1x128xf32> to vector<16x128xf32>
    %162 = arith.addf %159, %161 : vector<16x128xf32>
    %163 = arith.addf %162, %139 : vector<16x128xf32>
    %cst_56 = arith.constant dense<0.000000e+00> : vector<16xf32>
    %164 = vector.multi_reduction <add>, %163, %cst_56 [1] : vector<16x128xf32> to vector<16xf32>
    %165 = vector.shape_cast %164 : vector<16xf32> to vector<16x1xf32>
    %cst_57 = arith.constant 1.280000e+02 : f32
    %166 = vector.broadcast %cst_57 : f32 to vector<16x1xf32>
    %167 = arith.divf %165, %166 : vector<16x1xf32>
    %168 = vector.broadcast %167 : vector<16x1xf32> to vector<16x128xf32>
    %169 = arith.subf %163, %168 : vector<16x128xf32>
    %170 = arith.mulf %169, %169 : vector<16x128xf32>
    %cst_58 = arith.constant dense<0.000000e+00> : vector<16xf32>
    %171 = vector.multi_reduction <add>, %170, %cst_58 [1] : vector<16x128xf32> to vector<16xf32>
    %172 = vector.shape_cast %171 : vector<16xf32> to vector<16x1xf32>
    %cst_59 = arith.constant 1.280000e+02 : f32
    %173 = vector.broadcast %cst_59 : f32 to vector<16x1xf32>
    %174 = arith.divf %172, %173 : vector<16x1xf32>
    %175 = vector.broadcast %167 : vector<16x1xf32> to vector<16x128xf32>
    %176 = arith.subf %163, %175 : vector<16x128xf32>
    %cst_60 = arith.constant 9.99999996E-13 : f32
    %177 = vector.broadcast %cst_60 : f32 to vector<16x1xf32>
    %178 = arith.addf %174, %177 : vector<16x1xf32>
    %179 = math.rsqrt %178 : vector<16x1xf32>
    %180 = vector.broadcast %179 : vector<16x1xf32> to vector<16x128xf32>
    %181 = arith.mulf %176, %180 : vector<16x128xf32>
    %182 = vector.shape_cast %47 : vector<128xf32> to vector<1x128xf32>
    %183 = vector.broadcast %182 : vector<1x128xf32> to vector<16x128xf32>
    %184 = arith.mulf %181, %183 : vector<16x128xf32>
    %185 = vector.shape_cast %49 : vector<128xf32> to vector<1x128xf32>
    %186 = vector.broadcast %185 : vector<1x128xf32> to vector<16x128xf32>
    %187 = arith.addf %184, %186 : vector<16x128xf32>
    %c1 = arith.constant 1 : index
    %c0_61 = arith.constant 0 : index
    %c0_62 = arith.constant 0 : index
    %188 = vector.load %arg3[%c1, %c0_61, %c0_62] : memref<2x128x384xbf16, #tpu.memory_space<vmem>>, vector<1x128x384xbf16>
    %189 = vector.shape_cast %188 : vector<1x128x384xbf16> to vector<128x384xbf16>
    %c1_63 = arith.constant 1 : index
    %c0_64 = arith.constant 0 : index
    %c0_65 = arith.constant 0 : index
    %190 = vector.load %arg4[%c1_63, %c0_64, %c0_65] : memref<2x1x384xf32, #tpu.memory_space<vmem>>, vector<1x1x384xf32>
    %191 = vector.shape_cast %190 : vector<1x1x384xf32> to vector<1x384xf32>
    %c1_66 = arith.constant 1 : index
    %c0_67 = arith.constant 0 : index
    %c0_68 = arith.constant 0 : index
    %192 = vector.load %arg5[%c1_66, %c0_67, %c0_68] : memref<2x128x128xbf16, #tpu.memory_space<vmem>>, vector<1x128x128xbf16>
    %193 = vector.shape_cast %192 : vector<1x128x128xbf16> to vector<128x128xbf16>
    %c1_69 = arith.constant 1 : index
    %c0_70 = arith.constant 0 : index
    %194 = vector.load %arg6[%c1_69, %c0_70] : memref<2x128xf32, #tpu.memory_space<vmem>>, vector<1x128xf32>
    %195 = vector.shape_cast %194 : vector<1x128xf32> to vector<128xf32>
    %c1_71 = arith.constant 1 : index
    %c0_72 = arith.constant 0 : index
    %196 = vector.load %arg7[%c1_71, %c0_72] : memref<2x128xf32, #tpu.memory_space<vmem>>, vector<1x128xf32>
    %197 = vector.shape_cast %196 : vector<1x128xf32> to vector<128xf32>
    %c1_73 = arith.constant 1 : index
    %c0_74 = arith.constant 0 : index
    %198 = vector.load %arg8[%c1_73, %c0_74] : memref<2x128xf32, #tpu.memory_space<vmem>>, vector<1x128xf32>
    %199 = vector.shape_cast %198 : vector<1x128xf32> to vector<128xf32>
    %c1_75 = arith.constant 1 : index
    %c0_76 = arith.constant 0 : index
    %c0_77 = arith.constant 0 : index
    %200 = vector.load %arg9[%c1_75, %c0_76, %c0_77] : memref<2x128x256xbf16, #tpu.memory_space<vmem>>, vector<1x128x256xbf16>
    %201 = vector.shape_cast %200 : vector<1x128x256xbf16> to vector<128x256xbf16>
    %c1_78 = arith.constant 1 : index
    %c0_79 = arith.constant 0 : index
    %202 = vector.load %arg10[%c1_78, %c0_79] : memref<2x256xf32, #tpu.memory_space<vmem>>, vector<1x256xf32>
    %203 = vector.shape_cast %202 : vector<1x256xf32> to vector<256xf32>
    %c1_80 = arith.constant 1 : index
    %c0_81 = arith.constant 0 : index
    %c0_82 = arith.constant 0 : index
    %204 = vector.load %arg11[%c1_80, %c0_81, %c0_82] : memref<2x256x128xbf16, #tpu.memory_space<vmem>>, vector<1x256x128xbf16>
    %205 = vector.shape_cast %204 : vector<1x256x128xbf16> to vector<256x128xbf16>
    %c1_83 = arith.constant 1 : index
    %c0_84 = arith.constant 0 : index
    %206 = vector.load %arg12[%c1_83, %c0_84] : memref<2x128xf32, #tpu.memory_space<vmem>>, vector<1x128xf32>
    %207 = vector.shape_cast %206 : vector<1x128xf32> to vector<128xf32>
    %c1_85 = arith.constant 1 : index
    %c0_86 = arith.constant 0 : index
    %208 = vector.load %arg13[%c1_85, %c0_86] : memref<2x128xf32, #tpu.memory_space<vmem>>, vector<1x128xf32>
    %209 = vector.shape_cast %208 : vector<1x128xf32> to vector<128xf32>
    %c1_87 = arith.constant 1 : index
    %c0_88 = arith.constant 0 : index
    %210 = vector.load %arg14[%c1_87, %c0_88] : memref<2x128xf32, #tpu.memory_space<vmem>>, vector<1x128xf32>
    %211 = vector.shape_cast %210 : vector<1x128xf32> to vector<128xf32>
    %212 = arith.truncf %187 : vector<16x128xf32> to vector<16x128xbf16>
    %cst_89 = arith.constant dense<0.000000e+00> : vector<16x384xf32>
    %213 = tpu.matmul %212, %189, %cst_89 {dimension_numbers = #tpu.dot_dimension_numbers<[1], [0], [0], [1], [0, 0, 1, 1], [], []>} : vector<16x128xbf16>, vector<128x384xbf16>, vector<16x384xf32> -> vector<16x384xf32>
    %214 = vector.broadcast %191 : vector<1x384xf32> to vector<16x384xf32>
    %215 = arith.addf %213, %214 : vector<16x384xf32>
    %216 = arith.truncf %215 : vector<16x384xf32> to vector<16x384xbf16>
    %217 = vector.extract_strided_slice %216 {offsets = [0, 0], sizes = [16, 128], strides = [1, 1]} : vector<16x384xbf16> to vector<16x128xbf16>
    %218 = vector.extract_strided_slice %217 {offsets = [0, 0], sizes = [16, 32], strides = [1, 1]} : vector<16x128xbf16> to vector<16x32xbf16>
    %219 = vector.extract_strided_slice %217 {offsets = [0, 32], sizes = [16, 32], strides = [1, 1]} : vector<16x128xbf16> to vector<16x32xbf16>
    %220 = vector.extract_strided_slice %217 {offsets = [0, 64], sizes = [16, 32], strides = [1, 1]} : vector<16x128xbf16> to vector<16x32xbf16>
    %221 = vector.extract_strided_slice %217 {offsets = [0, 96], sizes = [16, 32], strides = [1, 1]} : vector<16x128xbf16> to vector<16x32xbf16>
    %222 = vector.shape_cast %218 : vector<16x32xbf16> to vector<1x16x32xbf16>
    %223 = vector.shape_cast %219 : vector<16x32xbf16> to vector<1x16x32xbf16>
    %224 = vector.shape_cast %220 : vector<16x32xbf16> to vector<1x16x32xbf16>
    %225 = vector.shape_cast %221 : vector<16x32xbf16> to vector<1x16x32xbf16>
    %226 = tpu.concatenate %222, %223, %224, %225 in 0 : vector<1x16x32xbf16>, vector<1x16x32xbf16>, vector<1x16x32xbf16>, vector<1x16x32xbf16> -> vector<4x16x32xbf16>
    %227 = vector.shape_cast %226 : vector<4x16x32xbf16> to vector<8x8x32xbf16>
    %228 = vector.extract_strided_slice %216 {offsets = [0, 128], sizes = [16, 128], strides = [1, 1]} : vector<16x384xbf16> to vector<16x128xbf16>
    %229 = vector.extract_strided_slice %228 {offsets = [0, 0], sizes = [16, 32], strides = [1, 1]} : vector<16x128xbf16> to vector<16x32xbf16>
    %230 = vector.extract_strided_slice %228 {offsets = [0, 32], sizes = [16, 32], strides = [1, 1]} : vector<16x128xbf16> to vector<16x32xbf16>
    %231 = vector.extract_strided_slice %228 {offsets = [0, 64], sizes = [16, 32], strides = [1, 1]} : vector<16x128xbf16> to vector<16x32xbf16>
    %232 = vector.extract_strided_slice %228 {offsets = [0, 96], sizes = [16, 32], strides = [1, 1]} : vector<16x128xbf16> to vector<16x32xbf16>
    %233 = vector.shape_cast %229 : vector<16x32xbf16> to vector<1x16x32xbf16>
    %234 = vector.shape_cast %230 : vector<16x32xbf16> to vector<1x16x32xbf16>
    %235 = vector.shape_cast %231 : vector<16x32xbf16> to vector<1x16x32xbf16>
    %236 = vector.shape_cast %232 : vector<16x32xbf16> to vector<1x16x32xbf16>
    %237 = tpu.concatenate %233, %234, %235, %236 in 0 : vector<1x16x32xbf16>, vector<1x16x32xbf16>, vector<1x16x32xbf16>, vector<1x16x32xbf16> -> vector<4x16x32xbf16>
    %238 = vector.shape_cast %237 : vector<4x16x32xbf16> to vector<8x8x32xbf16>
    %239 = vector.extract_strided_slice %216 {offsets = [0, 256], sizes = [16, 128], strides = [1, 1]} : vector<16x384xbf16> to vector<16x128xbf16>
    %240 = vector.extract_strided_slice %239 {offsets = [0, 0], sizes = [16, 32], strides = [1, 1]} : vector<16x128xbf16> to vector<16x32xbf16>
    %241 = vector.extract_strided_slice %239 {offsets = [0, 32], sizes = [16, 32], strides = [1, 1]} : vector<16x128xbf16> to vector<16x32xbf16>
    %242 = vector.extract_strided_slice %239 {offsets = [0, 64], sizes = [16, 32], strides = [1, 1]} : vector<16x128xbf16> to vector<16x32xbf16>
    %243 = vector.extract_strided_slice %239 {offsets = [0, 96], sizes = [16, 32], strides = [1, 1]} : vector<16x128xbf16> to vector<16x32xbf16>
    %244 = vector.shape_cast %240 : vector<16x32xbf16> to vector<1x16x32xbf16>
    %245 = vector.shape_cast %241 : vector<16x32xbf16> to vector<1x16x32xbf16>
    %246 = vector.shape_cast %242 : vector<16x32xbf16> to vector<1x16x32xbf16>
    %247 = vector.shape_cast %243 : vector<16x32xbf16> to vector<1x16x32xbf16>
    %248 = tpu.concatenate %244, %245, %246, %247 in 0 : vector<1x16x32xbf16>, vector<1x16x32xbf16>, vector<1x16x32xbf16>, vector<1x16x32xbf16> -> vector<4x16x32xbf16>
    %249 = vector.shape_cast %248 : vector<4x16x32xbf16> to vector<8x8x32xbf16>
    "tpu.trace_start"() <{level = 10 : i32, message = "nqd,nkd->nqk"}> : () -> ()
    %cst_90 = arith.constant dense<0.000000e+00> : vector<8x8x8xf32>
    %250 = tpu.matmul %227, %238, %cst_90 {dimension_numbers = #tpu.dot_dimension_numbers<[2], [2], [1], [1], [0, 0, 0, 1, 1, 1], [0], [0]>} : vector<8x8x32xbf16>, vector<8x8x32xbf16>, vector<8x8x8xf32> -> vector<8x8x8xf32>
    "tpu.trace_stop"() : () -> ()
    %cst_91 = arith.constant dense<0xFF800000> : vector<8x8xf32>
    %251 = vector.multi_reduction <maximumf>, %250, %cst_91 [2] : vector<8x8x8xf32> to vector<8x8xf32>
    %252 = vector.shape_cast %251 : vector<8x8xf32> to vector<8x8x1xf32>
    %253 = vector.broadcast %252 : vector<8x8x1xf32> to vector<8x8x8xf32>
    %254 = arith.subf %250, %253 : vector<8x8x8xf32>
    %255 = math.exp %254 : vector<8x8x8xf32>
    %cst_92 = arith.constant dense<0.000000e+00> : vector<8x8xf32>
    %256 = vector.multi_reduction <add>, %255, %cst_92 [2] : vector<8x8x8xf32> to vector<8x8xf32>
    %257 = vector.shape_cast %256 : vector<8x8xf32> to vector<8x8x1xf32>
    %258 = tpu.reciprocal %257 {approx = true} : vector<8x8x1xf32> -> vector<8x8x1xf32>
    %259 = vector.broadcast %258 : vector<8x8x1xf32> to vector<8x8x8xf32>
    %260 = arith.mulf %255, %259 : vector<8x8x8xf32>
    %261 = arith.truncf %260 : vector<8x8x8xf32> to vector<8x8x8xbf16>
    "tpu.trace_start"() <{level = 10 : i32, message = "nqk,nkd->nqd"}> : () -> ()
    %cst_93 = arith.constant dense<0.000000e+00> : vector<8x8x32xf32>
    %262 = tpu.matmul %261, %249, %cst_93 {dimension_numbers = #tpu.dot_dimension_numbers<[2], [1], [1], [2], [0, 0, 0, 1, 1, 2], [0], [0]>} : vector<8x8x8xbf16>, vector<8x8x32xbf16>, vector<8x8x32xf32> -> vector<8x8x32xf32>
    "tpu.trace_stop"() : () -> ()
    %263 = vector.extract_strided_slice %262 {offsets = [0, 0, 0], sizes = [2, 8, 32], strides = [1, 1, 1]} : vector<8x8x32xf32> to vector<2x8x32xf32>
    %264 = vector.shape_cast %263 : vector<2x8x32xf32> to vector<16x32xf32>
    %265 = vector.extract_strided_slice %262 {offsets = [2, 0, 0], sizes = [2, 8, 32], strides = [1, 1, 1]} : vector<8x8x32xf32> to vector<2x8x32xf32>
    %266 = vector.shape_cast %265 : vector<2x8x32xf32> to vector<16x32xf32>
    %267 = vector.extract_strided_slice %262 {offsets = [4, 0, 0], sizes = [2, 8, 32], strides = [1, 1, 1]} : vector<8x8x32xf32> to vector<2x8x32xf32>
    %268 = vector.shape_cast %267 : vector<2x8x32xf32> to vector<16x32xf32>
    %269 = vector.extract_strided_slice %262 {offsets = [6, 0, 0], sizes = [2, 8, 32], strides = [1, 1, 1]} : vector<8x8x32xf32> to vector<2x8x32xf32>
    %270 = vector.shape_cast %269 : vector<2x8x32xf32> to vector<16x32xf32>
    %271 = tpu.concatenate %264, %266, %268, %270 in 1 : vector<16x32xf32>, vector<16x32xf32>, vector<16x32xf32>, vector<16x32xf32> -> vector<16x128xf32>
    %272 = arith.truncf %271 : vector<16x128xf32> to vector<16x128xbf16>
    %cst_94 = arith.constant dense<0.000000e+00> : vector<16x128xf32>
    %273 = tpu.matmul %272, %193, %cst_94 {dimension_numbers = #tpu.dot_dimension_numbers<[1], [0], [0], [1], [0, 0, 1, 1], [], []>} : vector<16x128xbf16>, vector<128x128xbf16>, vector<16x128xf32> -> vector<16x128xf32>
    %274 = vector.shape_cast %195 : vector<128xf32> to vector<1x128xf32>
    %275 = vector.broadcast %274 : vector<1x128xf32> to vector<16x128xf32>
    %276 = arith.addf %273, %275 : vector<16x128xf32>
    %277 = arith.addf %276, %187 : vector<16x128xf32>
    %cst_95 = arith.constant dense<0.000000e+00> : vector<16xf32>
    %278 = vector.multi_reduction <add>, %277, %cst_95 [1] : vector<16x128xf32> to vector<16xf32>
    %279 = vector.shape_cast %278 : vector<16xf32> to vector<16x1xf32>
    %cst_96 = arith.constant 1.280000e+02 : f32
    %280 = vector.broadcast %cst_96 : f32 to vector<16x1xf32>
    %281 = arith.divf %279, %280 : vector<16x1xf32>
    %282 = vector.broadcast %281 : vector<16x1xf32> to vector<16x128xf32>
    %283 = arith.subf %277, %282 : vector<16x128xf32>
    %284 = arith.mulf %283, %283 : vector<16x128xf32>
    %cst_97 = arith.constant dense<0.000000e+00> : vector<16xf32>
    %285 = vector.multi_reduction <add>, %284, %cst_97 [1] : vector<16x128xf32> to vector<16xf32>
    %286 = vector.shape_cast %285 : vector<16xf32> to vector<16x1xf32>
    %cst_98 = arith.constant 1.280000e+02 : f32
    %287 = vector.broadcast %cst_98 : f32 to vector<16x1xf32>
    %288 = arith.divf %286, %287 : vector<16x1xf32>
    %289 = vector.broadcast %281 : vector<16x1xf32> to vector<16x128xf32>
    %290 = arith.subf %277, %289 : vector<16x128xf32>
    %cst_99 = arith.constant 9.99999996E-13 : f32
    %291 = vector.broadcast %cst_99 : f32 to vector<16x1xf32>
    %292 = arith.addf %288, %291 : vector<16x1xf32>
    %293 = math.rsqrt %292 : vector<16x1xf32>
    %294 = vector.broadcast %293 : vector<16x1xf32> to vector<16x128xf32>
    %295 = arith.mulf %290, %294 : vector<16x128xf32>
    %296 = vector.shape_cast %197 : vector<128xf32> to vector<1x128xf32>
    %297 = vector.broadcast %296 : vector<1x128xf32> to vector<16x128xf32>
    %298 = arith.mulf %295, %297 : vector<16x128xf32>
    %299 = vector.shape_cast %199 : vector<128xf32> to vector<1x128xf32>
    %300 = vector.broadcast %299 : vector<1x128xf32> to vector<16x128xf32>
    %301 = arith.addf %298, %300 : vector<16x128xf32>
    %302 = arith.truncf %301 : vector<16x128xf32> to vector<16x128xbf16>
    %cst_100 = arith.constant dense<0.000000e+00> : vector<16x256xf32>
    %303 = tpu.matmul %302, %201, %cst_100 {dimension_numbers = #tpu.dot_dimension_numbers<[1], [0], [0], [1], [0, 0, 1, 1], [], []>} : vector<16x128xbf16>, vector<128x256xbf16>, vector<16x256xf32> -> vector<16x256xf32>
    %304 = vector.shape_cast %203 : vector<256xf32> to vector<1x256xf32>
    %305 = vector.broadcast %304 : vector<1x256xf32> to vector<16x256xf32>
    %306 = arith.addf %303, %305 : vector<16x256xf32>
    %cst_101 = arith.constant 5.000000e-01 : f32
    %307 = vector.broadcast %cst_101 : f32 to vector<16x256xf32>
    %308 = arith.mulf %307, %306 : vector<16x256xf32>
    %cst_102 = arith.constant 4.471500e-02 : f32
    %309 = vector.broadcast %cst_102 : f32 to vector<16x256xf32>
    %310 = arith.mulf %309, %306 : vector<16x256xf32>
    %311 = arith.mulf %310, %306 : vector<16x256xf32>
    %312 = arith.mulf %311, %306 : vector<16x256xf32>
    %313 = arith.addf %306, %312 : vector<16x256xf32>
    %cst_103 = arith.constant 0.797884583 : f32
    %314 = vector.broadcast %cst_103 : f32 to vector<16x256xf32>
    %315 = arith.mulf %314, %313 : vector<16x256xf32>
    %316 = math.tanh %315 : vector<16x256xf32>
    %cst_104 = arith.constant 1.000000e+00 : f32
    %317 = vector.broadcast %cst_104 : f32 to vector<16x256xf32>
    %318 = arith.addf %317, %316 : vector<16x256xf32>
    %319 = arith.mulf %308, %318 : vector<16x256xf32>
    %320 = arith.truncf %319 : vector<16x256xf32> to vector<16x256xbf16>
    %cst_105 = arith.constant dense<0.000000e+00> : vector<16x128xf32>
    %321 = tpu.matmul %320, %205, %cst_105 {dimension_numbers = #tpu.dot_dimension_numbers<[1], [0], [0], [1], [0, 0, 1, 1], [], []>} : vector<16x256xbf16>, vector<256x128xbf16>, vector<16x128xf32> -> vector<16x128xf32>
    %322 = vector.shape_cast %207 : vector<128xf32> to vector<1x128xf32>
    %323 = vector.broadcast %322 : vector<1x128xf32> to vector<16x128xf32>
    %324 = arith.addf %321, %323 : vector<16x128xf32>
    %325 = arith.addf %324, %301 : vector<16x128xf32>
    %cst_106 = arith.constant dense<0.000000e+00> : vector<16xf32>
    %326 = vector.multi_reduction <add>, %325, %cst_106 [1] : vector<16x128xf32> to vector<16xf32>
    %327 = vector.shape_cast %326 : vector<16xf32> to vector<16x1xf32>
    %cst_107 = arith.constant 1.280000e+02 : f32
    %328 = vector.broadcast %cst_107 : f32 to vector<16x1xf32>
    %329 = arith.divf %327, %328 : vector<16x1xf32>
    %330 = vector.broadcast %329 : vector<16x1xf32> to vector<16x128xf32>
    %331 = arith.subf %325, %330 : vector<16x128xf32>
    %332 = arith.mulf %331, %331 : vector<16x128xf32>
    %cst_108 = arith.constant dense<0.000000e+00> : vector<16xf32>
    %333 = vector.multi_reduction <add>, %332, %cst_108 [1] : vector<16x128xf32> to vector<16xf32>
    %334 = vector.shape_cast %333 : vector<16xf32> to vector<16x1xf32>
    %cst_109 = arith.constant 1.280000e+02 : f32
    %335 = vector.broadcast %cst_109 : f32 to vector<16x1xf32>
    %336 = arith.divf %334, %335 : vector<16x1xf32>
    %337 = vector.broadcast %329 : vector<16x1xf32> to vector<16x128xf32>
    %338 = arith.subf %325, %337 : vector<16x128xf32>
    %cst_110 = arith.constant 9.99999996E-13 : f32
    %339 = vector.broadcast %cst_110 : f32 to vector<16x1xf32>
    %340 = arith.addf %336, %339 : vector<16x1xf32>
    %341 = math.rsqrt %340 : vector<16x1xf32>
    %342 = vector.broadcast %341 : vector<16x1xf32> to vector<16x128xf32>
    %343 = arith.mulf %338, %342 : vector<16x128xf32>
    %344 = vector.shape_cast %209 : vector<128xf32> to vector<1x128xf32>
    %345 = vector.broadcast %344 : vector<1x128xf32> to vector<16x128xf32>
    %346 = arith.mulf %343, %345 : vector<16x128xf32>
    %347 = vector.shape_cast %211 : vector<128xf32> to vector<1x128xf32>
    %348 = vector.broadcast %347 : vector<1x128xf32> to vector<16x128xf32>
    %349 = arith.addf %346, %348 : vector<16x128xf32>
    %350 = vector.extract_strided_slice %349 {offsets = [0, 0], sizes = [1, 128], strides = [1, 1]} : vector<16x128xf32> to vector<1x128xf32>
    %351 = vector.extract_strided_slice %349 {offsets = [8, 0], sizes = [1, 128], strides = [1, 1]} : vector<16x128xf32> to vector<1x128xf32>
    %352 = tpu.concatenate %350, %351 in 0 : vector<1x128xf32>, vector<1x128xf32> -> vector<2x128xf32>
    %353 = arith.truncf %352 : vector<2x128xf32> to vector<2x128xbf16>
    %c0_111 = arith.constant 0 : index
    %c0_112 = arith.constant 0 : index
    %354 = vector.load %arg15[%c0_111, %c0_112] : memref<128x128xbf16, #tpu.memory_space<vmem>>, vector<128x128xbf16>
    %cst_113 = arith.constant dense<0.000000e+00> : vector<2x128xf32>
    %355 = tpu.matmul %353, %354, %cst_113 {dimension_numbers = #tpu.dot_dimension_numbers<[1], [0], [0], [1], [0, 0, 1, 1], [], []>} : vector<2x128xbf16>, vector<128x128xbf16>, vector<2x128xf32> -> vector<2x128xf32>
    %c0_114 = arith.constant 0 : index
    %c0_115 = arith.constant 0 : index
    %356 = vector.load %arg16[%c0_114, %c0_115] : memref<1x128xf32, #tpu.memory_space<vmem>>, vector<1x128xf32>
    %357 = vector.broadcast %356 : vector<1x128xf32> to vector<2x128xf32>
    %358 = arith.addf %355, %357 : vector<2x128xf32>
    %c0_116 = arith.constant 0 : index
    %c0_117 = arith.constant 0 : index
    %359 = vector.load %arg17[%c0_116, %c0_117] : memref<2x128xf32, #tpu.memory_space<vmem>>, vector<2x128xf32>
    tpu.vector_store %arg17[%c0_116, %c0_117], %358 {strides = array<i32>} : memref<2x128xf32, #tpu.memory_space<vmem>>, vector<2x128xf32>,
    return
  }
}

</mosaic_0001>

<bundles_post_ra>
// kernel: doccls_forward.1
= control target key start
LH: loop header
LB: loop body
LE: loop exit
PB: predicated region body
PF: predicated region fallthrough
CT: control target
= control target key end

     0   :  { %s5926_s0 = inlined_call_operand.vmem [shape: f32[2,8,128], index: 0, kind: input, shape index: {}]   ;;  %s5927_s1 = inlined_call_operand.hbm [shape: f32[1,128], index: 1, kind: input, shape index: {}]   ;;  %s5928_s2 = inlined_call_operand.hbm [shape: f32[1,128], index: 2, kind: input, shape index: {}]   ;;  %s5929_s3 = inlined_call_operand.hbm [shape: bf16[2,128,384], index: 3, kind: input, shape index: {}]   ;;  %s5930_s4 = inlined_call_operand.vmem [shape: f32[2,1,384], index: 4, kind: input, shape index: {}]   ;;  %s5931_s5 = inlined_call_operand.hbm [shape: bf16[2,128,128], index: 5, kind: input, shape index: {}]   ;;  %s5932_s6 = inlined_call_operand.hbm [shape: f32[2,128], index: 6, kind: input, shape index: {}]   ;;  %s5933_s7 = inlined_call_operand.hbm [shape: f32[2,128], index: 7, kind: input, shape index: {}]   ;;  %s5934_s8 = inlined_call_operand.hbm [shape: f32[2,128], index: 8, kind: input, shape index: {}]   ;;  %s5935_s9 = inlined_call_operand.vmem [shape: bf16[2,128,256], index: 9, kind: input, shape index: {}]   ;;  %s5936_s10 = inlined_call_operand.vmem [shape: f32[2,256], index: 10, kind: input, shape index: {}]   ;;  %s5937_s11 = inlined_call_operand.hbm [shape: bf16[2,256,128], index: 11, kind: input, shape index: {}]   ;;  %s5938_s12 = inlined_call_operand.hbm [shape: f32[2,128], index: 12, kind: input, shape index: {}]   ;;  %s5939_s13 = inlined_call_operand.hbm [shape: f32[2,128], index: 13, kind: input, shape index: {}]   ;;  %s5940_s14 = inlined_call_operand.hbm [shape: f32[2,128], index: 14, kind: input, shape index: {}]   ;;  %s5941_s15 = inlined_call_operand.vmem [shape: bf16[128,128], index: 15, kind: input, shape index: {}]   ;;  %s5942_s16 = inlined_call_operand.hbm [shape: f32[1,128], index: 16, kind: input, shape index: {}]   ;;  %s5943_s17 = inlined_call_operand.hbm [shape: f32[2,128], index: 17, kind: output, shape index: {}]  }
   0x1   :  { %5945 = sst [smem:[#allocation31_spill]] %s5926_s0 }
   0x2   :  { %5946 = sst [smem:[#allocation32_spill]] %s5927_s1 }
   0x3   :  { %22 = vsyncpa [#allocation3], 0 }
   0x4   :  { %23 = vsyncpa [#allocation6], 0 }
   0x5   :  { %24 = vsyncpa [#allocation9], 0 }
   0x6   :  { %25 = vsyncpa [#allocation12], 0 }
   0x7   :  { %26 = vsyncpa [#allocation15], 0 }
   0x8   :  { %27 = vsyncpa [#allocation18], 0 }
   0x9   :  { %28 = vsyncpa [#allocation21], 0 }
   0xa   :  { %29 = vsyncpa [#allocation4], 0  ;;  %s5192_s24 = smov [#allocation5]   ;;  %s5193_s26 = smov [#allocation8]  }
   0xb   :  { %s48_s25 = sshll.u32 %s5192_s24, 4  ;;  %s71_s27 = sshll.u32 %s5193_s26, 4  ;;  %s49_s25 = int_to_ptr.vmem [resolvable:$true] %s48_s25  ;;  %s72_s27 = int_to_ptr.vmem [resolvable:$true] %s71_s27 }
   0xc   :  { %s4924_s28 = scalar_lea.vmem %s49_s25, 16  ;;  %s4928_s29 = scalar_lea.vmem %s49_s25, 32 }
   0xd   :  { %p4925_p0 = scmp.ne.s32.totalorder %s49_s25, %s4924_s28  ;;  %p4929_p1 = scmp.lt.s32.totalorder %s49_s25, %s49_s25 }
   0xe   :  { %p4930_p2 = scmp.lt.s32.totalorder %s4928_s29, %s4924_s28 }
  0x10   :  { %p4931_p3 = por %p4930_p2, %p4929_p1 }
  0x12   :  { %p4932_p4 = pnand %p4931_p3, %p4925_p0 }
  0x14   :  { %4935 = shalt.err (!%p4932_p4)
}
  0x15   :  { %51 = dma.hbm_to_vmem [thread:$0]  %s5928_s2, 16, %s49_s25, [#allocation6]  }
  0x16   :  { %s4944_s18 = scalar_lea.vmem %s72_s27, 2048  ;;  %p4949_p6 = scmp.lt.s32.totalorder %s72_s27, %s72_s27 }
  0x17   :  { %p4945_p5 = scmp.ne.s32.totalorder %s72_s27, %s4944_s18  ;;  %p4950_p7 = scmp.lt.s32.totalorder %s4944_s18, %s4944_s18 }
  0x19   :  { %p4951_p8 = por %p4950_p7, %p4949_p6 }
  0x1b   :  { %p4952_p9 = pnand %p4951_p8, %p4945_p5 }
  0x1d   :  { %4955 = shalt.err (!%p4952_p9)
}
  0x1e   :  { %s5194_s19 = smov 64   ;;  %s5195_s1 = smov 4  }
  0x1f   :  { %77 = dma.hbm_to_vmem [thread:$0]  %s5931_s5, 2048, %s72_s27, [#allocation9], %s5194_s19, %s5194_s19, %s5195_s1  }
  0x20   :  { %s5196_s22 = smov [#allocation11]   ;;  %s5197_s24 = smov [#allocation14]  }
  0x21   :  { %s94_s23 = sshll.u32 %s5196_s22, 4  ;;  %s117_s26 = sshll.u32 %s5197_s24, 4  ;;  %s95_s23 = int_to_ptr.vmem [resolvable:$true] %s94_s23  ;;  %s118_s26 = int_to_ptr.vmem [resolvable:$true] %s117_s26 }
  0x22   :  { %s4964_s2 = scalar_lea.vmem %s95_s23, 32  ;;  %p4969_p11 = scmp.lt.s32.totalorder %s95_s23, %s95_s23 }
  0x23   :  { %p4965_p10 = scmp.ne.s32.totalorder %s95_s23, %s4964_s2  ;;  %p4970_p12 = scmp.lt.s32.totalorder %s4964_s2, %s4964_s2 }
  0x25   :  { %p4971_p13 = por %p4970_p12, %p4969_p11 }
  0x27   :  { %p4972_p0 = pnand %p4971_p13, %p4965_p10 }
  0x29   :  { %4975 = shalt.err (!%p4972_p0)
}
  0x2a   :  { %97 = dma.hbm_to_vmem [thread:$0]  %s5933_s7, 32, %s95_s23, [#allocation12]  }
  0x2b   :  { %s4984_s29 = scalar_lea.vmem %s118_s26, 4096  ;;  %p4989_p2 = scmp.lt.s32.totalorder %s118_s26, %s118_s26 }
  0x2c   :  { %p4985_p1 = scmp.ne.s32.totalorder %s118_s26, %s4984_s29  ;;  %p4990_p3 = scmp.lt.s32.totalorder %s4984_s29, %s4984_s29 }
  0x2e   :  { %p4991_p4 = por %p4990_p3, %p4989_p2 }
  0x30   :  { %p4992_p5 = pnand %p4991_p4, %p4985_p1 }
  0x32   :  { %4995 = shalt.err (!%p4992_p5)
}
  0x33   :  { %123 = dma.hbm_to_vmem [thread:$0]  %s5937_s11, 4096, %s118_s26, [#allocation15], %s5194_s19, %s5194_s19, %s5195_s1  }
  0x34   :  { %s5198_s0 = smov [#allocation17]   ;;  %s5199_s18 = smov [#allocation2]  }
  0x35   :  { %s140_s30 = sshll.u32 %s5198_s0, 4  ;;  %s38_s20 = sshll.u32 %s5199_s18, 4  ;;  %s141_s30 = int_to_ptr.vmem [resolvable:$true] %s140_s30  ;;  %s39_s20 = int_to_ptr.vmem [resolvable:$true] %s38_s20 }
  0x36   :  { %s5004_s7 = scalar_lea.vmem %s141_s30, 32  ;;  %p5009_p7 = scmp.lt.s32.totalorder %s141_s30, %s141_s30 }
  0x37   :  { %p5005_p6 = scmp.ne.s32.totalorder %s141_s30, %s5004_s7  ;;  %p5010_p8 = scmp.lt.s32.totalorder %s5004_s7, %s5004_s7 }
  0x39   :  { %p5011_p9 = por %p5010_p8, %p5009_p7 }
  0x3b   :  { %p5012_p10 = pnand %p5011_p9, %p5005_p6 }
  0x3d   :  { %5015 = shalt.err (!%p5012_p10)
}
  0x3e   :  { %143 = dma.hbm_to_vmem [thread:$0]  %s5939_s13, 32, %s141_s30, [#allocation18]  }
  0x3f   :  { %s5024_s23 = scalar_lea.vmem %s39_s20, 16  ;;  %s5028_s11 = scalar_lea.vmem %s39_s20, 32 }
  0x40   :  { %p5025_p11 = scmp.ne.s32.totalorder %s39_s20, %s5024_s23  ;;  %p5029_p12 = scmp.lt.s32.totalorder %s39_s20, %s39_s20 }
  0x41   :  { %p5030_p13 = scmp.lt.s32.totalorder %s5028_s11, %s5024_s23 }
  0x43   :  { %p5031_p0 = por %p5030_p13, %p5029_p12 }
  0x45   :  { %p5032_p1 = pnand %p5031_p0, %p5025_p11 }
  0x47   :  { %5035 = shalt.err (!%p5032_p1)
}
  0x48   :  { %s5947_s26 = sld [smem:[#allocation32_spill]]  ;;  %s5200_s2 = smov [#allocation7]  }
  0x49   :  { %s57_s25 = sshll.u32 %s5200_s2, 4  ;;  %s58_s25 = int_to_ptr.vmem [resolvable:$true] %s57_s25 }
  0x4a   :  { %s5044_s28 = scalar_lea.vmem %s58_s25, 6144  ;;  %p5049_p3 = scmp.lt.s32.totalorder %s58_s25, %s58_s25 }
  0x4b   :  { %p5045_p2 = scmp.ne.s32.totalorder %s58_s25, %s5044_s28  ;;  %p5050_p4 = scmp.lt.s32.totalorder %s5044_s28, %s5044_s28 }
  0x4d   :  { %p5051_p5 = por %p5050_p4, %p5049_p3 }
  0x4e   :  { %41 = dma.hbm_to_vmem [thread:$0]  %s5947_s26, 16, %s39_s20, [#allocation3]  }
  0x4f   :  { %p5052_p6 = pnand %p5051_p5, %p5045_p2 }
  0x51   :  { %5055 = shalt.err (!%p5052_p6)
}
  0x52   :  { %s5201_s13 = smov 192   ;;  %s5202_s29 = smov 12  }
  0x53   :  { %63 = dma.hbm_to_vmem [thread:$0]  %s5929_s3, 6144, %s58_s25, [#allocation6], %s5201_s13, %s5201_s13, %s5202_s29  }
  0x54   :  { %s5203_s0 = smov [#allocation10]   ;;  %s5204_s18 = smov [#allocation13]  }
  0x55   :  { %s84_s30 = sshll.u32 %s5203_s0, 4  ;;  %s104_s20 = sshll.u32 %s5204_s18, 4  ;;  %s85_s30 = int_to_ptr.vmem [resolvable:$true] %s84_s30  ;;  %s105_s20 = int_to_ptr.vmem [resolvable:$true] %s104_s20 }
  0x56   :  { %s5064_s7 = scalar_lea.vmem %s85_s30, 32  ;;  %p5069_p8 = scmp.lt.s32.totalorder %s85_s30, %s85_s30 }
  0x57   :  { %p5065_p7 = scmp.ne.s32.totalorder %s85_s30, %s5064_s7  ;;  %p5070_p9 = scmp.lt.s32.totalorder %s5064_s7, %s5064_s7 }
  0x59   :  { %p5071_p10 = por %p5070_p9, %p5069_p8 }
  0x5b   :  { %p5072_p11 = pnand %p5071_p10, %p5065_p7 }
  0x5d   :  { %5075 = shalt.err (!%p5072_p11)
}
  0x5e   :  { %87 = dma.hbm_to_vmem [thread:$0]  %s5932_s6, 32, %s85_s30, [#allocation9]  }
  0x5f   :  { %s5084_s23 = scalar_lea.vmem %s105_s20, 32  ;;  %p5089_p13 = scmp.lt.s32.totalorder %s105_s20, %s105_s20 }
  0x60   :  { %p5085_p12 = scmp.ne.s32.totalorder %s105_s20, %s5084_s23  ;;  %p5090_p0 = scmp.lt.s32.totalorder %s5084_s23, %s5084_s23 }
  0x62   :  { %p5091_p1 = por %p5090_p0, %p5089_p13 }
  0x64   :  { %p5092_p2 = pnand %p5091_p1, %p5085_p12 }
  0x66   :  { %5095 = shalt.err (!%p5092_p2)
}
  0x67   :  { %107 = dma.hbm_to_vmem [thread:$0]  %s5934_s8, 32, %s105_s20, [#allocation12]  }
  0x68   :  { %s5205_s1 = smov [#allocation16]   ;;  %s5206_s26 = smov [#allocation19]  }
  0x69   :  { %s130_s24 = sshll.u32 %s5205_s1, 4  ;;  %s150_s2 = sshll.u32 %s5206_s26, 4  ;;  %s131_s24 = int_to_ptr.vmem [resolvable:$true] %s130_s24  ;;  %s151_s2 = int_to_ptr.vmem [resolvable:$true] %s150_s2 }
  0x6a   :  { %s5104_s25 = scalar_lea.vmem %s131_s24, 32  ;;  %p5109_p4 = scmp.lt.s32.totalorder %s131_s24, %s131_s24 }
  0x6b   :  { %p5105_p3 = scmp.ne.s32.totalorder %s131_s24, %s5104_s25  ;;  %p5110_p5 = scmp.lt.s32.totalorder %s5104_s25, %s5104_s25 }
  0x6d   :  { %p5111_p6 = por %p5110_p5, %p5109_p4 }
  0x6f   :  { %p5112_p7 = pnand %p5111_p6, %p5105_p3 }
  0x71   :  { %5115 = shalt.err (!%p5112_p7)
}
  0x72   :  { %133 = dma.hbm_to_vmem [thread:$0]  %s5938_s12, 32, %s131_s24, [#allocation15]  }
  0x73   :  { %s5124_s13 = scalar_lea.vmem %s151_s2, 32  ;;  %p5129_p9 = scmp.lt.s32.totalorder %s151_s2, %s151_s2 }
  0x74   :  { %p5125_p8 = scmp.ne.s32.totalorder %s151_s2, %s5124_s13  ;;  %p5130_p10 = scmp.lt.s32.totalorder %s5124_s13, %s5124_s13 }
  0x76   :  { %p5131_p11 = por %p5130_p10, %p5129_p9 }
  0x78   :  { %p5132_p12 = pnand %p5131_p11, %p5125_p8 }
  0x7a   :  { %5135 = shalt.err (!%p5132_p12)
}
  0x7b   :  { %153 = dma.hbm_to_vmem [thread:$0]  %s5940_s14, 32, %s151_s2, [#allocation18]  }
  0x7c   :  { %s5207_s5 = smov [#allocation20]  }
  0x7d   :  { %s162_s27 = sshll.u32 %s5207_s5, 4  ;;  %s163_s27 = int_to_ptr.vmem [resolvable:$true] %s162_s27 }
  0x7e   :  { %s5144_s0 = scalar_lea.vmem %s163_s27, 16  ;;  %s5148_s30 = scalar_lea.vmem %s163_s27, 32 }
  0x7f   :  { %p5145_p13 = scmp.ne.s32.totalorder %s163_s27, %s5144_s0  ;;  %p5149_p0 = scmp.lt.s32.totalorder %s163_s27, %s163_s27 }
  0x80   :  { %p5150_p1 = scmp.lt.s32.totalorder %s5148_s30, %s5144_s0 }
  0x82   :  { %p5151_p2 = por %p5150_p1, %p5149_p0 }
  0x84   :  { %p5152_p3 = pnand %p5151_p2, %p5145_p13 }
  0x86   :  { %5155 = shalt.err (!%p5152_p3)
}
  0x87   :  { %165 = dma.hbm_to_vmem [thread:$0]  %s5942_s16, 16, %s163_s27, [#allocation21]  }
  0x88   :  { %5176 = dma.done.wait [#allocation3], 16  }
  0x89   :  { %5177 = vsyncadd [#allocation3], 4294967280 }
  0x8a   :  { %5178 = dma.done.wait [#allocation6], 6160  }
  0x8b   :  { %5179 = vsyncadd [#allocation6], 4294961136 }
  0x8c   :  { %5180 = dma.done.wait [#allocation9], 2080  }
  0x8d   :  { %5181 = vsyncadd [#allocation9], 4294965216 }
  0x8e   :  { %5182 = dma.done.wait [#allocation12], 64  }
  0x8f   :  { %5183 = vsyncadd [#allocation12], 4294967232 }
  0x90   :  { %5184 = dma.done.wait [#allocation15], 4128  }
  0x91   :  { %5185 = vsyncadd [#allocation15], 4294963168 }
  0x92   :  { %5186 = dma.done.wait [#allocation18], 64  }
  0x93   :  { %5187 = vsyncadd [#allocation18], 4294967232 }
  0x94   :  { %5188 = dma.done.wait [#allocation21], 16  }
  0x95   :  { %5189 = vsyncadd [#allocation21], 4294967280  ;;  %s5948_s7 = sld [smem:[#allocation31_spill]]  ;;  %v4648_v2 = vld [vmem:[#allocation7 + $0xac] ss:$12 sps:$4 sm:$0xff]   ;;  %v5208_v4 = vmov 0.0   ;;  %v352_v53 = vlaneseq }
  0x96   :  { %v4650_v3 = vld [vmem:[#allocation7 + $0xa8] ss:$12 sps:$4 sm:$0xff]   ;;  %4304 = vmatprep.subr.bf16.mxu1 %v5208_v4  ;;  %v4651_v5 = vld [vmem:[#allocation7 + $0xb0] ss:$12 sps:$4 sm:$0xff]   ;;  %495 = vmatprep.subr.bf16.mxu0 %v4648_v2  ;;  %v4655_v16 = vld [vmem:[#allocation7 + $0x98] ss:$12 sps:$4 sm:$0xff]  }
  0x97   :  { %496 = vmatpush1.bf16.msra.mxu0 %v4650_v3  ;;  %4305 = vmatpush3.bf16.msra.mxu1 %v4651_v5  ;;  %v4652_v14 = vld [vmem:[#allocation7 + $0x94] ss:$12 sps:$4 sm:$0xff]   ;;  %v4654_v15 = vld [vmem:[#allocation7 + $0x90] ss:$12 sps:$4 sm:$0xff]   ;;  %v4658_v18 = vld [vmem:[#allocation7 + $0x78] ss:$12 sps:$4 sm:$0xff]  }
  0x98   :  { %4306 = vmatprep.subr.bf16.mxu1 %v5208_v4  ;;  %497 = vmatprep.subr.bf16.mxu0 %v4652_v14  ;;  %v4656_v17 = vld [vmem:[#allocation7 + $0x7c] ss:$12 sps:$4 sm:$0xff]   ;;  %v4659_v19 = vld [vmem:[#allocation7 + $0x80] ss:$12 sps:$4 sm:$0xff]   ;;  %v4660_v20 = vld [vmem:[#allocation7 + $0x64] ss:$12 sps:$4 sm:$0xff]  }
  0x99   :  { %v4662_v21 = vld [vmem:[#allocation7 + $0x60] ss:$12 sps:$4 sm:$0xff]   ;;  %v4663_v22 = vld [vmem:[#allocation7 + $0x68] ss:$12 sps:$4 sm:$0xff]   ;;  %v4667_v25 = vld [vmem:[#allocation7 + $0x50] ss:$12 sps:$4 sm:$0xff]  }
  0x9a   :  { %v4664_v23 = vld [vmem:[#allocation7 + $0x4c] ss:$12 sps:$4 sm:$0xff]   ;;  %v4666_v24 = vld [vmem:[#allocation7 + $0x48] ss:$12 sps:$4 sm:$0xff]   ;;  %v5209_v27 = vmov 0   ;;  %vm5210_vm0 = vmmov 0  }
  0x9b   :  { %v203_v0 = vld [vmem:[%s5948_s7] sm:$0xff]  ;;  %v204_v1 = vld [vmem:[%s5948_s7 + $0x8] sm:$0xff]  ;;  %498 = vmatpush1.bf16.msra.mxu0 %v4654_v15  ;;  %4307 = vmatpush3.bf16.msra.mxu1 %v4655_v16  ;;  %v5383_v54 = vshrl.u32 %v352_v53, 7  ;;  %vm651_vm1 = vcmask 261120   ;;  %s5211_s3 = smov 96   ;;  %s5212_s11 = smov 32  }
  0x9c   :  { %207 = vadd.xlane.f32.xlu0 %v203_v0  ;;  %4308 = vmatprep.subr.bf16.mxu1 %v5208_v4  ;;  %v4668_v26 = vld [vmem:[#allocation7 + $0x34] ss:$12 sps:$4 sm:$0xff]   ;;  %v4670_v28 = vld [vmem:[#allocation7 + $0x30] ss:$12 sps:$4 sm:$0xff]   ;;  %v4671_v29 = vld [vmem:[#allocation7 + $0x38] ss:$12 sps:$4 sm:$0xff]  }
  0x9d   :  { %499 = vmatprep.subr.bf16.mxu0 %v4656_v17  ;;  %527 = vmatprep.mubr.bf16.mxu0 %v5209_v27  ;;  %v4672_v30 = vld [vmem:[#allocation7 + $0x1c] ss:$12 sps:$4 sm:$0xff]   ;;  %v4674_v31 = vld [vmem:[#allocation7 + $0x18] ss:$12 sps:$4 sm:$0xff]   ;;  %v4675_v32 = vld [vmem:[#allocation7 + $0x20] ss:$12 sps:$4 sm:$0xff]  }
  0x9e   :  { %4320 = vmatprep.mubr.msk.bf16.mxu1 %vm5210_vm0, %v5208_v4  ;;  %v4676_v33 = vld [vmem:[#allocation7 + $0x4] ss:$12 sps:$4 sm:$0xff]   ;;  %v4678_v34 = vld [vmem:[#allocation7] ss:$12 sps:$4 sm:$0xff]   ;;  %v4679_v35 = vld [vmem:[#allocation7 + $0x8] ss:$12 sps:$4 sm:$0xff]  }
  0x9f   :  { %500 = vmatpush1.bf16.msra.mxu0 %v4658_v18  ;;  %4309 = vmatpush3.bf16.msra.mxu1 %v4659_v19  ;;  %v3890_v44 = vld [vmem:[#allocation2] ss:$0 sm:$0xff]  ;;  %v3891_v48 = vld [vmem:[#allocation5] ss:$0 sm:$0xff]  ;;  %v5386_v55 = vsub.s32 1, %v5383_v54  ;;  %v5389_v56 = vsub.s32 0, %v5383_v54 }
  0xa0   :  { %209 = vadd.xlane.f32.xlu0 %v204_v1  ;;  %4310 = vmatprep.subr.bf16.mxu1 %v5208_v4  ;;  %v278_v57 = vld [vmem:[%s5930_s4] sm:$0x7]  ;;  %v362_v58 = vsub.s32 2, %v5383_v54  ;;  %vm1120_vm2 = vcmask 1043456   ;;  %vm1020_vm3 = vcmask 64512   ;;  %vm1512_vm4 = vcmask 523264  }
  0xa1   :  { %501 = vmatprep.subr.bf16.mxu0 %v4660_v20  ;;  %v359_v59 = vrot.slane %v278_v57, %v5386_v55  ;;  %v355_v60 = vrot.slane %v278_v57, %v5389_v56  ;;  %vm1515_vm5 = vcmask 785408   ;;  %vm3754_vm6 = vcmask 1040384  }
  0xa2   :  { %v363_v63 = vrot.slane %v278_v57, %v362_v58 }
  0xa3   :  { %502 = vmatpush1.bf16.msra.mxu0 %v4662_v21  ;;  %4311 = vmatpush3.bf16.msra.mxu1 %v4663_v22 }
  0xa4   :  { %503 = vmatprep.subr.bf16.mxu0 %v4664_v23  ;;  %4312 = vmatprep.subr.bf16.mxu1 %v5208_v4 }
  0xa7   :  { %504 = vmatpush1.bf16.msra.mxu0 %v4666_v24  ;;  %4313 = vmatpush3.bf16.msra.mxu1 %v4667_v25 }
  0xa8   :  { %505 = vmatprep.subr.bf16.mxu0 %v4668_v26  ;;  %4314 = vmatprep.subr.bf16.mxu1 %v5208_v4 }
  0xab   :  { %506 = vmatpush1.bf16.msra.mxu0 %v4670_v28  ;;  %4315 = vmatpush3.bf16.msra.mxu1 %v4671_v29 }
  0xac   :  { %507 = vmatprep.subr.bf16.mxu0 %v4672_v30  ;;  %4316 = vmatprep.subr.bf16.mxu1 %v5208_v4 }
  0xaf   :  { %508 = vmatpush1.bf16.msra.mxu0 %v4674_v31  ;;  %4317 = vmatpush3.bf16.msra.mxu1 %v4675_v32 }
  0xb0   :  { %509 = vmatprep.subr.bf16.mxu0 %v4676_v33  ;;  %4318 = vmatprep.subr.bf16.mxu1 %v5208_v4 }
  0xb3   :  { %510 = vmatpush1.bf16.msra.mxu0 %v4678_v34  ;;  %4319 = vmatpush3.bf16.msra.mxu1 %v4679_v35 }
  0xb4   :  { %4324 = vmatprep.subr.bf16.mxu0 %v5208_v4  ;;  %4330 = vmatprep.subr.bf16.mxu1 %v5208_v4 }
 0x125   :  { %v208_v6 = vpop.xlane.xlu0 %207 }
 0x126   :  { %v212_v7 = vmul.f32 0.0078125, %v208_v6 }
 0x128   :  { %v5352_v8 = vsub.f32 %v203_v0, %v212_v7 }
 0x129   :  { %v210_v9 = vpop.xlane.xlu0 %209 }
 0x12a   :  { %v213_v10 = vmul.f32 0.0078125, %v210_v9  ;;  %v216_v11 = vmul.f32 %v5352_v8, %v5352_v8 }
 0x12c   :  { %v5356_v12 = vsub.f32 %v204_v1, %v213_v10  ;;  %218 = vadd.xlane.f32.xlu1 %v216_v11 }
 0x12e   :  { %v217_v13 = vmul.f32 %v5356_v12, %v5356_v12 }
 0x130   :  { %220 = vadd.xlane.f32.xlu1 %v217_v13 }
 0x1b5   :  { %v219_v36 = vpop.xlane.xlu1 %218 }
 0x1b6   :  { %v222_v37 = vmul.f32 0.0078125, %v219_v36 }
 0x1b8   :  { %v224_v38 = vadd.f32 1e-12, %v222_v37 }
 0x1b9   :  { %v221_v39 = vpop.xlane.xlu1 %220 }
 0x1ba   :  { %4816 = vrsqrt.f32 %v224_v38  ;;  %v223_v40 = vmul.f32 0.0078125, %v221_v39 }
 0x1bc   :  { %v225_v41 = vadd.f32 1e-12, %v223_v40 }
 0x1be   :  { %4818 = vrsqrt.f32 %v225_v41 }
 0x1c7   :  { %v4817_v42 = vpop.eup %4816 }
 0x1c8   :  { %v228_v43 = vmul.f32 %v4817_v42, %v5352_v8 }
 0x1ca   :  { %v236_v47 = vmul.f32 %v3890_v44, %v228_v43 }
 0x1cb   :  { %v4819_v45 = vpop.eup %4818 }
 0x1cc   :  { %v229_v46 = vmul.f32 %v4819_v45, %v5356_v12  ;;  %v5373_v50 = vadd.f32 %v3891_v48, %v236_v47 }
 0x1ce   :  { %v237_v49 = vmul.f32 %v3890_v44, %v229_v46 }
 0x1d0   :  { %v5375_v51 = vadd.f32 %v3891_v48, %v237_v49 }
 0x1d2   :  { %v350_v52 = vpack.c.bf16 %v5375_v51, %v5373_v50 }
 0x1d4   :  { %528 = vmatmul.mubr.bf16.vlgmr.msra.gmra.mxu0 %v350_v52  ;;  %4321 = vmatmul.mubr.bf16.vlgmr.msra.gmra.mxu1 %v350_v52 }
 0x1d5   :  { %4326 = vmatprep.mubr.msk.bf16.mxu0 %vm5210_vm0, %v5208_v4  ;;  %4332 = vmatprep.mubr.msk.bf16.mxu1 %vm5210_vm0, %v5208_v4 }
 0x294   :  { %v529_v61 = vpop.f32.mrf.mxu0  ;;  %v572_v62 = vpop.f32.mrf.mxu1 }
 0x295   :  { %v530_v3 = vadd.f32 %v529_v61, %v355_v60  ;;  %v5399_v7 = vadd.f32 %v572_v62, %v363_v63 }
 0x296   :  { %v531_v0 = vpop.f32.mrf.mxu0  ;;  %v4322_v1 = vpop.f32.mrf.mxu1 }
 0x297   :  { %v532_v2 = vadd.f32 %v531_v0, %v359_v59  ;;  %v4139_v20 = vpack.c.bf16 %v530_v3, %v530_v3  ;;  %v4143_v45 = vpack.c.bf16 %v5399_v7, %v5399_v7 }
 0x298   :  { %v533_v5 = vpop.f32.mrf.mxu0  ;;  %v575_v6 = vpop.f32.mrf.mxu1 }
 0x299   :  { %v4141_v8 = vpack.c.bf16 %v532_v2, %v532_v2  ;;  %v534_v9 = vadd.f32 %v533_v5, %v355_v60  ;;  %v5401_v10 = vadd.f32 %v575_v6, %v363_v63  ;;  %v1122_v49 = vsel %vm1120_vm2, %v4143_v45, 0 }
 0x29a   :  { %v535_v11 = vpop.f32.mrf.mxu0  ;;  %v4323_v12 = vpop.f32.mrf.mxu1 }
 0x29b   :  { %v579_v13 = vpack.c.bf16 %v534_v9, %v530_v3  ;;  %v5405_v14 = vpack.c.bf16 %v5401_v10, %v5399_v7  ;;  %v536_v15 = vadd.f32 %v535_v11, %v359_v59  ;;  %v656_v16 = vsel %vm651_vm1, %v4141_v8, 0 }
 0x29c   :  { %4325 = vmatpush3.bf16.xpose.msra.mxu0 %v656_v16  ;;  %v4140_v21 = vpack.c.bf16 %v534_v9, %v534_v9  ;;  %v4144_v46 = vpack.c.bf16 %v5401_v10, %v5401_v10 }
 0x29d   :  { %583 = vrot.lane.b32.xlu1 %v579_v13, %s5211_s3  ;;  %v580_v17 = vpack.c.bf16 %v536_v15, %v532_v2  ;;  %v4142_v18 = vpack.c.bf16 %v536_v15, %v536_v15  ;;  %4336 = vmatprep.subr.bf16.mxu0 %v5208_v4 }
 0x29e   :  { %v1168_v52 = vsel %vm1120_vm2, %v4144_v46, 0 }
 0x29f   :  { %606 = vrot.lane.b32.xlu0 %v580_v17, %s5211_s3  ;;  %v702_v19 = vsel %vm651_vm1, %v4142_v18, 0 }
 0x2a0   :  { %4331 = vmatpush3.bf16.xpose.msra.mxu1 %v702_v19 }
 0x2a1   :  { %608 = vrot.lane.b32.xlu1 %v580_v17, %s5194_s19  ;;  %4342 = vmatprep.subr.bf16.mxu1 %v5208_v4 }
 0x2a3   :  { %610 = vrot.lane.b32.xlu0 %v580_v17, %s5212_s11  ;;  %4327 = vmatmul.mubr.msk.bf16.vlgmr.msra.gmra.mxu0 %vm651_vm1, %v4139_v20 }
 0x2a4   :  { %4338 = vmatprep.mubr.msk.bf16.mxu0 %vm5210_vm0, %v5208_v4 }
 0x2a5   :  { %585 = vrot.lane.b32.xlu1 %v579_v13, %s5194_s19 }
 0x2a7   :  { %4333 = vmatmul.mubr.msk.bf16.vlgmr.msra.gmra.mxu1 %vm651_vm1, %v4140_v21 }
 0x2a8   :  { %4344 = vmatprep.mubr.msk.bf16.mxu1 %vm5210_vm0, %v5208_v4 }
 0x2a9   :  { %587 = vrot.lane.b32.xlu1 %v579_v13, %s5212_s11 }
 0x30f   :  { %v584_v22 = vpop.permute.xlu1 %583 }
 0x310   :  { %v3918_v32 = vcombine.low %v584_v22, %v584_v22  ;;  %v3919_v33 = vcombine.high %v584_v22, %v584_v22 }
 0x311   :  { %v607_v23 = vpop.permute.xlu0 %606 }
 0x312   :  { %v3926_v24 = vcombine.low %v607_v23, %v607_v23  ;;  %v3927_v25 = vcombine.high %v607_v23, %v607_v23 }
 0x313   :  { %v609_v29 = vpop.permute.xlu1 %608 }
 0x314   :  { %v794_v26 = vsel %vm651_vm1, %v3927_v25, 0  ;;  %v748_v28 = vsel %vm651_vm1, %v3926_v24, 0  ;;  %v3928_v30 = vcombine.low %v609_v29, %v609_v29  ;;  %v3929_v31 = vcombine.high %v609_v29, %v609_v29 }
 0x315   :  { %4343 = vmatpush3.bf16.xpose.msra.mxu1 %v794_v26  ;;  %4337 = vmatpush3.bf16.xpose.msra.mxu0 %v748_v28  ;;  %v611_v36 = vpop.permute.xlu0 %610 }
 0x316   :  { %4348 = vmatprep.subr.bf16.mxu0 %v5208_v4  ;;  %4354 = vmatprep.subr.bf16.mxu1 %v5208_v4  ;;  %v840_v34 = vsel %vm651_vm1, %v3928_v30, 0  ;;  %v886_v35 = vsel %vm651_vm1, %v3929_v31, 0  ;;  %v3930_v38 = vcombine.low %v611_v36, %v611_v36  ;;  %v3931_v39 = vcombine.high %v611_v36, %v611_v36 }
 0x317   :  { %v586_v37 = vpop.permute.xlu1 %585 }
 0x318   :  { %v3920_v40 = vcombine.low %v586_v37, %v586_v37  ;;  %v3921_v41 = vcombine.high %v586_v37, %v586_v37  ;;  %v932_v42 = vsel %vm651_vm1, %v3930_v38, 0  ;;  %v978_v43 = vsel %vm651_vm1, %v3931_v39, 0 }
 0x31b   :  { %v588_v44 = vpop.permute.xlu1 %587 }
 0x31c   :  { %4339 = vmatmul.mubr.msk.bf16.vlgmr.msra.gmra.mxu0 %vm651_vm1, %v3918_v32  ;;  %4345 = vmatmul.mubr.msk.bf16.vlgmr.msra.gmra.mxu1 %vm651_vm1, %v3919_v33  ;;  %v3922_v47 = vcombine.low %v588_v44, %v588_v44  ;;  %v3923_v48 = vcombine.high %v588_v44, %v588_v44 }
 0x31d   :  { %4349 = vmatpush3.bf16.xpose.msra.mxu0 %v840_v34  ;;  %4355 = vmatpush3.bf16.xpose.msra.mxu1 %v886_v35 }
 0x31e   :  { %4350 = vmatprep.mubr.msk.bf16.mxu0 %vm5210_vm0, %v5208_v4  ;;  %4356 = vmatprep.mubr.msk.bf16.mxu1 %vm5210_vm0, %v5208_v4 }
 0x31f   :  { %4360 = vmatprep.subr.bf16.mxu0 %v5208_v4  ;;  %4366 = vmatprep.subr.bf16.mxu1 %v5208_v4 }
 0x324   :  { %4351 = vmatmul.mubr.msk.bf16.vlgmr.msra.gmra.mxu0 %vm651_vm1, %v3920_v40  ;;  %4357 = vmatmul.mubr.msk.bf16.vlgmr.msra.gmra.mxu1 %vm651_vm1, %v3921_v41 }
 0x325   :  { %4361 = vmatpush3.bf16.xpose.msra.mxu0 %v932_v42  ;;  %4367 = vmatpush3.bf16.xpose.msra.mxu1 %v978_v43 }
 0x326   :  { %4362 = vmatprep.mubr.msk.bf16.mxu0 %vm5210_vm0, %v5208_v4  ;;  %4368 = vmatprep.mubr.msk.bf16.mxu1 %vm5210_vm0, %v5208_v4 }
 0x327   :  { %4372 = vmatprep.subr.bf16.mxu0 %v5208_v4  ;;  %4378 = vmatprep.subr.bf16.mxu1 %v5208_v4 }
 0x32c   :  { %4363 = vmatmul.mubr.msk.bf16.vlgmr.msra.gmra.mxu0 %vm651_vm1, %v3922_v47  ;;  %4369 = vmatmul.mubr.msk.bf16.vlgmr.msra.gmra.mxu1 %vm651_vm1, %v3923_v48 }
 0x32d   :  { %4373 = vmatpush3.bf16.msra.mxu0 %v1122_v49  ;;  %4379 = vmatpush3.bf16.msra.mxu1 %v1168_v52 }
 0x32e   :  { %4374 = vmatprep.mubr.msk.bf16.mxu0 %vm5210_vm0, %v5208_v4  ;;  %4380 = vmatprep.mubr.msk.bf16.mxu1 %vm5210_vm0, %v5208_v4 }
 0x32f   :  { %4384 = vmatprep.subr.bf16.mxu0 %v5208_v4  ;;  %4390 = vmatprep.subr.bf16.mxu1 %v5208_v4 }
 0x363   :  { %v692_v53 = vpop.f32.mrf.mxu0 }
 0x364   :  { %v1021_v57 = vsel %vm1020_vm3, %v692_v53, -inf }
 0x365   :  { %1022 = vmax.xlane.f32.xlu0 %v1021_v57  ;;  %v4328_v59 = vpop.f32.mrf.mxu0 }
 0x367   :  { %v695_v60 = vpop.f32.mrf.mxu0  ;;  %v738_v61 = vpop.f32.mrf.mxu1 }
 0x368   :  { %v1024_v62 = vsel %vm1020_vm3, %v738_v61, -inf }
 0x369   :  { %v4329_v63 = vpop.f32.mrf.mxu0  ;;  %v4334_v0 = vpop.f32.mrf.mxu1  ;;  %1025 = vmax.xlane.f32.xlu1 %v1024_v62 }
 0x36b   :  { %v741_v1 = vpop.f32.mrf.mxu1 }
 0x36d   :  { %v4335_v2 = vpop.f32.mrf.mxu1 }
 0x3dc   :  { %v784_v3 = vpop.f32.mrf.mxu0  ;;  %v830_v5 = vpop.f32.mrf.mxu1 }
 0x3dd   :  { %v1027_v6 = vsel %vm1020_vm3, %v784_v3, -inf  ;;  %v1030_v11 = vsel %vm1020_vm3, %v830_v5, -inf }
 0x3de   :  { %v4346_v7 = vpop.f32.mrf.mxu1  ;;  %1028 = vmax.xlane.f32.xlu0 %v1027_v6  ;;  %v4340_v8 = vpop.f32.mrf.mxu0 }
 0x3e0   :  { %v787_v9 = vpop.f32.mrf.mxu0  ;;  %v833_v10 = vpop.f32.mrf.mxu1 }
 0x3e2   :  { %v4347_v12 = vpop.f32.mrf.mxu1  ;;  %1031 = vmax.xlane.f32.xlu0 %v1030_v11  ;;  %v4341_v13 = vpop.f32.mrf.mxu0 }
 0x3e4   :  { %v876_v15 = vpop.f32.mrf.mxu0  ;;  %v922_v16 = vpop.f32.mrf.mxu1 }
 0x3e5   :  { %v1036_v17 = vsel %vm1020_vm3, %v922_v16, -inf  ;;  %v1033_v18 = vsel %vm1020_vm3, %v876_v15, -inf }
 0x3e6   :  { %1037 = vmax.xlane.f32.xlu1 %v1036_v17  ;;  %v4358_v19 = vpop.f32.mrf.mxu1  ;;  %1034 = vmax.xlane.f32.xlu0 %v1033_v18  ;;  %v4352_v20 = vpop.f32.mrf.mxu0 }
 0x3e8   :  { %v879_v21 = vpop.f32.mrf.mxu0  ;;  %v925_v22 = vpop.f32.mrf.mxu1 }
 0x3ea   :  { %v4353_v23 = vpop.f32.mrf.mxu0  ;;  %v4359_v24 = vpop.f32.mrf.mxu1 }
 0x3ec   :  { %v968_v25 = vpop.f32.mrf.mxu0  ;;  %v5467_v26 = vpop.f32.mrf.mxu1 }
 0x3ed   :  { %v1042_v28 = vsel %vm1020_vm3, %v5467_v26, -inf  ;;  %v1039_v29 = vsel %vm1020_vm3, %v968_v25, -inf }
 0x3ee   :  { %v1023_v30 = vpop.xlane.xlu0 %1022  ;;  %1043 = vmax.xlane.f32.xlu1 %v1042_v28  ;;  %v4370_v31 = vpop.f32.mrf.mxu1  ;;  %1040 = vmax.xlane.f32.xlu0 %v1039_v29 }
 0x3ef   :  { %v1045_v32 = vsub.f32 %v692_v53, %v1023_v30  ;;  %v4364_v33 = vpop.f32.mrf.mxu0 }
 0x3f0   :  { %v1017_v34 = vpop.f32.mrf.mxu1 }
 0x3f1   :  { %v1053_v35 = vmul.f32 1.442695, %v1045_v32  ;;  %v971_v36 = vpop.f32.mrf.mxu0 }
 0x3f2   :  { %v4371_v37 = vpop.f32.mrf.mxu1  ;;  %v1026_v38 = vpop.xlane.xlu1 %1025 }
 0x3f3   :  { %4820 = vpow2.f32 %v1053_v35  ;;  %v4365_v39 = vpop.f32.mrf.mxu0  ;;  %v1046_v40 = vsub.f32 %v738_v61, %v1026_v38 }
 0x3f5   :  { %v1055_v41 = vmul.f32 1.442695, %v1046_v40 }
 0x3f7   :  { %4822 = vpow2.f32 %v1055_v41 }
 0x400   :  { %v4821_v42 = vpop.eup %4820 }
 0x401   :  { %v1069_v43 = vsel %vm1020_vm3, %v4821_v42, 0.0 }
 0x402   :  { %1070 = vadd.xlane.f32.xlu0 %v1069_v43 }
 0x404   :  { %v4823_v44 = vpop.eup %4822 }
 0x405   :  { %v1072_v45 = vsel %vm1020_vm3, %v4823_v44, 0.0 }
 0x406   :  { %1073 = vadd.xlane.f32.xlu1 %v1072_v45 }
 0x467   :  { %v1029_v46 = vpop.xlane.xlu0 %1028 }
 0x468   :  { %v1047_v47 = vsub.f32 %v784_v3, %v1029_v46 }
 0x46a   :  { %v1057_v48 = vmul.f32 1.442695, %v1047_v47 }
 0x46b   :  { %v1032_v49 = vpop.xlane.xlu0 %1031 }
 0x46c   :  { %4824 = vpow2.f32 %v1057_v48  ;;  %v1048_v52 = vsub.f32 %v830_v5, %v1032_v49 }
 0x46e   :  { %v1059_v53 = vmul.f32 1.442695, %v1048_v52 }
 0x46f   :  { %v1035_v57 = vpop.xlane.xlu0 %1034  ;;  %v1038_v59 = vpop.xlane.xlu1 %1037 }
 0x470   :  { %4826 = vpow2.f32 %v1059_v53  ;;  %v1049_v60 = vsub.f32 %v876_v15, %v1035_v57  ;;  %v1050_v61 = vsub.f32 %v922_v16, %v1038_v59 }
 0x472   :  { %v1061_v62 = vmul.f32 1.442695, %v1049_v60  ;;  %v1063_v63 = vmul.f32 1.442695, %v1050_v61 }
 0x474   :  { %4828 = vpow2.f32 %v1061_v62 }
 0x475   :  { %4830 = vpow2.f32 %v1063_v63 }
 0x477   :  { %v1041_v0 = vpop.xlane.xlu0 %1040  ;;  %v1044_v15 = vpop.xlane.xlu1 %1043 }
 0x478   :  { %v1051_v1 = vsub.f32 %v968_v25, %v1041_v0  ;;  %v1052_v23 = vsub.f32 %v5467_v26, %v1044_v15 }
 0x479   :  { %v4825_v2 = vpop.eup %4824 }
 0x47a   :  { %v1065_v6 = vmul.f32 1.442695, %v1051_v1  ;;  %v1075_v3 = vsel %vm1020_vm3, %v4825_v2, 0.0  ;;  %v1067_v25 = vmul.f32 1.442695, %v1052_v23 }
 0x47b   :  { %1076 = vadd.xlane.f32.xlu0 %v1075_v3 }
 0x47c   :  { %4832 = vpow2.f32 %v1065_v6 }
 0x47d   :  { %v4827_v7 = vpop.eup %4826 }
 0x47e   :  { %v1078_v5 = vsel %vm1020_vm3, %v4827_v7, 0.0 }
 0x47f   :  { %1079 = vadd.xlane.f32.xlu1 %v1078_v5 }
 0x481   :  { %v5476_v8 = vpop.eup %4828 }
 0x482   :  { %v5478_v9 = vpop.eup %4830  ;;  %v1081_v10 = vsel %vm1020_vm3, %v5476_v8, 0.0 }
 0x483   :  { %1082 = vadd.xlane.f32.xlu0 %v1081_v10  ;;  %v1084_v11 = vsel %vm1020_vm3, %v5478_v9, 0.0 }
 0x484   :  { %1085 = vadd.xlane.f32.xlu1 %v1084_v11 }
 0x489   :  { %v5484_v12 = vpop.eup %4832 }
 0x48a   :  { %v1087_v13 = vsel %vm1020_vm3, %v5484_v12, 0.0 }
 0x48b   :  { %1088 = vadd.xlane.f32.xlu0 %v1087_v13  ;;  %v1071_v16 = vpop.xlane.xlu0 %1070 }
 0x48c   :  { %4834 = vrcp.f32 %v1071_v16 }
 0x48f   :  { %v1074_v17 = vpop.xlane.xlu1 %1073 }
 0x490   :  { %4836 = vrcp.f32 %v1074_v17 }
 0x491   :  { %4838 = vpow2.f32 %v1067_v25  ;;  %v4681_v25 = vld [vmem:[#allocation8 + $0x30] sm:$0xff]  }
 0x495   :  { %631 = vrot.lane.b32.xlu1 %v5405_v14, %s5194_s19 }
 0x499   :  { %v4835_v18 = vpop.eup %4834 }
 0x49a   :  { %v1101_v19 = vmul.f32 %v4835_v18, %v4821_v42 }
 0x49c   :  { %v1109_v20 = vpack.c.bf16 %v1101_v19, %v1101_v19 }
 0x49d   :  { %v4837_v21 = vpop.eup %4836 }
 0x49e   :  { %4375 = vmatmul.mubr.msk.bf16.vlgmr.msra.gmra.mxu0 %vm1020_vm3, %v1109_v20  ;;  %v1102_v22 = vmul.f32 %v4837_v21, %v4823_v44  ;;  %v5499_v28 = vpop.eup %4838  ;;  %v4680_v21 = vld [vmem:[#allocation8 + $0x38] sm:$0xff]  }
 0x49f   :  { %4386 = vmatprep.mubr.msk.bf16.mxu0 %vm5210_vm0, %v5208_v4  ;;  %v1090_v29 = vsel %vm1020_vm3, %v5499_v28, 0.0 }
 0x4a0   :  { %v1110_v24 = vpack.c.bf16 %v1102_v22, %v1102_v22 }
 0x4a1   :  { %629 = vrot.lane.b32.xlu0 %v5405_v14, %s5211_s3 }
 0x4a2   :  { %4381 = vmatmul.mubr.msk.bf16.vlgmr.msra.gmra.mxu1 %vm1020_vm3, %v1110_v24 }
 0x4a3   :  { %4392 = vmatprep.mubr.msk.bf16.mxu1 %vm5210_vm0, %v5208_v4 }
 0x4b9   :  { %1091 = vadd.xlane.f32.xlu1 %v1090_v29 }
 0x4ca   :  { %633 = vrot.lane.b32.xlu1 %v5405_v14, %s5212_s11 }
 0x504   :  { %v1077_v26 = vpop.xlane.xlu0 %1076 }
 0x505   :  { %4840 = vrcp.f32 %v1077_v26 }
 0x508   :  { %v1080_v30 = vpop.xlane.xlu1 %1079 }
 0x509   :  { %4842 = vrcp.f32 %v1080_v30 }
 0x50c   :  { %v1083_v31 = vpop.xlane.xlu0 %1082 }
 0x50d   :  { %v1086_v32 = vpop.xlane.xlu1 %1085  ;;  %4844 = vrcp.f32 %v1083_v31  ;;  %v4682_v31 = vld [vmem:[#allocation8 + $0x28] sm:$0xff]  }
 0x50e   :  { %4846 = vrcp.f32 %v1086_v32 }
 0x511   :  { %v632_v36 = vpop.permute.xlu1 %631 }
 0x512   :  { %v4841_v34 = vpop.eup %4840  ;;  %v3936_v42 = vcombine.low %v632_v36, %v632_v36  ;;  %v3937_v43 = vcombine.high %v632_v36, %v632_v36 }
 0x513   :  { %v1103_v40 = vmul.f32 %v4841_v34, %v4825_v2 }
 0x514   :  { %v1089_v33 = vpop.xlane.xlu0 %1088  ;;  %v1306_v49 = vsel %vm1120_vm2, %v3936_v42, 0  ;;  %v1352_v52 = vsel %vm1120_vm2, %v3937_v43, 0  ;;  %v4684_v42 = vld [vmem:[#allocation8 + $0x18] sm:$0xff]   ;;  %v4685_v43 = vld [vmem:[#allocation8 + $0x10] sm:$0xff]  }
 0x515   :  { %v1111_v46 = vpack.c.bf16 %v1103_v40, %v1103_v40  ;;  %4848 = vrcp.f32 %v1089_v33 }
 0x516   :  { %v4843_v35 = vpop.eup %4842 }
 0x517   :  { %v1104_v41 = vmul.f32 %v4843_v35, %v4827_v7 }
 0x518   :  { %v630_v37 = vpop.permute.xlu0 %629 }
 0x519   :  { %v3934_v38 = vcombine.low %v630_v37, %v630_v37  ;;  %v3935_v39 = vcombine.high %v630_v37, %v630_v37  ;;  %v1112_v47 = vpack.c.bf16 %v1104_v41, %v1104_v41  ;;  %v4683_v37 = vld [vmem:[#allocation8 + $0x20] sm:$0xff]  }
 0x51a   :  { %v4845_v45 = vpop.eup %4844 }
 0x51b   :  { %v1214_v14 = vsel %vm1120_vm2, %v3934_v38, 0  ;;  %v1260_v44 = vsel %vm1120_vm2, %v3935_v39, 0  ;;  %v4847_v48 = vpop.eup %4846  ;;  %v1105_v53 = vmul.f32 %v4845_v45, %v5476_v8 }
 0x51c   :  { %4385 = vmatpush3.bf16.msra.mxu0 %v1214_v14  ;;  %4391 = vmatpush3.bf16.msra.mxu1 %v1260_v44  ;;  %v1106_v57 = vmul.f32 %v4847_v48, %v5478_v9  ;;  %v4686_v14 = vld [vmem:[#allocation8 + $0x8] sm:$0xff]   ;;  %v4687_v44 = vld [vmem:[#allocation8] sm:$0xff]  }
 0x51d   :  { %4396 = vmatprep.subr.bf16.mxu0 %v5208_v4  ;;  %4402 = vmatprep.subr.bf16.mxu1 %v5208_v4  ;;  %v1113_v59 = vpack.c.bf16 %v1105_v53, %v1105_v53 }
 0x51e   :  { %v1114_v60 = vpack.c.bf16 %v1106_v57, %v1106_v57 }
 0x51f   :  { %4387 = vmatmul.mubr.msk.bf16.vlgmr.msra.gmra.mxu0 %vm1020_vm3, %v1111_v46  ;;  %4393 = vmatmul.mubr.msk.bf16.vlgmr.msra.gmra.mxu1 %vm1020_vm3, %v1112_v47 }
 0x520   :  { %4397 = vmatpush3.bf16.msra.mxu0 %v1306_v49  ;;  %4403 = vmatpush3.bf16.msra.mxu1 %v1352_v52 }
 0x521   :  { %4398 = vmatprep.mubr.msk.bf16.mxu0 %vm5210_vm0, %v5208_v4  ;;  %4404 = vmatprep.mubr.msk.bf16.mxu1 %vm5210_vm0, %v5208_v4 }
 0x522   :  { %4408 = vmatprep.subr.bf16.mxu0 %v5208_v4  ;;  %4414 = vmatprep.subr.bf16.mxu1 %v5208_v4  ;;  %v4849_v62 = vpop.eup %4848 }
 0x523   :  { %v1107_v2 = vmul.f32 %v4849_v62, %v5484_v12 }
 0x525   :  { %v1115_v7 = vpack.c.bf16 %v1107_v2, %v1107_v2 }
 0x527   :  { %4399 = vmatmul.mubr.msk.bf16.vlgmr.msra.gmra.mxu0 %vm1020_vm3, %v1113_v59  ;;  %4405 = vmatmul.mubr.msk.bf16.vlgmr.msra.gmra.mxu1 %vm1020_vm3, %v1114_v60 }
 0x528   :  { %4410 = vmatprep.mubr.msk.bf16.mxu0 %vm5210_vm0, %v5208_v4  ;;  %4416 = vmatprep.mubr.msk.bf16.mxu1 %vm5210_vm0, %v5208_v4 }
 0x542   :  { %v1092_v61 = vpop.xlane.xlu1 %1091 }
 0x543   :  { %4850 = vrcp.f32 %v1092_v61 }
 0x546   :  { %v634_v63 = vpop.permute.xlu1 %633 }
 0x547   :  { %v3938_v0 = vcombine.low %v634_v63, %v634_v63  ;;  %v3939_v1 = vcombine.high %v634_v63, %v634_v63 }
 0x549   :  { %v1398_v6 = vsel %vm1120_vm2, %v3938_v0, 0  ;;  %v1444_v3 = vsel %vm1120_vm2, %v3939_v1, 0 }
 0x54a   :  { %4409 = vmatpush3.bf16.msra.mxu0 %v1398_v6  ;;  %4415 = vmatpush3.bf16.msra.mxu1 %v1444_v3 }
 0x54b   :  { %4420 = vmatprep.subr.bf16.mxu0 %v5208_v4 }
 0x54d   :  { %4411 = vmatmul.mubr.msk.bf16.vlgmr.msra.gmra.mxu0 %vm1020_vm3, %v1115_v7 }
 0x54e   :  { %4436 = vmatprep.mubr.msk.bf16.mxu0 %vm5210_vm0, %v5208_v4  ;;  %4421 = vmatpush3.bf16.msra.mxu0 %v4680_v21 }
 0x54f   :  { %4422 = vmatprep.subr.bf16.mxu0 %v5208_v4 }
 0x550   :  { %v4851_v5 = vpop.eup %4850 }
 0x551   :  { %v1108_v8 = vmul.f32 %v4851_v5, %v5499_v28 }
 0x552   :  { %4423 = vmatpush3.bf16.msra.mxu0 %v4681_v25 }
 0x553   :  { %v1116_v9 = vpack.c.bf16 %v1108_v8, %v1108_v8  ;;  %4424 = vmatprep.subr.bf16.mxu0 %v5208_v4 }
 0x555   :  { %4417 = vmatmul.mubr.msk.bf16.vlgmr.msra.gmra.mxu1 %vm1020_vm3, %v1116_v9 }
 0x556   :  { %1772 = vmatprep.mubr.bf16.mxu1 %v5209_v27  ;;  %4425 = vmatpush3.bf16.msra.mxu0 %v4682_v31 }
 0x557   :  { %4426 = vmatprep.subr.bf16.mxu0 %v5208_v4 }
 0x55a   :  { %4427 = vmatpush3.bf16.msra.mxu0 %v4683_v37  ;;  %v4699_v37 = vld [vmem:[%s5935_s9 + $0x44] ss:$8 sps:$4 sm:$0xff]  }
 0x55b   :  { %4428 = vmatprep.subr.bf16.mxu0 %v5208_v4 }
 0x55e   :  { %v5537_v10 = vpop.f32.mrf.mxu0  ;;  %4429 = vmatpush3.bf16.msra.mxu0 %v4684_v42  ;;  %v4708_v42 = vld [vmem:[%s5935_s9 + $0x14] ss:$8 sps:$4 sm:$0xff]  }
 0x55f   :  { %4430 = vmatprep.subr.bf16.mxu0 %v5208_v4 }
 0x560   :  { %v4376_v11 = vpop.f32.mrf.mxu0 }
 0x562   :  { %v1161_v12 = vpop.f32.mrf.mxu0  ;;  %v5539_v13 = vpop.f32.mrf.mxu1  ;;  %4431 = vmatpush3.bf16.msra.mxu0 %v4685_v43  ;;  %v4706_v43 = vld [vmem:[%s5935_s9 + $0x10] ss:$8 sps:$4 sm:$0xff]  }
 0x563   :  { %4432 = vmatprep.subr.bf16.mxu0 %v5208_v4 }
 0x564   :  { %v4377_v15 = vpop.f32.mrf.mxu0  ;;  %v4382_v16 = vpop.f32.mrf.mxu1 }
 0x565   :  { %v3956_v16 = vld [vmem:[#allocation10] ss:$0 sm:$0xff] }
 0x566   :  { %v1207_v17 = vpop.f32.mrf.mxu1  ;;  %4433 = vmatpush3.bf16.msra.mxu0 %v4686_v14  ;;  %v4711_v14 = vld [vmem:[%s5935_s9 + $0x4] ss:$8 sps:$4 sm:$0xff]  }
 0x567   :  { %4434 = vmatprep.subr.bf16.mxu0 %v5208_v4 }
 0x568   :  { %v4383_v18 = vpop.f32.mrf.mxu1 }
 0x56a   :  { %4435 = vmatpush3.bf16.msra.mxu0 %v4687_v44  ;;  %v4709_v44 = vld [vmem:[%s5935_s9] ss:$8 sps:$4 sm:$0xff]  }
 0x5df   :  { %v1250_v19 = vpop.f32.mrf.mxu0  ;;  %v1296_v20 = vpop.f32.mrf.mxu1 }
 0x5e0   :  { %v4618_v22 = vpack.i.bf16 %v1296_v20, %v1250_v19 }
 0x5e1   :  { %v4388_v23 = vpop.f32.mrf.mxu0  ;;  %v4394_v24 = vpop.f32.mrf.mxu1 }
 0x5e2   :  { %4619 = vrot.lane.b32.xlu1 %v4618_v22, %s5212_s11  ;;  %v4688_v23 = vld [vmem:[%s5935_s9 + $0x70] ss:$8 sps:$4 sm:$0xff]   ;;  %v4690_v24 = vld [vmem:[%s5935_s9 + $0x74] ss:$8 sps:$4 sm:$0xff]  }
 0x5e3   :  { %v1253_v28 = vpop.f32.mrf.mxu0  ;;  %v1299_v29 = vpop.f32.mrf.mxu1  ;;  %1740 = vmatprep.subr.bf16.mxu1 %v4690_v24 }
 0x5e4   :  { %1741 = vmatpush1.bf16.msra.mxu1 %v4688_v23 }
 0x5e5   :  { %v4389_v26 = vpop.f32.mrf.mxu0  ;;  %v4395_v30 = vpop.f32.mrf.mxu1 }
 0x5e7   :  { %v1342_v32 = vpop.f32.mrf.mxu0  ;;  %v1388_v33 = vpop.f32.mrf.mxu1 }
 0x5e8   :  { %v4623_v34 = vpack.i.bf16 %v1388_v33, %v1342_v32  ;;  %v4693_v32 = vld [vmem:[%s5935_s9 + $0x64] ss:$8 sps:$4 sm:$0xff]   ;;  %v4691_v33 = vld [vmem:[%s5935_s9 + $0x60] ss:$8 sps:$4 sm:$0xff]  }
 0x5e9   :  { %v4400_v35 = vpop.f32.mrf.mxu0  ;;  %v4406_v36 = vpop.f32.mrf.mxu1  ;;  %1742 = vmatprep.subr.bf16.mxu1 %v4693_v32 }
 0x5ea   :  { %4624 = vrot.lane.b32.xlu0 %v4623_v34, %s5194_s19  ;;  %1743 = vmatpush1.bf16.msra.mxu1 %v4691_v33  ;;  %v4696_v34 = vld [vmem:[%s5935_s9 + $0x54] ss:$8 sps:$4 sm:$0xff]   ;;  %v4694_v35 = vld [vmem:[%s5935_s9 + $0x50] ss:$8 sps:$4 sm:$0xff]   ;;  %v4697_v36 = vld [vmem:[%s5935_s9 + $0x40] ss:$8 sps:$4 sm:$0xff]  }
 0x5eb   :  { %v1345_v38 = vpop.f32.mrf.mxu0  ;;  %v1391_v39 = vpop.f32.mrf.mxu1  ;;  %1744 = vmatprep.subr.bf16.mxu1 %v4696_v34 }
 0x5ec   :  { %v4702_v38 = vld [vmem:[%s5935_s9 + $0x34] ss:$8 sps:$4 sm:$0xff]   ;;  %v4700_v39 = vld [vmem:[%s5935_s9 + $0x30] ss:$8 sps:$4 sm:$0xff]  }
 0x5ed   :  { %v4401_v40 = vpop.f32.mrf.mxu0  ;;  %v4407_v41 = vpop.f32.mrf.mxu1 }
 0x5ee   :  { %1745 = vmatpush1.bf16.msra.mxu1 %v4694_v35  ;;  %v4705_v40 = vld [vmem:[%s5935_s9 + $0x24] ss:$8 sps:$4 sm:$0xff]   ;;  %v4703_v41 = vld [vmem:[%s5935_s9 + $0x20] ss:$8 sps:$4 sm:$0xff]  }
 0x5ef   :  { %1746 = vmatprep.subr.bf16.mxu1 %v4699_v37 }
 0x5f2   :  { %1747 = vmatpush1.bf16.msra.mxu1 %v4697_v36 }
 0x5f3   :  { %1748 = vmatprep.subr.bf16.mxu1 %v4702_v38 }
 0x5f6   :  { %1749 = vmatpush1.bf16.msra.mxu1 %v4700_v39 }
 0x5f7   :  { %1750 = vmatprep.subr.bf16.mxu1 %v4705_v40 }
 0x5fa   :  { %1751 = vmatpush1.bf16.msra.mxu1 %v4703_v41 }
 0x5fb   :  { %1752 = vmatprep.subr.bf16.mxu1 %v4708_v42 }
 0x5fe   :  { %1753 = vmatpush1.bf16.msra.mxu1 %v4706_v43 }
 0x5ff   :  { %1754 = vmatprep.subr.bf16.mxu1 %v4711_v14 }
 0x602   :  { %1755 = vmatpush1.bf16.msra.mxu1 %v4709_v44 }
 0x60d   :  { %v1434_v45 = vpop.f32.mrf.mxu0 }
 0x60f   :  { %v4412_v46 = vpop.f32.mrf.mxu0 }
 0x611   :  { %v1437_v47 = vpop.f32.mrf.mxu0 }
 0x613   :  { %v4413_v48 = vpop.f32.mrf.mxu0 }
 0x615   :  { %v1480_v49 = vpop.f32.mrf.mxu1 }
 0x616   :  { %v4628_v52 = vpack.i.bf16 %v1480_v49, %v1434_v45 }
 0x617   :  { %v4418_v53 = vpop.f32.mrf.mxu1 }
 0x618   :  { %4629 = vrot.lane.b32.xlu1 %v4628_v52, %s5211_s3 }
 0x619   :  { %v1483_v57 = vpop.f32.mrf.mxu1 }
 0x61b   :  { %v4419_v59 = vpop.f32.mrf.mxu1 }
 0x61c   :  { %v3965_v59 = vld [vmem:[#allocation11] ss:$0 sm:$0xff] }
 0x654   :  { %v4620_v60 = vpop.permute.xlu1 %4619 }
 0x655   :  { %v4622_v62 = vunpack.i.h.bf16 %v4620_v60  ;;  %v4621_v63 = vunpack.i.l.bf16 %v4620_v60 }
 0x657   :  { %v1511_v6 = vsel %vm651_vm1, %v5539_v13, %v4622_v62  ;;  %v1510_v3 = vsel %vm651_vm1, %v5537_v10, %v4621_v63  ;;  %v3966_v63 = vld [vmem:[#allocation13] ss:$0 sm:$0xff] }
 0x65c   :  { %v4625_v61 = vpop.permute.xlu0 %4624 }
 0x65d   :  { %v4627_v0 = vunpack.i.h.bf16 %v4625_v61  ;;  %v4626_v1 = vunpack.i.l.bf16 %v4625_v61 }
 0x65f   :  { %v1513_v8 = vsel %vm1512_vm4, %v1510_v3, %v4626_v1  ;;  %v1514_v9 = vsel %vm1512_vm4, %v1511_v6, %v4627_v0  ;;  %v4712_v3 = vld [vmem:[#allocation14 + $0x78] sm:$0xff]  }
 0x660   :  { %4201 = vmatprep.subr.bf16.mxu0 %v4712_v3 }
 0x68a   :  { %v4630_v2 = vpop.permute.xlu1 %4629 }
 0x68b   :  { %v4632_v7 = vunpack.i.h.bf16 %v4630_v2  ;;  %v4631_v5 = vunpack.i.l.bf16 %v4630_v2 }
 0x68d   :  { %v1516_v11 = vsel %vm1515_vm5, %v1513_v8, %v4631_v5  ;;  %v1517_v12 = vsel %vm1515_vm5, %v1514_v9, %v4632_v7  ;;  %v4713_v7 = vld [vmem:[#allocation14 + $0x38] sm:$0xff]   ;;  %v4714_v5 = vld [vmem:[#allocation14 + $0x70] sm:$0xff]   ;;  %v4716_v9 = vld [vmem:[#allocation14 + $0x68] sm:$0xff]  }
 0x68e   :  { %v1518_v15 = vpack.c.bf16 %v1517_v12, %v1516_v11  ;;  %v4715_v8 = vld [vmem:[#allocation14 + $0x30] sm:$0xff]   ;;  %v4717_v11 = vld [vmem:[#allocation14 + $0x28] sm:$0xff]   ;;  %v4718_v12 = vld [vmem:[#allocation14 + $0x60] sm:$0xff]  }
 0x690   :  { %4437 = vmatmul.mubr.bf16.vlgmr.msra.gmra.mxu0 %v1518_v15  ;;  %v4719_v15 = vld [vmem:[#allocation14 + $0x20] sm:$0xff]  }
 0x691   :  { %4202 = vmatpush3.bf16.msra.mxu0 %v4713_v7 }
 0x692   :  { %4203 = vmatprep.subr.bf16.mxu0 %v4714_v5 }
 0x695   :  { %4204 = vmatpush3.bf16.msra.mxu0 %v4715_v8 }
 0x696   :  { %4205 = vmatprep.subr.bf16.mxu0 %v4716_v9 }
 0x699   :  { %4206 = vmatpush3.bf16.msra.mxu0 %v4717_v11 }
 0x69a   :  { %4207 = vmatprep.subr.bf16.mxu0 %v4718_v12 }
 0x69d   :  { %4208 = vmatpush3.bf16.msra.mxu0 %v4719_v15 }
 0x750   :  { %v1605_v17 = vpop.f32.mrf.mxu0 }
 0x751   :  { %v1606_v18 = vadd.f32 %v3956_v16, %v1605_v17  ;;  %v4721_v17 = vld [vmem:[#allocation14 + $0x18] sm:$0xff]  }
 0x752   :  { %v4438_v19 = vpop.f32.mrf.mxu0 }
 0x753   :  { %v1612_v13 = vadd.f32 %v1606_v18, %v5373_v50  ;;  %v4722_v18 = vld [vmem:[#allocation14 + $0x50] sm:$0xff]  }
 0x754   :  { %v1608_v20 = vpop.f32.mrf.mxu0  ;;  %v4723_v19 = vld [vmem:[#allocation14 + $0x10] sm:$0xff]  }
 0x755   :  { %v1609_v10 = vadd.f32 %v3956_v16, %v1608_v20  ;;  %1614 = vadd.xlane.f32.xlu0 %v1612_v13  ;;  %v4720_v16 = vld [vmem:[#allocation14 + $0x58] sm:$0xff]   ;;  %v4725_v20 = vld [vmem:[#allocation14 + $0x8] sm:$0xff]  }
 0x756   :  { %v4439_v21 = vpop.f32.mrf.mxu0  ;;  %4209 = vmatprep.subr.bf16.mxu0 %v4720_v16 }
 0x757   :  { %v1613_v22 = vadd.f32 %v1609_v10, %v5375_v51  ;;  %4210 = vmatpush3.bf16.msra.mxu0 %v4721_v17  ;;  %v4726_v10 = vld [vmem:[#allocation14 + $0x40] sm:$0xff]  }
 0x758   :  { %4211 = vmatprep.subr.bf16.mxu0 %v4722_v18  ;;  %v4727_v21 = vld [vmem:[#allocation14] sm:$0xff]  }
 0x759   :  { %1616 = vadd.xlane.f32.xlu1 %v1613_v22  ;;  %v3983_v18 = vld [vmem:[#allocation16] ss:$0 sm:$0xff] }
 0x75b   :  { %4212 = vmatpush3.bf16.msra.mxu0 %v4723_v19 }
 0x7de   :  { %v1615_v25 = vpop.xlane.xlu0 %1614 }
 0x7df   :  { %v1618_v28 = vmul.f32 0.0078125, %v1615_v25 }
 0x7e1   :  { %v1620_v50 = vsub.f32 %v1612_v13, %v1618_v28  ;;  %v4724_v13 = vld [vmem:[#allocation14 + $0x48] sm:$0xff]  }
 0x7e2   :  { %v1617_v29 = vpop.xlane.xlu1 %1616  ;;  %4213 = vmatprep.subr.bf16.mxu0 %v4724_v13 }
 0x7e3   :  { %v1619_v26 = vmul.f32 0.0078125, %v1617_v29  ;;  %v1622_v30 = vmul.f32 %v1620_v50, %v1620_v50  ;;  %4214 = vmatpush3.bf16.msra.mxu0 %v4725_v20 }
 0x7e4   :  { %4215 = vmatprep.subr.bf16.mxu0 %v4726_v10 }
 0x7e5   :  { %v1621_v31 = vsub.f32 %v1613_v22, %v1619_v26  ;;  %1624 = vadd.xlane.f32.xlu0 %v1622_v30  ;;  %v314_v22 = vld [vmem:[%s5936_s10] ss:$2 sm:$0x3] }
 0x7e6   :  { %v1653_v23 = vrot.slane %v314_v22, %v5389_v56  ;;  %v1657_v24 = vrot.slane %v314_v22, %v5386_v55 }
 0x7e7   :  { %v1623_v51 = vmul.f32 %v1621_v31, %v1621_v31  ;;  %4216 = vmatpush3.bf16.msra.mxu0 %v4727_v21 }
 0x7e8   :  { %4440 = vmatprep.subr.bf16.mxu0 %v5208_v4 }
 0x7e9   :  { %1626 = vadd.xlane.f32.xlu0 %v1623_v51 }
 0x86e   :  { %v1625_v45 = vpop.xlane.xlu0 %1624 }
 0x86f   :  { %v1628_v46 = vmul.f32 0.0078125, %v1625_v45 }
 0x871   :  { %v1630_v47 = vadd.f32 1e-12, %v1628_v46 }
 0x872   :  { %v1627_v48 = vpop.xlane.xlu0 %1626 }
 0x873   :  { %4852 = vrsqrt.f32 %v1630_v47  ;;  %v1629_v49 = vmul.f32 0.0078125, %v1627_v48 }
 0x875   :  { %v1631_v52 = vadd.f32 1e-12, %v1629_v49 }
 0x877   :  { %4854 = vrsqrt.f32 %v1631_v52 }
 0x880   :  { %v4853_v53 = vpop.eup %4852 }
 0x881   :  { %v1634_v57 = vmul.f32 %v4853_v53, %v1620_v50 }
 0x883   :  { %v1640_v62 = vmul.f32 %v3965_v59, %v1634_v57 }
 0x884   :  { %v4855_v60 = vpop.eup %4854 }
 0x885   :  { %v1635_v61 = vmul.f32 %v4855_v60, %v1621_v31  ;;  %v5609_v1 = vadd.f32 %v3966_v63, %v1640_v62 }
 0x887   :  { %v1641_v0 = vmul.f32 %v3965_v59, %v1635_v61 }
 0x889   :  { %v5611_v2 = vadd.f32 %v3966_v63, %v1641_v0 }
 0x88b   :  { %v1648_v6 = vpack.c.bf16 %v5611_v2, %v5609_v1 }
 0x88d   :  { %1773 = vmatmul.mubr.bf16.vlgmr.msra.gmra.mxu1 %v1648_v6 }
 0x88e   :  { %2285 = vmatprep.mubr.bf16.mxu1 %v5209_v27 }
 0x94d   :  { %v1774_v25 = vpop.f32.mrf.mxu1 }
 0x94e   :  { %v1775_v28 = vadd.f32 %v1774_v25, %v1653_v23 }
 0x94f   :  { %v1776_v50 = vpop.f32.mrf.mxu1 }
 0x950   :  { %v1787_v29 = vmul.f32 0.044715, %v1775_v28  ;;  %v1777_v26 = vadd.f32 %v1776_v50, %v1657_v24  ;;  %v1783_v5 = vmul.f32 0.5, %v1775_v28  ;;  %v4730_v50 = vld [vmem:[#allocation7 + $0x16c] ss:$12 sps:$4 sm:$0xff]  }
 0x951   :  { %v1778_v30 = vpop.f32.mrf.mxu1  ;;  %2253 = vmatprep.subr.bf16.mxu1 %v4730_v50 }
 0x952   :  { %v1791_v31 = vmul.f32 %v1787_v29, %v1775_v28  ;;  %v1788_v51 = vmul.f32 0.044715, %v1777_v26  ;;  %v1779_v32 = vadd.f32 %v1778_v30, %v1653_v23  ;;  %v1784_v6 = vmul.f32 0.5, %v1777_v26  ;;  %v4731_v29 = vld [vmem:[#allocation7 + $0x170] ss:$12 sps:$4 sm:$0xff]  }
 0x953   :  { %v1780_v33 = vpop.f32.mrf.mxu1 }
 0x954   :  { %v1795_v34 = vmul.f32 %v1791_v31, %v1775_v28  ;;  %v1792_v35 = vmul.f32 %v1788_v51, %v1777_v26  ;;  %v1789_v36 = vmul.f32 0.044715, %v1779_v32  ;;  %v1781_v37 = vadd.f32 %v1780_v33, %v1657_v24 }
 0x955   :  { %v1785_v63 = vmul.f32 0.5, %v1779_v32 }
 0x956   :  { %v1799_v38 = vadd.f32 %v1795_v34, %v1775_v28  ;;  %v1796_v39 = vmul.f32 %v1792_v35, %v1777_v26  ;;  %v1793_v40 = vmul.f32 %v1789_v36, %v1779_v32  ;;  %v1790_v41 = vmul.f32 0.044715, %v1781_v37  ;;  %v4728_v28 = vld [vmem:[#allocation7 + $0x168] ss:$12 sps:$4 sm:$0xff]   ;;  %v4732_v35 = vld [vmem:[#allocation7 + $0x150] ss:$12 sps:$4 sm:$0xff]  }
 0x957   :  { %v1786_v3 = vmul.f32 0.5, %v1781_v37  ;;  %2254 = vmatpush1.bf16.msra.mxu1 %v4728_v28  ;;  %v4734_v34 = vld [vmem:[#allocation7 + $0x154] ss:$12 sps:$4 sm:$0xff]   ;;  %v4735_v36 = vld [vmem:[#allocation7 + $0x158] ss:$12 sps:$4 sm:$0xff]  }
 0x958   :  { %v1797_v42 = vmul.f32 %v1793_v40, %v1779_v32  ;;  %v1794_v43 = vmul.f32 %v1790_v41, %v1781_v37  ;;  %v1800_v14 = vadd.f32 %v1796_v39, %v1777_v26  ;;  %v1803_v44 = vmul.f32 0.7978846, %v1799_v38  ;;  %2255 = vmatprep.subr.bf16.mxu1 %v4734_v34  ;;  %v4736_v38 = vld [vmem:[#allocation7 + $0x138] ss:$12 sps:$4 sm:$0xff]   ;;  %v4739_v39 = vld [vmem:[#allocation7 + $0x140] ss:$12 sps:$4 sm:$0xff]  }
 0x959   :  { %v4740_v40 = vld [vmem:[#allocation7 + $0x120] ss:$12 sps:$4 sm:$0xff]   ;;  %v4742_v41 = vld [vmem:[#allocation7 + $0x124] ss:$12 sps:$4 sm:$0xff]  }
 0x95a   :  { %v1801_v45 = vadd.f32 %v1797_v42, %v1779_v32  ;;  %v1798_v46 = vmul.f32 %v1794_v43, %v1781_v37  ;;  %v1804_v47 = vmul.f32 0.7978846, %v1800_v14  ;;  %v4743_v42 = vld [vmem:[#allocation7 + $0x128] ss:$12 sps:$4 sm:$0xff]   ;;  %v4746_v43 = vld [vmem:[#allocation7 + $0x10c] ss:$12 sps:$4 sm:$0xff]  }
 0x95b   :  { %2256 = vmatpush1.bf16.msra.mxu1 %v4732_v35  ;;  %v4744_v14 = vld [vmem:[#allocation7 + $0x108] ss:$12 sps:$4 sm:$0xff]  }
 0x95c   :  { %v1805_v48 = vmul.f32 0.7978846, %v1801_v45  ;;  %v1802_v49 = vadd.f32 %v1798_v46, %v1781_v37  ;;  %4856 = vtanh.f32 %v1804_v47  ;;  %v4738_v37 = vld [vmem:[#allocation7 + $0x13c] ss:$12 sps:$4 sm:$0xff]   ;;  %v4750_v45 = vld [vmem:[#allocation7 + $0xf4] ss:$12 sps:$4 sm:$0xff]  }
 0x95d   :  { %4858 = vtanh.f32 %v1803_v44  ;;  %2257 = vmatprep.subr.bf16.mxu1 %v4738_v37  ;;  %v4747_v44 = vld [vmem:[#allocation7 + $0x110] ss:$12 sps:$4 sm:$0xff]   ;;  %v4751_v47 = vld [vmem:[#allocation7 + $0xf8] ss:$12 sps:$4 sm:$0xff]  }
 0x95e   :  { %4860 = vtanh.f32 %v1805_v48  ;;  %v1806_v52 = vmul.f32 0.7978846, %v1802_v49  ;;  %v4748_v46 = vld [vmem:[#allocation7 + $0xf0] ss:$12 sps:$4 sm:$0xff]   ;;  %v4752_v49 = vld [vmem:[#allocation7 + $0xd8] ss:$12 sps:$4 sm:$0xff]  }
 0x95f   :  { %2258 = vmatpush1.bf16.msra.mxu1 %v4736_v38  ;;  %v4754_v48 = vld [vmem:[#allocation7 + $0xdc] ss:$12 sps:$4 sm:$0xff]  }
 0x960   :  { %4862 = vtanh.f32 %v1806_v52  ;;  %2259 = vmatprep.subr.bf16.mxu1 %v4742_v41  ;;  %v4755_v52 = vld [vmem:[#allocation7 + $0xe0] ss:$12 sps:$4 sm:$0xff]  }
 0x963   :  { %2260 = vmatpush1.bf16.msra.mxu1 %v4740_v40 }
 0x964   :  { %2261 = vmatprep.subr.bf16.mxu1 %v4746_v43 }
 0x967   :  { %2262 = vmatpush1.bf16.msra.mxu1 %v4744_v14 }
 0x968   :  { %2263 = vmatprep.subr.bf16.mxu1 %v4750_v45 }
 0x969   :  { %v4857_v53 = vpop.eup %4856 }
 0x96a   :  { %v4859_v57 = vpop.eup %4858  ;;  %v1812_v60 = vadd.f32 1.0, %v4857_v53  ;;  %v4758_v53 = vld [vmem:[#allocation7 + $0xc4] ss:$12 sps:$4 sm:$0xff]  }
 0x96b   :  { %v4861_v59 = vpop.eup %4860  ;;  %v1811_v0 = vadd.f32 1.0, %v4859_v57  ;;  %2264 = vmatpush1.bf16.msra.mxu1 %v4748_v46  ;;  %v4756_v57 = vld [vmem:[#allocation7 + $0xc0] ss:$12 sps:$4 sm:$0xff]  }
 0x96c   :  { %v1813_v61 = vadd.f32 1.0, %v4861_v59  ;;  %v1816_v9 = vmul.f32 %v1812_v60, %v1784_v6  ;;  %2265 = vmatprep.subr.bf16.mxu1 %v4754_v48  ;;  %v4759_v59 = vld [vmem:[#allocation7 + $0xc8] ss:$12 sps:$4 sm:$0xff]  }
 0x96d   :  { %v4863_v62 = vpop.eup %4862  ;;  %v1815_v12 = vmul.f32 %v1811_v0, %v1783_v5  ;;  %v4000_v5 = vld [vmem:[#allocation17] ss:$0 sm:$0xff] }
 0x96e   :  { %v1814_v7 = vadd.f32 1.0, %v4863_v62  ;;  %v1817_v8 = vmul.f32 %v1813_v61, %v1785_v63 }
 0x96f   :  { %2266 = vmatpush1.bf16.msra.mxu1 %v4752_v49 }
 0x970   :  { %v1818_v11 = vmul.f32 %v1814_v7, %v1786_v3  ;;  %v1819_v16 = vpack.c.bf16 %v1817_v8, %v1815_v12  ;;  %2267 = vmatprep.subr.bf16.mxu1 %v4758_v53  ;;  %v4001_v12 = vld [vmem:[#allocation19] ss:$0 sm:$0xff] }
 0x972   :  { %v1820_v15 = vpack.c.bf16 %v1818_v11, %v1816_v9 }
 0x973   :  { %2268 = vmatpush1.bf16.msra.mxu1 %v4756_v57 }
 0x974   :  { %1953 = vmatprep.mubr.bf16.mxu0 %v1820_v15  ;;  %4460 = vmatprep.subr.bf16.mxu1 %v5208_v4 }
 0x975   :  { %1954 = vmatmul.mubr.bf16.vlgmr.msra.gmra.mxu0 %v1819_v16 }
 0x976   :  { %4456 = vmatprep.mubr.msk.bf16.mxu0 %vm5210_vm0, %v5208_v4  ;;  %4441 = vmatpush3.bf16.msra.mxu0 %v4731_v29 }
 0x977   :  { %4442 = vmatprep.subr.bf16.mxu0 %v5208_v4 }
 0x97a   :  { %4443 = vmatpush3.bf16.msra.mxu0 %v4735_v36 }
 0x97b   :  { %4444 = vmatprep.subr.bf16.mxu0 %v5208_v4 }
 0x97e   :  { %4445 = vmatpush3.bf16.msra.mxu0 %v4739_v39 }
 0x97f   :  { %4446 = vmatprep.subr.bf16.mxu0 %v5208_v4 }
 0x982   :  { %4447 = vmatpush3.bf16.msra.mxu0 %v4743_v42 }
 0x983   :  { %4448 = vmatprep.subr.bf16.mxu0 %v5208_v4 }
 0x986   :  { %4449 = vmatpush3.bf16.msra.mxu0 %v4747_v44 }
 0x987   :  { %4450 = vmatprep.subr.bf16.mxu0 %v5208_v4 }
 0x98a   :  { %4451 = vmatpush3.bf16.msra.mxu0 %v4751_v47 }
 0x98b   :  { %4452 = vmatprep.subr.bf16.mxu0 %v5208_v4 }
 0x98e   :  { %4453 = vmatpush3.bf16.msra.mxu0 %v4755_v52 }
 0x98f   :  { %4454 = vmatprep.subr.bf16.mxu0 %v5208_v4 }
 0x992   :  { %4455 = vmatpush3.bf16.msra.mxu0 %v4759_v59 }
 0x993   :  { %4484 = vmatprep.subr.bf16.mxu0 %v5208_v4 }
 0xa35   :  { %v4217_v17 = vpop.f32.mrf.mxu0 }
 0xa37   :  { %v4218_v19 = vpop.f32.mrf.mxu0 }
 0xa38   :  { %v4219_v13 = vadd.f32 %v4218_v19, %v4217_v17  ;;  %v4002_v19 = vld [vmem:[%s5930_s4 + $0x3] sm:$0x7] }
 0xa39   :  { %v4220_v20 = vpop.f32.mrf.mxu0 }
 0xa3a   :  { %v1956_v10 = vadd.f32 %v4219_v13, %v3983_v18  ;;  %v2117_v13 = vrot.slane %v4002_v19, %v5386_v55 }
 0xa3b   :  { %v4221_v21 = vpop.f32.mrf.mxu0 }
 0xa3c   :  { %v4222_v22 = vadd.f32 %v4221_v21, %v4220_v20  ;;  %v1962_v23 = vadd.f32 %v1956_v10, %v5609_v1  ;;  %v2113_v20 = vrot.slane %v4002_v19, %v5389_v56 }
 0xa3e   :  { %v1959_v24 = vadd.f32 %v4222_v22, %v3983_v18  ;;  %1964 = vadd.xlane.f32.xlu0 %v1962_v23  ;;  %v2121_v22 = vrot.slane %v4002_v19, %v362_v58 }
 0xa40   :  { %v1963_v25 = vadd.f32 %v1959_v24, %v5611_v2 }
 0xa42   :  { %1966 = vadd.xlane.f32.xlu1 %v1963_v25 }
 0xac7   :  { %v1965_v26 = vpop.xlane.xlu0 %1964 }
 0xac8   :  { %v1968_v30 = vmul.f32 0.0078125, %v1965_v26 }
 0xaca   :  { %v5627_v31 = vsub.f32 %v1962_v23, %v1968_v30 }
 0xacb   :  { %v1967_v51 = vpop.xlane.xlu1 %1966 }
 0xacc   :  { %v1969_v32 = vmul.f32 0.0078125, %v1967_v51  ;;  %v1972_v1 = vmul.f32 %v5627_v31, %v5627_v31 }
 0xace   :  { %v5631_v33 = vsub.f32 %v1963_v25, %v1969_v32  ;;  %1974 = vadd.xlane.f32.xlu0 %v1972_v1 }
 0xad0   :  { %v1973_v2 = vmul.f32 %v5631_v33, %v5631_v33 }
 0xad2   :  { %1976 = vadd.xlane.f32.xlu1 %v1973_v2 }
 0xb57   :  { %v1975_v60 = vpop.xlane.xlu0 %1974 }
 0xb58   :  { %v1978_v61 = vmul.f32 0.0078125, %v1975_v60 }
 0xb5a   :  { %v1980_v62 = vadd.f32 1e-12, %v1978_v61 }
 0xb5b   :  { %v1977_v63 = vpop.xlane.xlu1 %1976 }
 0xb5c   :  { %4864 = vrsqrt.f32 %v1980_v62  ;;  %v1979_v0 = vmul.f32 0.0078125, %v1977_v63 }
 0xb5e   :  { %v1981_v6 = vadd.f32 1e-12, %v1979_v0 }
 0xb60   :  { %4866 = vrsqrt.f32 %v1981_v6 }
 0xb69   :  { %v4865_v3 = vpop.eup %4864 }
 0xb6a   :  { %v1984_v7 = vmul.f32 %v4865_v3, %v5627_v31 }
 0xb6c   :  { %v1990_v11 = vmul.f32 %v4000_v5, %v1984_v7 }
 0xb6d   :  { %v4867_v8 = vpop.eup %4866 }
 0xb6e   :  { %v1985_v9 = vmul.f32 %v4867_v8, %v5631_v33  ;;  %v5645_v16 = vadd.f32 %v4001_v12, %v1990_v11 }
 0xb70   :  { %v1991_v15 = vmul.f32 %v4000_v5, %v1985_v9 }
 0xb72   :  { %v5647_v17 = vadd.f32 %v4001_v12, %v1991_v15 }
 0xb74   :  { %v2108_v18 = vpack.c.bf16 %v5647_v17, %v5645_v16 }
 0xb76   :  { %2286 = vmatmul.mubr.bf16.vlgmr.msra.gmra.mxu1 %v2108_v18  ;;  %4457 = vmatmul.mubr.bf16.vlgmr.msra.gmra.mxu0 %v2108_v18 }
 0xb77   :  { %4462 = vmatprep.mubr.msk.bf16.mxu1 %vm5210_vm0, %v5208_v4  ;;  %4486 = vmatprep.mubr.msk.bf16.mxu0 %vm5210_vm0, %v5208_v4 }
 0xc36   :  { %v2287_v10 = vpop.f32.mrf.mxu1  ;;  %v2330_v21 = vpop.f32.mrf.mxu0 }
 0xc37   :  { %v2288_v28 = vadd.f32 %v2287_v10, %v2113_v20  ;;  %v5662_v26 = vadd.f32 %v2330_v21, %v2121_v22 }
 0xc38   :  { %v2289_v23 = vpop.f32.mrf.mxu1  ;;  %v4458_v24 = vpop.f32.mrf.mxu0 }
 0xc39   :  { %v2290_v25 = vadd.f32 %v2289_v23, %v2117_v13  ;;  %v4145_v36 = vpack.c.bf16 %v2288_v28, %v2288_v28  ;;  %v4149_v61 = vpack.c.bf16 %v5662_v26, %v5662_v26 }
 0xc3a   :  { %v2291_v50 = vpop.f32.mrf.mxu1  ;;  %v2333_v29 = vpop.f32.mrf.mxu0 }
 0xc3b   :  { %v4147_v30 = vpack.c.bf16 %v2290_v25, %v2290_v25  ;;  %v2292_v31 = vadd.f32 %v2291_v50, %v2113_v20  ;;  %v5664_v51 = vadd.f32 %v2333_v29, %v2121_v22  ;;  %v2877_v6 = vsel %vm1120_vm2, %v4149_v61, 0 }
 0xc3c   :  { %v2293_v32 = vpop.f32.mrf.mxu1  ;;  %v4459_v1 = vpop.f32.mrf.mxu0 }
 0xc3d   :  { %v2337_v33 = vpack.c.bf16 %v2292_v31, %v2288_v28  ;;  %v5668_v2 = vpack.c.bf16 %v5664_v51, %v5662_v26  ;;  %v2294_v54 = vadd.f32 %v2293_v32, %v2117_v13  ;;  %v2413_v58 = vsel %vm651_vm1, %v4147_v30, 0 }
 0xc3e   :  { %4461 = vmatpush3.bf16.xpose.msra.mxu1 %v2413_v58  ;;  %v4146_v38 = vpack.c.bf16 %v2292_v31, %v2292_v31  ;;  %v4150_v8 = vpack.c.bf16 %v5664_v51, %v5664_v51 }
 0xc3f   :  { %2341 = vrot.lane.b32.xlu1 %v2337_v33, %s5211_s3  ;;  %v2338_v34 = vpack.c.bf16 %v2294_v54, %v2290_v25  ;;  %4466 = vmatprep.subr.bf16.mxu1 %v5208_v4  ;;  %v4148_v35 = vpack.c.bf16 %v2294_v54, %v2294_v54 }
 0xc40   :  { %v2923_v11 = vsel %vm1120_vm2, %v4150_v8, 0 }
 0xc41   :  { %2364 = vrot.lane.b32.xlu0 %v2338_v34, %s5211_s3  ;;  %v2459_v37 = vsel %vm651_vm1, %v4148_v35, 0 }
 0xc43   :  { %2366 = vrot.lane.b32.xlu1 %v2338_v34, %s5194_s19 }
 0xc45   :  { %2368 = vrot.lane.b32.xlu0 %v2338_v34, %s5212_s11  ;;  %4463 = vmatmul.mubr.msk.bf16.vlgmr.msra.gmra.mxu1 %vm651_vm1, %v4145_v36 }
 0xc46   :  { %4467 = vmatpush3.bf16.xpose.msra.mxu1 %v2459_v37  ;;  %4468 = vmatprep.mubr.msk.bf16.mxu1 %vm5210_vm0, %v5208_v4 }
 0xc47   :  { %2343 = vrot.lane.b32.xlu1 %v2337_v33, %s5194_s19  ;;  %4472 = vmatprep.subr.bf16.mxu1 %v5208_v4 }
 0xc4b   :  { %2345 = vrot.lane.b32.xlu1 %v2337_v33, %s5212_s11 }
 0xc4d   :  { %4469 = vmatmul.mubr.msk.bf16.vlgmr.msra.gmra.mxu1 %vm651_vm1, %v4146_v38 }
 0xc4e   :  { %4474 = vmatprep.mubr.msk.bf16.mxu1 %vm5210_vm0, %v5208_v4 }
 0xcb1   :  { %v2342_v39 = vpop.permute.xlu1 %2341 }
 0xcb2   :  { %v4046_v49 = vcombine.low %v2342_v39, %v2342_v39  ;;  %v4047_v62 = vcombine.high %v2342_v39, %v2342_v39 }
 0xcb3   :  { %v2365_v40 = vpop.permute.xlu0 %2364 }
 0xcb4   :  { %v4054_v41 = vcombine.low %v2365_v40, %v2365_v40  ;;  %v4055_v46 = vcombine.high %v2365_v40, %v2365_v40 }
 0xcb5   :  { %v2367_v42 = vpop.permute.xlu1 %2366 }
 0xcb6   :  { %v4056_v43 = vcombine.low %v2367_v42, %v2367_v42  ;;  %v2505_v14 = vsel %vm651_vm1, %v4054_v41, 0  ;;  %v2551_v53 = vsel %vm651_vm1, %v4055_v46, 0  ;;  %v4057_v59 = vcombine.high %v2367_v42, %v2367_v42 }
 0xcb7   :  { %4473 = vmatpush3.bf16.xpose.msra.mxu1 %v2505_v14  ;;  %v2369_v45 = vpop.permute.xlu0 %2368 }
 0xcb8   :  { %v2597_v44 = vsel %vm651_vm1, %v4056_v43, 0  ;;  %4478 = vmatprep.subr.bf16.mxu1 %v5208_v4  ;;  %v4058_v48 = vcombine.low %v2369_v45, %v2369_v45  ;;  %v2643_v0 = vsel %vm651_vm1, %v4057_v59, 0  ;;  %v4059_v3 = vcombine.high %v2369_v45, %v2369_v45 }
 0xcb9   :  { %4485 = vmatpush3.bf16.xpose.msra.mxu0 %v2597_v44  ;;  %v2344_v47 = vpop.permute.xlu1 %2343 }
 0xcba   :  { %4496 = vmatprep.subr.bf16.mxu0 %v5208_v4  ;;  %v4048_v52 = vcombine.low %v2344_v47, %v2344_v47  ;;  %v2689_v57 = vsel %vm651_vm1, %v4058_v48, 0  ;;  %v4049_v7 = vcombine.high %v2344_v47, %v2344_v47  ;;  %v2735_v5 = vsel %vm651_vm1, %v4059_v3, 0 }
 0xcbd   :  { %v2346_v60 = vpop.permute.xlu1 %2345 }
 0xcbe   :  { %4475 = vmatmul.mubr.msk.bf16.vlgmr.msra.gmra.mxu1 %vm651_vm1, %v4046_v49  ;;  %v4050_v63 = vcombine.low %v2346_v60, %v2346_v60  ;;  %v4051_v9 = vcombine.high %v2346_v60, %v2346_v60 }
 0xcbf   :  { %4479 = vmatpush3.bf16.xpose.msra.mxu1 %v2551_v53  ;;  %4480 = vmatprep.mubr.msk.bf16.mxu1 %vm5210_vm0, %v5208_v4 }
 0xcc0   :  { %4487 = vmatmul.mubr.msk.bf16.vlgmr.msra.gmra.mxu0 %vm651_vm1, %v4048_v52  ;;  %4490 = vmatprep.subr.bf16.mxu1 %v5208_v4 }
 0xcc1   :  { %4497 = vmatpush3.bf16.xpose.msra.mxu0 %v2689_v57  ;;  %4498 = vmatprep.mubr.msk.bf16.mxu0 %vm5210_vm0, %v5208_v4 }
 0xcc2   :  { %4508 = vmatprep.subr.bf16.mxu0 %v5208_v4 }
 0xcc6   :  { %4481 = vmatmul.mubr.msk.bf16.vlgmr.msra.gmra.mxu1 %vm651_vm1, %v4047_v62 }
 0xcc7   :  { %4491 = vmatpush3.bf16.xpose.msra.mxu1 %v2643_v0  ;;  %4492 = vmatprep.mubr.msk.bf16.mxu1 %vm5210_vm0, %v5208_v4 }
 0xcc8   :  { %4499 = vmatmul.mubr.msk.bf16.vlgmr.msra.gmra.mxu0 %vm651_vm1, %v4050_v63  ;;  %4502 = vmatprep.subr.bf16.mxu1 %v5208_v4 }
 0xcc9   :  { %4509 = vmatpush3.bf16.msra.mxu0 %v2877_v6  ;;  %4510 = vmatprep.mubr.msk.bf16.mxu0 %vm5210_vm0, %v5208_v4 }
 0xcca   :  { %4520 = vmatprep.subr.bf16.mxu0 %v5208_v4 }
 0xcce   :  { %4493 = vmatmul.mubr.msk.bf16.vlgmr.msra.gmra.mxu1 %vm651_vm1, %v4049_v7 }
 0xccf   :  { %4503 = vmatpush3.bf16.xpose.msra.mxu1 %v2735_v5  ;;  %4504 = vmatprep.mubr.msk.bf16.mxu1 %vm5210_vm0, %v5208_v4 }
 0xcd0   :  { %4514 = vmatprep.subr.bf16.mxu1 %v5208_v4 }
 0xcd6   :  { %4505 = vmatmul.mubr.msk.bf16.vlgmr.msra.gmra.mxu1 %vm651_vm1, %v4051_v9 }
 0xcd7   :  { %4515 = vmatpush3.bf16.msra.mxu1 %v2923_v11  ;;  %4516 = vmatprep.mubr.msk.bf16.mxu1 %vm5210_vm0, %v5208_v4 }
 0xcd8   :  { %4526 = vmatprep.subr.bf16.mxu1 %v5208_v4 }
 0xd05   :  { %v2449_v12 = vpop.f32.mrf.mxu1 }
 0xd06   :  { %v2777_v15 = vsel %vm1020_vm3, %v2449_v12, -inf }
 0xd07   :  { %2778 = vmax.xlane.f32.xlu0 %v2777_v15  ;;  %v4464_v18 = vpop.f32.mrf.mxu1 }
 0xd09   :  { %v2452_v19 = vpop.f32.mrf.mxu1 }
 0xd0b   :  { %v4465_v13 = vpop.f32.mrf.mxu1 }
 0xd0d   :  { %v2495_v20 = vpop.f32.mrf.mxu1 }
 0xd0e   :  { %v2780_v10 = vsel %vm1020_vm3, %v2495_v20, -inf }
 0xd0f   :  { %v4470_v21 = vpop.f32.mrf.mxu1  ;;  %2781 = vmax.xlane.f32.xlu1 %v2780_v10 }
 0xd11   :  { %v2498_v22 = vpop.f32.mrf.mxu1 }
 0xd13   :  { %v4471_v23 = vpop.f32.mrf.mxu1 }
 0xd7e   :  { %v2541_v24 = vpop.f32.mrf.mxu1 }
 0xd7f   :  { %v2783_v25 = vsel %vm1020_vm3, %v2541_v24, -inf }
 0xd80   :  { %v2633_v28 = vpop.f32.mrf.mxu0  ;;  %2784 = vmax.xlane.f32.xlu0 %v2783_v25  ;;  %v4476_v50 = vpop.f32.mrf.mxu1 }
 0xd81   :  { %v2789_v35 = vsel %vm1020_vm3, %v2633_v28, -inf }
 0xd82   :  { %v4488_v29 = vpop.f32.mrf.mxu0  ;;  %v2544_v26 = vpop.f32.mrf.mxu1 }
 0xd84   :  { %v2636_v30 = vpop.f32.mrf.mxu0  ;;  %v4477_v31 = vpop.f32.mrf.mxu1 }
 0xd86   :  { %v4489_v51 = vpop.f32.mrf.mxu0  ;;  %v2587_v32 = vpop.f32.mrf.mxu1 }
 0xd87   :  { %v2786_v1 = vsel %vm1020_vm3, %v2587_v32, -inf }
 0xd88   :  { %v2725_v33 = vpop.f32.mrf.mxu0  ;;  %2787 = vmax.xlane.f32.xlu0 %v2786_v1  ;;  %v4482_v54 = vpop.f32.mrf.mxu1 }
 0xd89   :  { %v2795_v41 = vsel %vm1020_vm3, %v2725_v33, -inf }
 0xd8a   :  { %v4500_v58 = vpop.f32.mrf.mxu0  ;;  %v2590_v34 = vpop.f32.mrf.mxu1 }
 0xd8c   :  { %v2728_v36 = vpop.f32.mrf.mxu0  ;;  %v4483_v37 = vpop.f32.mrf.mxu1  ;;  %2790 = vmax.xlane.f32.xlu0 %v2789_v35 }
 0xd8e   :  { %v4501_v38 = vpop.f32.mrf.mxu0  ;;  %v5729_v39 = vpop.f32.mrf.mxu1 }
 0xd8f   :  { %v2792_v40 = vsel %vm1020_vm3, %v5729_v39, -inf }
 0xd90   :  { %v2779_v42 = vpop.xlane.xlu0 %2778  ;;  %2793 = vmax.xlane.f32.xlu1 %v2792_v40  ;;  %v4494_v43 = vpop.f32.mrf.mxu1  ;;  %2796 = vmax.xlane.f32.xlu0 %v2795_v41 }
 0xd91   :  { %v2801_v14 = vsub.f32 %v2449_v12, %v2779_v42 }
 0xd92   :  { %v2682_v44 = vpop.f32.mrf.mxu1 }
 0xd93   :  { %v2809_v45 = vmul.f32 1.442695, %v2801_v14 }
 0xd94   :  { %v4495_v46 = vpop.f32.mrf.mxu1 }
 0xd95   :  { %4868 = vpow2.f32 %v2809_v45 }
 0xd96   :  { %v5734_v47 = vpop.f32.mrf.mxu1 }
 0xd97   :  { %v2798_v48 = vsel %vm1020_vm3, %v5734_v47, -inf }
 0xd98   :  { %2799 = vmax.xlane.f32.xlu1 %v2798_v48  ;;  %v4506_v49 = vpop.f32.mrf.mxu1  ;;  %v2782_v52 = vpop.xlane.xlu1 %2781 }
 0xd99   :  { %v2802_v53 = vsub.f32 %v2495_v20, %v2782_v52 }
 0xd9a   :  { %v2774_v57 = vpop.f32.mrf.mxu1 }
 0xd9b   :  { %v2811_v59 = vmul.f32 1.442695, %v2802_v53 }
 0xd9c   :  { %v4507_v60 = vpop.f32.mrf.mxu1 }
 0xd9d   :  { %4870 = vpow2.f32 %v2811_v59 }
 0xda2   :  { %v4869_v61 = vpop.eup %4868 }
 0xda3   :  { %v2825_v62 = vsel %vm1020_vm3, %v4869_v61, 0.0 }
 0xda4   :  { %2826 = vadd.xlane.f32.xlu0 %v2825_v62 }
 0xdaa   :  { %v4871_v63 = vpop.eup %4870 }
 0xdab   :  { %v2828_v0 = vsel %vm1020_vm3, %v4871_v63, 0.0 }
 0xdac   :  { %2829 = vadd.xlane.f32.xlu1 %v2828_v0 }
 0xe09   :  { %v2785_v6 = vpop.xlane.xlu0 %2784 }
 0xe0a   :  { %v2803_v3 = vsub.f32 %v2541_v24, %v2785_v6 }
 0xe0c   :  { %v2813_v7 = vmul.f32 1.442695, %v2803_v3 }
 0xe0e   :  { %4872 = vpow2.f32 %v2813_v7 }
 0xe11   :  { %v2788_v5 = vpop.xlane.xlu0 %2787 }
 0xe12   :  { %v2804_v8 = vsub.f32 %v2587_v32, %v2788_v5 }
 0xe14   :  { %v2815_v9 = vmul.f32 1.442695, %v2804_v8 }
 0xe15   :  { %v2791_v11 = vpop.xlane.xlu0 %2790 }
 0xe16   :  { %4874 = vpow2.f32 %v2815_v9  ;;  %v2805_v12 = vsub.f32 %v2633_v28, %v2791_v11 }
 0xe18   :  { %v2817_v15 = vmul.f32 1.442695, %v2805_v12 }
 0xe19   :  { %v2797_v18 = vpop.xlane.xlu0 %2796  ;;  %v2794_v50 = vpop.xlane.xlu1 %2793 }
 0xe1a   :  { %4876 = vpow2.f32 %v2817_v15  ;;  %v2807_v19 = vsub.f32 %v2725_v33, %v2797_v18  ;;  %v2806_v1 = vsub.f32 %v5729_v39, %v2794_v50 }
 0xe1b   :  { %v4873_v13 = vpop.eup %4872 }
 0xe1c   :  { %v2821_v20 = vmul.f32 1.442695, %v2807_v19  ;;  %v2831_v10 = vsel %vm1020_vm3, %v4873_v13, 0.0  ;;  %v2819_v58 = vmul.f32 1.442695, %v2806_v1  ;;  %v4760_v1 = vld [vmem:[#allocation8 + $0x78] sm:$0xff]  }
 0xe1d   :  { %2832 = vadd.xlane.f32.xlu0 %v2831_v10 }
 0xe1e   :  { %4878 = vpow2.f32 %v2821_v20 }
 0xe21   :  { %v2800_v26 = vpop.xlane.xlu1 %2799 }
 0xe22   :  { %v2808_v34 = vsub.f32 %v5734_v47, %v2800_v26 }
 0xe23   :  { %v4875_v21 = vpop.eup %4874 }
 0xe24   :  { %v2834_v22 = vsel %vm1020_vm3, %v4875_v21, 0.0  ;;  %v2823_v36 = vmul.f32 1.442695, %v2808_v34 }
 0xe25   :  { %2835 = vadd.xlane.f32.xlu1 %v2834_v22 }
 0xe27   :  { %v5742_v23 = vpop.eup %4876 }
 0xe28   :  { %v2837_v24 = vsel %vm1020_vm3, %v5742_v23, 0.0 }
 0xe29   :  { %2838 = vadd.xlane.f32.xlu0 %v2837_v24 }
 0xe2b   :  { %v5746_v25 = vpop.eup %4878 }
 0xe2c   :  { %v2843_v28 = vsel %vm1020_vm3, %v5746_v25, 0.0 }
 0xe2d   :  { %2844 = vadd.xlane.f32.xlu0 %v2843_v28  ;;  %v2827_v29 = vpop.xlane.xlu0 %2826 }
 0xe2e   :  { %4880 = vrcp.f32 %v2827_v29 }
 0xe35   :  { %v2830_v30 = vpop.xlane.xlu1 %2829 }
 0xe36   :  { %4882 = vrcp.f32 %v2830_v30  ;;  %2389 = vrot.lane.b32.xlu1 %v5668_v2, %s5194_s19 }
 0xe37   :  { %4884 = vpow2.f32 %v2819_v58 }
 0xe38   :  { %4886 = vpow2.f32 %v2823_v36 }
 0xe3b   :  { %v4881_v31 = vpop.eup %4880 }
 0xe3c   :  { %v2857_v51 = vmul.f32 %v4881_v31, %v4869_v61 }
 0xe3e   :  { %v2865_v32 = vpack.c.bf16 %v2857_v51, %v2857_v51 }
 0xe40   :  { %4511 = vmatmul.mubr.msk.bf16.vlgmr.msra.gmra.mxu0 %vm1020_vm3, %v2865_v32 }
 0xe41   :  { %4522 = vmatprep.mubr.msk.bf16.mxu0 %vm5210_vm0, %v5208_v4 }
 0xe43   :  { %v4883_v33 = vpop.eup %4882  ;;  %2387 = vrot.lane.b32.xlu0 %v5668_v2, %s5211_s3 }
 0xe44   :  { %v2858_v54 = vmul.f32 %v4883_v33, %v4871_v63  ;;  %v5762_v37 = vpop.eup %4884  ;;  %v4761_v33 = vld [vmem:[#allocation8 + $0x70] sm:$0xff]  }
 0xe45   :  { %v2840_v38 = vsel %vm1020_vm3, %v5762_v37, 0.0  ;;  %v5766_v39 = vpop.eup %4886 }
 0xe46   :  { %v2866_v35 = vpack.c.bf16 %v2858_v54, %v2858_v54  ;;  %v2846_v40 = vsel %vm1020_vm3, %v5766_v39, 0.0  ;;  %v4762_v54 = vld [vmem:[#allocation8 + $0x68] sm:$0xff]  }
 0xe48   :  { %4517 = vmatmul.mubr.msk.bf16.vlgmr.msra.gmra.mxu1 %vm1020_vm3, %v2866_v35 }
 0xe49   :  { %4528 = vmatprep.mubr.msk.bf16.mxu1 %vm5210_vm0, %v5208_v4 }
 0xe5a   :  { %2841 = vadd.xlane.f32.xlu1 %v2840_v38 }
 0xe5e   :  { %2847 = vadd.xlane.f32.xlu1 %v2846_v40 }
 0xe6f   :  { %2391 = vrot.lane.b32.xlu1 %v5668_v2, %s5212_s11 }
 0xea6   :  { %v2833_v41 = vpop.xlane.xlu0 %2832 }
 0xea7   :  { %4888 = vrcp.f32 %v2833_v41 }
 0xeae   :  { %v2836_v42 = vpop.xlane.xlu1 %2835 }
 0xeaf   :  { %4890 = vrcp.f32 %v2836_v42  ;;  %v4764_v42 = vld [vmem:[#allocation8 + $0x58] sm:$0xff]  }
 0xeb2   :  { %v2839_v43 = vpop.xlane.xlu0 %2838  ;;  %v2390_v45 = vpop.permute.xlu1 %2389 }
 0xeb3   :  { %4892 = vrcp.f32 %v2839_v43  ;;  %v4064_v53 = vcombine.low %v2390_v45, %v2390_v45  ;;  %v4065_v57 = vcombine.high %v2390_v45, %v2390_v45 }
 0xeb4   :  { %v4889_v44 = vpop.eup %4888 }
 0xeb5   :  { %v2859_v49 = vmul.f32 %v4889_v44, %v4873_v13  ;;  %v3061_v0 = vsel %vm1120_vm2, %v4064_v53, 0  ;;  %v3107_v6 = vsel %vm1120_vm2, %v4065_v57, 0 }
 0xeb6   :  { %v2845_v14 = vpop.xlane.xlu0 %2844 }
 0xeb7   :  { %v2867_v61 = vpack.c.bf16 %v2859_v49, %v2859_v49  ;;  %4894 = vrcp.f32 %v2845_v14 }
 0xeba   :  { %v2388_v46 = vpop.permute.xlu0 %2387 }
 0xebb   :  { %v4062_v47 = vcombine.low %v2388_v46, %v2388_v46  ;;  %v4063_v48 = vcombine.high %v2388_v46, %v2388_v46  ;;  %v4765_v46 = vld [vmem:[#allocation8 + $0x50] sm:$0xff]  }
 0xebc   :  { %v4891_v52 = vpop.eup %4890 }
 0xebd   :  { %v2969_v59 = vsel %vm1120_vm2, %v4062_v47, 0  ;;  %v3015_v2 = vsel %vm1120_vm2, %v4063_v48, 0  ;;  %v2860_v60 = vmul.f32 %v4891_v52, %v4875_v21  ;;  %v4766_v47 = vld [vmem:[#allocation8 + $0x48] sm:$0xff]   ;;  %v4767_v52 = vld [vmem:[#allocation8 + $0x40] sm:$0xff]  }
 0xebe   :  { %4521 = vmatpush3.bf16.msra.mxu0 %v2969_v59  ;;  %4527 = vmatpush3.bf16.msra.mxu1 %v3015_v2 }
 0xebf   :  { %v2868_v62 = vpack.c.bf16 %v2860_v60, %v2860_v60  ;;  %4532 = vmatprep.subr.bf16.mxu0 %v5208_v4  ;;  %4538 = vmatprep.subr.bf16.mxu1 %v5208_v4 }
 0xec0   :  { %v4893_v63 = vpop.eup %4892 }
 0xec1   :  { %4523 = vmatmul.mubr.msk.bf16.vlgmr.msra.gmra.mxu0 %vm1020_vm3, %v2867_v61  ;;  %4529 = vmatmul.mubr.msk.bf16.vlgmr.msra.gmra.mxu1 %vm1020_vm3, %v2868_v62  ;;  %v2861_v3 = vmul.f32 %v4893_v63, %v5742_v23 }
 0xec2   :  { %4533 = vmatpush3.bf16.msra.mxu0 %v3061_v0  ;;  %4539 = vmatpush3.bf16.msra.mxu1 %v3107_v6 }
 0xec3   :  { %4534 = vmatprep.mubr.msk.bf16.mxu0 %vm5210_vm0, %v5208_v4  ;;  %4544 = vmatprep.subr.bf16.mxu0 %v5208_v4  ;;  %v2869_v7 = vpack.c.bf16 %v2861_v3, %v2861_v3 }
 0xec4   :  { %4540 = vmatprep.mubr.msk.bf16.mxu1 %vm5210_vm0, %v5208_v4  ;;  %4550 = vmatprep.subr.bf16.mxu1 %v5208_v4  ;;  %v4895_v9 = vpop.eup %4894 }
 0xec5   :  { %v2863_v15 = vmul.f32 %v4895_v9, %v5746_v25 }
 0xec7   :  { %v2871_v19 = vpack.c.bf16 %v2863_v15, %v2863_v15 }
 0xec9   :  { %4535 = vmatmul.mubr.msk.bf16.vlgmr.msra.gmra.mxu0 %vm1020_vm3, %v2869_v7 }
 0xeca   :  { %4546 = vmatprep.mubr.msk.bf16.mxu0 %vm5210_vm0, %v5208_v4 }
 0xee3   :  { %v2842_v5 = vpop.xlane.xlu1 %2841 }
 0xee4   :  { %4896 = vrcp.f32 %v2842_v5 }
 0xee7   :  { %v2848_v8 = vpop.xlane.xlu1 %2847 }
 0xee8   :  { %4898 = vrcp.f32 %v2848_v8 }
 0xeeb   :  { %v2392_v11 = vpop.permute.xlu1 %2391 }
 0xeec   :  { %v4066_v12 = vcombine.low %v2392_v11, %v2392_v11  ;;  %v4067_v20 = vcombine.high %v2392_v11, %v2392_v11 }
 0xeee   :  { %v3153_v18 = vsel %vm1120_vm2, %v4066_v12, 0  ;;  %v3199_v23 = vsel %vm1120_vm2, %v4067_v20, 0 }
 0xeef   :  { %4545 = vmatpush3.bf16.msra.mxu0 %v3153_v18 }
 0xef0   :  { %4556 = vmatprep.subr.bf16.mxu0 %v5208_v4 }
 0xef1   :  { %v4897_v13 = vpop.eup %4896 }
 0xef2   :  { %4547 = vmatmul.mubr.msk.bf16.vlgmr.msra.gmra.mxu0 %vm1020_vm3, %v2871_v19  ;;  %v2862_v10 = vmul.f32 %v4897_v13, %v5762_v37  ;;  %v4763_v37 = vld [vmem:[#allocation8 + $0x60] sm:$0xff]  }
 0xef3   :  { %4572 = vmatprep.mubr.msk.bf16.mxu0 %vm5210_vm0, %v5208_v4  ;;  %4557 = vmatpush3.bf16.msra.mxu0 %v4760_v1 }
 0xef4   :  { %v2870_v21 = vpack.c.bf16 %v2862_v10, %v2862_v10  ;;  %4558 = vmatprep.subr.bf16.mxu0 %v5208_v4 }
 0xef5   :  { %v4899_v22 = vpop.eup %4898 }
 0xef6   :  { %4541 = vmatmul.mubr.msk.bf16.vlgmr.msra.gmra.mxu1 %vm1020_vm3, %v2870_v21  ;;  %v2864_v24 = vmul.f32 %v4899_v22, %v5766_v39 }
 0xef7   :  { %4551 = vmatpush3.bf16.msra.mxu1 %v3199_v23  ;;  %4552 = vmatprep.mubr.msk.bf16.mxu1 %vm5210_vm0, %v5208_v4 }
 0xef8   :  { %v2872_v25 = vpack.c.bf16 %v2864_v24, %v2864_v24  ;;  %4559 = vmatpush3.bf16.msra.mxu0 %v4761_v33  ;;  %v4768_v33 = vld [vmem:[%s5935_s9 + $0xf0] ss:$8 sps:$4 sm:$0xff]  }
 0xef9   :  { %4560 = vmatprep.subr.bf16.mxu0 %v5208_v4 }
 0xefc   :  { %4561 = vmatpush3.bf16.msra.mxu0 %v4762_v54  ;;  %v4770_v54 = vld [vmem:[%s5935_s9 + $0xf4] ss:$8 sps:$4 sm:$0xff]  }
 0xefd   :  { %4562 = vmatprep.subr.bf16.mxu0 %v5208_v4  ;;  %3493 = vmatprep.subr.bf16.mxu1 %v4770_v54 }
 0xefe   :  { %4553 = vmatmul.mubr.msk.bf16.vlgmr.msra.gmra.mxu1 %vm1020_vm3, %v2872_v25 }
 0xeff   :  { %3525 = vmatprep.mubr.bf16.mxu1 %v5209_v27  ;;  %3494 = vmatpush1.bf16.msra.mxu1 %v4768_v33 }
 0xf00   :  { %v5804_v28 = vpop.f32.mrf.mxu0  ;;  %4563 = vmatpush3.bf16.msra.mxu0 %v4763_v37 }
 0xf01   :  { %4564 = vmatprep.subr.bf16.mxu0 %v5208_v4 }
 0xf02   :  { %v4512_v50 = vpop.f32.mrf.mxu0 }
 0xf03   :  { %v4084_v50 = vld [vmem:[#allocation10 + $0x1] ss:$0 sm:$0xff] }
 0xf04   :  { %v2916_v29 = vpop.f32.mrf.mxu0  ;;  %4565 = vmatpush3.bf16.msra.mxu0 %v4764_v42  ;;  %v4777_v42 = vld [vmem:[%s5935_s9 + $0xc0] ss:$8 sps:$4 sm:$0xff]  }
 0xf05   :  { %4566 = vmatprep.subr.bf16.mxu0 %v5208_v4 }
 0xf06   :  { %v4513_v26 = vpop.f32.mrf.mxu0 }
 0xf08   :  { %v5806_v30 = vpop.f32.mrf.mxu1  ;;  %4567 = vmatpush3.bf16.msra.mxu0 %v4765_v46  ;;  %v4783_v46 = vld [vmem:[%s5935_s9 + $0xa0] ss:$8 sps:$4 sm:$0xff]  }
 0xf09   :  { %4568 = vmatprep.subr.bf16.mxu0 %v5208_v4 }
 0xf0a   :  { %v4518_v31 = vpop.f32.mrf.mxu1 }
 0xf0c   :  { %v2962_v51 = vpop.f32.mrf.mxu1  ;;  %4569 = vmatpush3.bf16.msra.mxu0 %v4766_v47  ;;  %v4788_v47 = vld [vmem:[%s5935_s9 + $0x94] ss:$8 sps:$4 sm:$0xff]  }
 0xf0d   :  { %4570 = vmatprep.subr.bf16.mxu0 %v5208_v4 }
 0xf0e   :  { %v4519_v32 = vpop.f32.mrf.mxu1 }
 0xf10   :  { %4571 = vmatpush3.bf16.msra.mxu0 %v4767_v52  ;;  %v4789_v52 = vld [vmem:[%s5935_s9 + $0x80] ss:$8 sps:$4 sm:$0xff]  }
 0xf81   :  { %v3005_v27 = vpop.f32.mrf.mxu0  ;;  %v3051_v58 = vpop.f32.mrf.mxu1 }
 0xf82   :  { %v4633_v34 = vpack.i.bf16 %v3051_v58, %v3005_v27 }
 0xf83   :  { %v4524_v35 = vpop.f32.mrf.mxu0  ;;  %v4530_v36 = vpop.f32.mrf.mxu1 }
 0xf84   :  { %4634 = vrot.lane.b32.xlu1 %v4633_v34, %s5212_s11 }
 0xf85   :  { %v3008_v38 = vpop.f32.mrf.mxu0  ;;  %v3054_v39 = vpop.f32.mrf.mxu1 }
 0xf86   :  { %v4773_v38 = vld [vmem:[%s5935_s9 + $0xe4] ss:$8 sps:$4 sm:$0xff]   ;;  %v4771_v39 = vld [vmem:[%s5935_s9 + $0xe0] ss:$8 sps:$4 sm:$0xff]  }
 0xf87   :  { %v4525_v40 = vpop.f32.mrf.mxu0  ;;  %v4531_v41 = vpop.f32.mrf.mxu1  ;;  %3495 = vmatprep.subr.bf16.mxu1 %v4773_v38 }
 0xf88   :  { %3496 = vmatpush1.bf16.msra.mxu1 %v4771_v39  ;;  %v4776_v40 = vld [vmem:[%s5935_s9 + $0xd4] ss:$8 sps:$4 sm:$0xff]   ;;  %v4774_v41 = vld [vmem:[%s5935_s9 + $0xd0] ss:$8 sps:$4 sm:$0xff]  }
 0xf89   :  { %v3097_v43 = vpop.f32.mrf.mxu0  ;;  %3497 = vmatprep.subr.bf16.mxu1 %v4776_v40 }
 0xf8b   :  { %v4536_v14 = vpop.f32.mrf.mxu0 }
 0xf8c   :  { %3498 = vmatpush1.bf16.msra.mxu1 %v4774_v41  ;;  %v4782_v14 = vld [vmem:[%s5935_s9 + $0xb4] ss:$8 sps:$4 sm:$0xff]  }
 0xf8d   :  { %v3100_v44 = vpop.f32.mrf.mxu0 }
 0xf8e   :  { %v4780_v44 = vld [vmem:[%s5935_s9 + $0xb0] ss:$8 sps:$4 sm:$0xff]  }
 0xf8f   :  { %v4537_v45 = vpop.f32.mrf.mxu0 }
 0xf90   :  { %v4785_v45 = vld [vmem:[%s5935_s9 + $0xa4] ss:$8 sps:$4 sm:$0xff]  }
 0xfb2   :  { %v3189_v48 = vpop.f32.mrf.mxu0 }
 0xfb4   :  { %v4548_v49 = vpop.f32.mrf.mxu0 }
 0xfb5   :  { %v4791_v49 = vld [vmem:[%s5935_s9 + $0x84] ss:$8 sps:$4 sm:$0xff]  }
 0xfb6   :  { %v3143_v53 = vpop.f32.mrf.mxu1  ;;  %v3192_v57 = vpop.f32.mrf.mxu0 }
 0xfb7   :  { %v4638_v59 = vpack.i.bf16 %v3143_v53, %v3097_v43  ;;  %v4779_v43 = vld [vmem:[%s5935_s9 + $0xc4] ss:$8 sps:$4 sm:$0xff]  }
 0xfb8   :  { %v4542_v2 = vpop.f32.mrf.mxu1  ;;  %v4549_v60 = vpop.f32.mrf.mxu0  ;;  %3499 = vmatprep.subr.bf16.mxu1 %v4779_v43 }
 0xfb9   :  { %4639 = vrot.lane.b32.xlu0 %v4638_v59, %s5194_s19  ;;  %3500 = vmatpush1.bf16.msra.mxu1 %v4777_v42 }
 0xfba   :  { %v3146_v61 = vpop.f32.mrf.mxu1  ;;  %3501 = vmatprep.subr.bf16.mxu1 %v4782_v14 }
 0xfbc   :  { %v4543_v62 = vpop.f32.mrf.mxu1 }
 0xfbd   :  { %3502 = vmatpush1.bf16.msra.mxu1 %v4780_v44 }
 0xfbe   :  { %v3235_v63 = vpop.f32.mrf.mxu1  ;;  %3503 = vmatprep.subr.bf16.mxu1 %v4785_v45 }
 0xfbf   :  { %v4643_v0 = vpack.i.bf16 %v3235_v63, %v3189_v48  ;;  %v4786_v48 = vld [vmem:[%s5935_s9 + $0x90] ss:$8 sps:$4 sm:$0xff]  }
 0xfc0   :  { %v4554_v6 = vpop.f32.mrf.mxu1 }
 0xfc1   :  { %4644 = vrot.lane.b32.xlu1 %v4643_v0, %s5211_s3  ;;  %3504 = vmatpush1.bf16.msra.mxu1 %v4783_v46  ;;  %v4093_v0 = vld [vmem:[#allocation11 + $0x1] ss:$0 sm:$0xff] }
 0xfc2   :  { %v3238_v3 = vpop.f32.mrf.mxu1  ;;  %3505 = vmatprep.subr.bf16.mxu1 %v4788_v47 }
 0xfc4   :  { %v4555_v7 = vpop.f32.mrf.mxu1 }
 0xfc5   :  { %3506 = vmatpush1.bf16.msra.mxu1 %v4786_v48 }
 0xfc6   :  { %3507 = vmatprep.subr.bf16.mxu1 %v4791_v49 }
 0xfc9   :  { %3508 = vmatpush1.bf16.msra.mxu1 %v4789_v52 }
 0xfca   :  { %4576 = vmatprep.subr.bf16.mxu1 %v5208_v4 }
 0xff6   :  { %v4635_v5 = vpop.permute.xlu1 %4634 }
 0xff7   :  { %v4637_v9 = vunpack.i.h.bf16 %v4635_v5  ;;  %v4636_v11 = vunpack.i.l.bf16 %v4635_v5  ;;  %v4094_v5 = vld [vmem:[#allocation13 + $0x1] ss:$0 sm:$0xff] }
 0xff9   :  { %v3266_v19 = vsel %vm651_vm1, %v5806_v30, %v4637_v9  ;;  %v3265_v13 = vsel %vm651_vm1, %v5804_v28, %v4636_v11 }
0x102b   :  { %v4640_v8 = vpop.permute.xlu0 %4639 }
0x102c   :  { %v4642_v12 = vunpack.i.h.bf16 %v4640_v8  ;;  %v4641_v15 = vunpack.i.l.bf16 %v4640_v8 }
0x102e   :  { %v3267_v21 = vsel %vm1512_vm4, %v3265_v13, %v4641_v15  ;;  %v3268_v22 = vsel %vm1512_vm4, %v3266_v19, %v4642_v12  ;;  %v4792_v15 = vld [vmem:[#allocation14 + $0xf8] sm:$0xff]   ;;  %v4794_v19 = vld [vmem:[#allocation14 + $0xf0] sm:$0xff]  }
0x102f   :  { %4273 = vmatprep.subr.bf16.mxu0 %v4792_v15  ;;  %v4795_v13 = vld [vmem:[#allocation14 + $0xb0] sm:$0xff]  }
0x1033   :  { %v4645_v18 = vpop.permute.xlu1 %4644 }
0x1034   :  { %v4647_v20 = vunpack.i.h.bf16 %v4645_v18  ;;  %v4646_v10 = vunpack.i.l.bf16 %v4645_v18  ;;  %v4793_v18 = vld [vmem:[#allocation14 + $0xb8] sm:$0xff]  }
0x1036   :  { %v3269_v23 = vsel %vm1515_vm5, %v3267_v21, %v4646_v10  ;;  %v3270_v24 = vsel %vm1515_vm5, %v3268_v22, %v4647_v20  ;;  %v4796_v20 = vld [vmem:[#allocation14 + $0xe8] sm:$0xff]   ;;  %v4798_v21 = vld [vmem:[#allocation14 + $0xe0] sm:$0xff]  }
0x1037   :  { %v3271_v25 = vpack.c.bf16 %v3270_v24, %v3269_v23  ;;  %v4797_v10 = vld [vmem:[#allocation14 + $0xa8] sm:$0xff]   ;;  %v4799_v22 = vld [vmem:[#allocation14 + $0xa0] sm:$0xff]   ;;  %v4800_v23 = vld [vmem:[#allocation14 + $0xd8] sm:$0xff]  }
0x1038   :  { %v4801_v24 = vld [vmem:[#allocation14 + $0x98] sm:$0xff]  }
0x1039   :  { %4573 = vmatmul.mubr.bf16.vlgmr.msra.gmra.mxu0 %v3271_v25  ;;  %v4802_v25 = vld [vmem:[#allocation14 + $0xd0] sm:$0xff]  }
0x103a   :  { %4274 = vmatpush3.bf16.msra.mxu0 %v4793_v18 }
0x103b   :  { %4275 = vmatprep.subr.bf16.mxu0 %v4794_v19 }
0x103e   :  { %4276 = vmatpush3.bf16.msra.mxu0 %v4795_v13 }
0x103f   :  { %4277 = vmatprep.subr.bf16.mxu0 %v4796_v20 }
0x1042   :  { %4278 = vmatpush3.bf16.msra.mxu0 %v4797_v10  ;;  %v4111_v10 = vld [vmem:[#allocation16 + $0x1] ss:$0 sm:$0xff] }
0x1043   :  { %4279 = vmatprep.subr.bf16.mxu0 %v4798_v21 }
0x1046   :  { %4280 = vmatpush3.bf16.msra.mxu0 %v4799_v22 }
0x1047   :  { %4281 = vmatprep.subr.bf16.mxu0 %v4800_v23 }
0x104a   :  { %4282 = vmatpush3.bf16.msra.mxu0 %v4801_v24 }
0x104b   :  { %4283 = vmatprep.subr.bf16.mxu0 %v4802_v25 }
0x10f9   :  { %v3358_v29 = vpop.f32.mrf.mxu0 }
0x10fa   :  { %v3359_v26 = vadd.f32 %v4084_v50, %v3358_v29  ;;  %v4804_v29 = vld [vmem:[#allocation14 + $0xc8] sm:$0xff]  }
0x10fb   :  { %v4574_v31 = vpop.f32.mrf.mxu0 }
0x10fc   :  { %v3365_v30 = vadd.f32 %v3359_v26, %v5645_v16  ;;  %v4805_v26 = vld [vmem:[#allocation14 + $0x88] sm:$0xff]   ;;  %v4806_v31 = vld [vmem:[#allocation14 + $0xc0] sm:$0xff]  }
0x10fd   :  { %v3361_v51 = vpop.f32.mrf.mxu0 }
0x10fe   :  { %v3362_v28 = vadd.f32 %v4084_v50, %v3361_v51  ;;  %3367 = vadd.xlane.f32.xlu0 %v3365_v30  ;;  %v4803_v50 = vld [vmem:[#allocation14 + $0x90] sm:$0xff]  }
0x10ff   :  { %v4575_v32 = vpop.f32.mrf.mxu0  ;;  %4284 = vmatpush3.bf16.msra.mxu0 %v4803_v50  ;;  %v4019_v51 = vld [vmem:[%s5936_s10 + $0x1] ss:$2 sm:$0x3] }
0x1100   :  { %v3366_v1 = vadd.f32 %v3362_v28, %v5647_v17  ;;  %4285 = vmatprep.subr.bf16.mxu0 %v4804_v29  ;;  %v3406_v28 = vrot.slane %v4019_v51, %v5389_v56  ;;  %v3410_v32 = vrot.slane %v4019_v51, %v5386_v55 }
0x1102   :  { %3369 = vadd.xlane.f32.xlu1 %v3366_v1 }
0x1103   :  { %4286 = vmatpush3.bf16.msra.mxu0 %v4805_v26 }
0x1104   :  { %4287 = vmatprep.subr.bf16.mxu0 %v4806_v31 }
0x1187   :  { %v3368_v27 = vpop.xlane.xlu0 %3367 }
0x1188   :  { %v3371_v58 = vmul.f32 0.0078125, %v3368_v27 }
0x118a   :  { %v3373_v16 = vsub.f32 %v3365_v30, %v3371_v58  ;;  %v4807_v30 = vld [vmem:[#allocation14 + $0x80] sm:$0xff]  }
0x118b   :  { %v3370_v34 = vpop.xlane.xlu1 %3369  ;;  %4288 = vmatpush3.bf16.msra.mxu0 %v4807_v30 }
0x118c   :  { %v3372_v35 = vmul.f32 0.0078125, %v3370_v34  ;;  %v3375_v36 = vmul.f32 %v3373_v16, %v3373_v16 }
0x118e   :  { %v3374_v37 = vsub.f32 %v3366_v1, %v3372_v35  ;;  %3377 = vadd.xlane.f32.xlu0 %v3375_v36 }
0x1190   :  { %v3376_v17 = vmul.f32 %v3374_v37, %v3374_v37 }
0x1192   :  { %3379 = vadd.xlane.f32.xlu0 %v3376_v17 }
0x1217   :  { %v3378_v53 = vpop.xlane.xlu0 %3377 }
0x1218   :  { %v3381_v57 = vmul.f32 0.0078125, %v3378_v53 }
0x121a   :  { %v3383_v59 = vadd.f32 1e-12, %v3381_v57 }
0x121b   :  { %v3380_v2 = vpop.xlane.xlu0 %3379 }
0x121c   :  { %4900 = vrsqrt.f32 %v3383_v59  ;;  %v3382_v60 = vmul.f32 0.0078125, %v3380_v2 }
0x121e   :  { %v3384_v61 = vadd.f32 1e-12, %v3382_v60 }
0x1220   :  { %4902 = vrsqrt.f32 %v3384_v61 }
0x1229   :  { %v4901_v62 = vpop.eup %4900 }
0x122a   :  { %v3387_v63 = vmul.f32 %v4901_v62, %v3373_v16 }
0x122c   :  { %v3393_v7 = vmul.f32 %v4093_v0, %v3387_v63 }
0x122d   :  { %v4903_v6 = vpop.eup %4902 }
0x122e   :  { %v3388_v3 = vmul.f32 %v4903_v6, %v3374_v37  ;;  %v5877_v9 = vadd.f32 %v4094_v5, %v3393_v7 }
0x1230   :  { %v3394_v8 = vmul.f32 %v4093_v0, %v3388_v3 }
0x1232   :  { %v5879_v11 = vadd.f32 %v4094_v5, %v3394_v8 }
0x1234   :  { %v3401_v12 = vpack.c.bf16 %v5879_v11, %v5877_v9 }
0x1236   :  { %3526 = vmatmul.mubr.bf16.vlgmr.msra.gmra.mxu1 %v3401_v12 }
0x1237   :  { %4592 = vmatprep.mubr.msk.bf16.mxu1 %vm5210_vm0, %v5208_v4 }
0x12f6   :  { %v3527_v1 = vpop.f32.mrf.mxu1 }
0x12f7   :  { %v3528_v33 = vadd.f32 %v3527_v1, %v3406_v28 }
0x12f8   :  { %v3529_v54 = vpop.f32.mrf.mxu1 }
0x12f9   :  { %v3540_v27 = vmul.f32 0.044715, %v3528_v33  ;;  %v3530_v58 = vadd.f32 %v3529_v54, %v3410_v32  ;;  %v3536_v5 = vmul.f32 0.5, %v3528_v33 }
0x12fa   :  { %v3531_v16 = vpop.f32.mrf.mxu1 }
0x12fb   :  { %v3544_v34 = vmul.f32 %v3540_v27, %v3528_v33  ;;  %v3541_v35 = vmul.f32 0.044715, %v3530_v58  ;;  %v3532_v36 = vadd.f32 %v3531_v16, %v3406_v28  ;;  %v3537_v6 = vmul.f32 0.5, %v3530_v58  ;;  %v4811_v16 = vld [vmem:[%s5941_s15 + $0x20] sm:$0xff]  }
0x12fc   :  { %v3533_v37 = vpop.f32.mrf.mxu1 }
0x12fd   :  { %v3548_v17 = vmul.f32 %v3544_v34, %v3528_v33  ;;  %v3545_v38 = vmul.f32 %v3541_v35, %v3530_v58  ;;  %v3542_v39 = vmul.f32 0.044715, %v3532_v36  ;;  %v3534_v40 = vadd.f32 %v3533_v37, %v3410_v32  ;;  %v4812_v34 = vld [vmem:[%s5941_s15 + $0x18] sm:$0xff]   ;;  %v4813_v35 = vld [vmem:[%s5941_s15 + $0x10] sm:$0xff]   ;;  %v4815_v37 = vld [vmem:[%s5941_s15] sm:$0xff]  }
0x12fe   :  { %v3538_v63 = vmul.f32 0.5, %v3532_v36 }
0x12ff   :  { %v3552_v41 = vadd.f32 %v3548_v17, %v3528_v33  ;;  %v3549_v42 = vmul.f32 %v3545_v38, %v3530_v58  ;;  %v3546_v43 = vmul.f32 %v3542_v39, %v3532_v36  ;;  %v3543_v56 = vmul.f32 0.044715, %v3534_v40 }
0x1300   :  { %v3539_v3 = vmul.f32 0.5, %v3534_v40 }
0x1301   :  { %v3550_v14 = vmul.f32 %v3546_v43, %v3532_v36  ;;  %v3547_v55 = vmul.f32 %v3543_v56, %v3534_v40  ;;  %v3553_v44 = vadd.f32 %v3549_v42, %v3530_v58  ;;  %v3556_v45 = vmul.f32 0.7978846, %v3552_v41  ;;  %v4808_v58 = vld [vmem:[%s5941_s15 + $0x38] sm:$0xff]  }
0x1302   :  { %4577 = vmatpush3.bf16.msra.mxu1 %v4808_v58 }
0x1303   :  { %v3554_v46 = vadd.f32 %v3550_v14, %v3532_v36  ;;  %v3551_v47 = vmul.f32 %v3547_v55, %v3534_v40  ;;  %v3557_v48 = vmul.f32 0.7978846, %v3553_v44  ;;  %4578 = vmatprep.subr.bf16.mxu1 %v5208_v4  ;;  %v4814_v36 = vld [vmem:[%s5941_s15 + $0x8] sm:$0xff]  }
0x1304   :  { %v4128_v55 = vld [vmem:[#allocation17 + $0x1] ss:$0 sm:$0xff] }
0x1305   :  { %v3558_v49 = vmul.f32 0.7978846, %v3554_v46  ;;  %v3555_v52 = vadd.f32 %v3551_v47, %v3534_v40  ;;  %4904 = vtanh.f32 %v3557_v48  ;;  %v4129_v47 = vld [vmem:[#allocation19 + $0x1] ss:$0 sm:$0xff] }
0x1306   :  { %4906 = vtanh.f32 %v3556_v45 }
0x1307   :  { %4908 = vtanh.f32 %v3558_v49  ;;  %v3559_v53 = vmul.f32 0.7978846, %v3555_v52 }
0x1309   :  { %4910 = vtanh.f32 %v3559_v53 }
0x1312   :  { %v4905_v57 = vpop.eup %4904 }
0x1313   :  { %v4907_v59 = vpop.eup %4906  ;;  %v3565_v60 = vadd.f32 1.0, %v4905_v57  ;;  %v4130_v57 = vld [vmem:[#allocation20] ss:$0 sm:$0xff] }
0x1314   :  { %v4909_v2 = vpop.eup %4908  ;;  %v3564_v0 = vadd.f32 1.0, %v4907_v59 }
0x1315   :  { %v3566_v61 = vadd.f32 1.0, %v4909_v2  ;;  %v3569_v12 = vmul.f32 %v3565_v60, %v3537_v6 }
0x1316   :  { %v4911_v62 = vpop.eup %4910  ;;  %v3568_v18 = vmul.f32 %v3564_v0, %v3536_v5 }
0x1317   :  { %v3567_v7 = vadd.f32 1.0, %v4911_v62  ;;  %v3570_v8 = vmul.f32 %v3566_v61, %v3538_v63 }
0x1319   :  { %v3571_v15 = vmul.f32 %v3567_v7, %v3539_v3  ;;  %v3572_v13 = vpack.c.bf16 %v3570_v8, %v3568_v18 }
0x131b   :  { %v3573_v19 = vpack.c.bf16 %v3571_v15, %v3569_v12 }
0x131d   :  { %3706 = vmatprep.mubr.bf16.mxu0 %v3573_v19 }
0x131e   :  { %3707 = vmatmul.mubr.bf16.vlgmr.msra.gmra.mxu0 %v3572_v13 }
0x13de   :  { %v4289_v20 = vpop.f32.mrf.mxu0 }
0x13e0   :  { %v4290_v21 = vpop.f32.mrf.mxu0 }
0x13e1   :  { %v4291_v22 = vadd.f32 %v4290_v21, %v4289_v20 }
0x13e2   :  { %v4292_v23 = vpop.f32.mrf.mxu0 }
0x13e3   :  { %v3709_v24 = vadd.f32 %v4291_v22, %v4111_v10 }
0x13e4   :  { %v4293_v25 = vpop.f32.mrf.mxu0 }
0x13e5   :  { %v4294_v50 = vadd.f32 %v4293_v25, %v4292_v23  ;;  %v3715_v29 = vadd.f32 %v3709_v24, %v5877_v9  ;;  %v4809_v9 = vld [vmem:[%s5941_s15 + $0x30] sm:$0xff]  }
0x13e6   :  { %4579 = vmatpush3.bf16.msra.mxu1 %v4809_v9 }
0x13e7   :  { %v3712_v26 = vadd.f32 %v4294_v50, %v4111_v10  ;;  %3717 = vadd.xlane.f32.xlu1 %v3715_v29  ;;  %4580 = vmatprep.subr.bf16.mxu1 %v5208_v4 }
0x13e9   :  { %v3716_v31 = vadd.f32 %v3712_v26, %v5879_v11  ;;  %v4810_v11 = vld [vmem:[%s5941_s15 + $0x28] sm:$0xff]   ;;  %s5213_s15 = smov [#allocation22]  }
0x13ea   :  { %4581 = vmatpush3.bf16.msra.mxu1 %v4810_v11  ;;  %s3875_s13 = sshll.u32 %s5213_s15, 4  ;;  %s3876_s13 = int_to_ptr.vmem [resolvable:$true] %s3875_s13 }
0x13eb   :  { %3719 = vadd.xlane.f32.xlu0 %v3716_v31  ;;  %4582 = vmatprep.subr.bf16.mxu1 %v5208_v4  ;;  %s5156_s8 = scalar_lea.vmem %s3876_s13, 32  ;;  %p5161_p5 = scmp.lt.s32.totalorder %s3876_s13, %s3876_s13 }
0x13ec   :  { %p5157_p4 = scmp.ne.s32.totalorder %s3876_s13, %s5156_s8  ;;  %p5162_p6 = scmp.lt.s32.totalorder %s5156_s8, %s5156_s8 }
0x13ee   :  { %4583 = vmatpush3.bf16.msra.mxu1 %v4811_v16  ;;  %p5163_p7 = por %p5162_p6, %p5161_p5 }
0x13ef   :  { %4584 = vmatprep.subr.bf16.mxu1 %v5208_v4 }
0x13f0   :  { %p5164_p8 = pnand %p5163_p7, %p5157_p4 }
0x13f2   :  { %4585 = vmatpush3.bf16.msra.mxu1 %v4812_v34 }
0x13f3   :  { %4586 = vmatprep.subr.bf16.mxu1 %v5208_v4 }
0x13f6   :  { %4587 = vmatpush3.bf16.msra.mxu1 %v4813_v35 }
0x13f7   :  { %4588 = vmatprep.subr.bf16.mxu1 %v5208_v4 }
0x13fa   :  { %4589 = vmatpush3.bf16.msra.mxu1 %v4814_v36 }
0x13fb   :  { %4590 = vmatprep.subr.bf16.mxu1 %v5208_v4 }
0x13fe   :  { %4591 = vmatpush3.bf16.msra.mxu1 %v4815_v37 }
0x1470   :  { %v3718_v30 = vpop.xlane.xlu1 %3717 }
0x1471   :  { %v3721_v51 = vmul.f32 0.0078125, %v3718_v30 }
0x1473   :  { %v3723_v28 = vsub.f32 %v3715_v29, %v3721_v51 }
0x1474   :  { %v3720_v32 = vpop.xlane.xlu0 %3719 }
0x1475   :  { %v3722_v1 = vmul.f32 0.0078125, %v3720_v32  ;;  %v3725_v33 = vmul.f32 %v3723_v28, %v3723_v28 }
0x1477   :  { %v3724_v54 = vsub.f32 %v3716_v31, %v3722_v1  ;;  %3727 = vadd.xlane.f32.xlu1 %v3725_v33 }
0x1479   :  { %v3726_v27 = vmul.f32 %v3724_v54, %v3724_v54 }
0x147b   :  { %3729 = vadd.xlane.f32.xlu0 %v3726_v27 }
0x1500   :  { %v3728_v17 = vpop.xlane.xlu1 %3727 }
0x1501   :  { %v3731_v38 = vmul.f32 0.0078125, %v3728_v17 }
0x1503   :  { %v3733_v39 = vadd.f32 1e-12, %v3731_v38 }
0x1504   :  { %v3730_v40 = vpop.xlane.xlu0 %3729 }
0x1505   :  { %4912 = vrsqrt.f32 %v3733_v39  ;;  %v3732_v41 = vmul.f32 0.0078125, %v3730_v40 }
0x1507   :  { %v3734_v42 = vadd.f32 1e-12, %v3732_v41 }
0x1509   :  { %4914 = vrsqrt.f32 %v3734_v42 }
0x1512   :  { %v4913_v43 = vpop.eup %4912 }
0x1513   :  { %v3737_v56 = vmul.f32 %v4913_v43, %v3723_v28 }
0x1515   :  { %v3743_v45 = vmul.f32 %v4128_v55, %v3737_v56 }
0x1516   :  { %v4915_v14 = vpop.eup %4914 }
0x1517   :  { %v3738_v44 = vmul.f32 %v4915_v14, %v3724_v54  ;;  %v3749_v4 = vadd.f32 %v4129_v47, %v3743_v45 }
0x1519   :  { %v3744_v46 = vmul.f32 %v4128_v55, %v3738_v44 }
0x151b   :  { %v3750_v48 = vadd.f32 %v4129_v47, %v3744_v46 }
0x151d   :  { %v3752_v49 = vrot.slane %v3750_v48, 7 }
0x151f   :  { %v3755_v52 = vsel %vm3754_vm6, %v3749_v4, %v3752_v49 }
0x1520   :  { %v3756_v53 = vpack.c.bf16 %v3755_v52, %v3755_v52 }
0x1522   :  { %4593 = vmatmul.mubr.bf16.vlgmr.msra.gmra.mxu1 %v3756_v53 }
0x15e2   :  { %v3862_v59 = vpop.f32.mrf.mxu1 }
0x15e3   :  { %v3863_v2 = vadd.f32 %v4130_v57, %v3862_v59 }
0x15e4   :  { %v4594_v60 = vpop.f32.mrf.mxu1 }
0x15e5   :  { %3868 = vst [vmem:[#allocation22] sm:$0x3] %v3863_v2 }
0x15e6   :  { %v3865_v61 = vpop.f32.mrf.mxu1 }
0x15e7   :  { %5167 = shalt.err (!%p5164_p8)
}
0x15e8   :  { %3878 = dma.vmem_to_hbm [thread:$0]  %s3876_s13, 32, %s5943_s17, [#allocation4]   ;;  %v4595_v62 = vpop.f32.mrf.mxu1 }
0x15e9   :  { %5190 = dma.done.wait [#allocation4], 32  }
0x15ea   :  { %5191 = vsyncadd [#allocation4], 4294967264 }
0x15eb   :  { %3882 = vsyncpa [#allocation3], 1 }
0x15ec   :  { %3883 = vsyncpa [#allocation6], 1 }
0x15ed   :  { %3884 = vsyncpa [#allocation9], 1 }
0x15ee   :  { %3885 = vsyncpa [#allocation12], 1 }
0x15ef   :  { %3886 = vsyncpa [#allocation15], 1 }
0x15f0   :  { %3887 = vsyncpa [#allocation18], 1 }
0x15f1   :  { %3888 = vsyncpa [#allocation21], 1 }
0x15f2   :  { %3889 = vsyncpa [#allocation4], 1 }

</bundles_post_ra>
